<compile_context>
chip_gen: v7x
topology: tpu7x:2x2x1
jax: 0.10.0
libtpu: 0.0.40
codegen_flags: <defaults>
</compile_context>

<pallas_src>
import functools

import jax
import jax.numpy as jnp
from jax import lax
from jax.experimental import pallas as pl
from jax.experimental.pallas import tpu as pltpu


# ----------------------------------------------------------------------------
# helpers
# ----------------------------------------------------------------------------
def _largest_divisor(n, cap):
    for d in range(min(cap, n), 0, -1):
        if n % d == 0:
            return d
    return 1


def _round_up(x, m):
    return ((x + m - 1) // m) * m


def _im2col_5x5(x_nhwc, kh=5, kw=5):
    """XLA-level patch extraction for the FIRST conv only.

    cin=3 on the lane axis is pathological (3/128 useful lanes, K=3 MXU
    pushes), so each 5x5xCin patch is packed into a dense kh*kw*cin minor dim.
    Row order of the packed dim is (kh, kw, cin) to match the packed weight.
    """
    n, h, w, c = x_nhwc.shape
    ho, wo = h - kh + 1, w - kw + 1
    cols = []
    for i in range(kh):
        for j in range(kw):
            cols.append(lax.slice(x_nhwc, (0, i, j, 0), (n, i + ho, j + wo, c)))
    return jnp.concatenate(cols, axis=-1)          # (n, ho, wo, kh*kw*c)


# ----------------------------------------------------------------------------
# Kernel 1: conv1 (pre-im2col'd) + bias + PReLU + MaxPool2d(2, 2)
# Grid: (batch [parallel], pooled-row blocks [parallel]).
# ----------------------------------------------------------------------------
def _conv1_kernel(x_ref, w_ref, b_ref, a_ref, o_ref, pool_sc):
    """x_ref  : (2*RB, Wo, K)  bf16  im2col patches for this block's conv rows
       w_ref  : (K, 32)        bf16
       b_ref  : (1, 32)        f32
       a_ref  : (1, 32)        f32   PReLU slope broadcast over channels
       o_ref  : (RB, Wp, 32)   bf16  pooled output rows of this block
       pool_sc: (2*Wp, 32)     f32   scratch for the 2x2 column pool
    """
    rb, wp, _ = o_ref.shape
    wo_u = 2 * wp                       # conv columns actually consumed
    w = w_ref[...]
    bias = b_ref[...]
    alpha = a_ref[...]

    def body(r, carry):
        r0 = 2 * r                      # first of the two conv rows pooled
        p0 = x_ref[r0, pl.ds(0, wo_u), :]
        p1 = x_ref[r0 + 1, pl.ds(0, wo_u), :]
        # Stack the two pool rows on the sublane/M axis -> one tall MXU push.
        p = jnp.concatenate([p0, p1], axis=0)             # (2*Wo, K)
        z = jnp.dot(p, w, preferred_element_type=jnp.float32) + bias
        z = jnp.where(z > 0, z, alpha * z)                # PReLU in f32
        # 2x2 max pool: row pair first, then strided column pairs via scratch.
        pool_sc[...] = jnp.maximum(z[:wo_u], z[wo_u:])
        even = pool_sc[pl.ds(0, wp, stride=2), :]
        odd = pool_sc[pl.ds(1, wp, stride=2), :]
        o_ref[r, :, :] = jnp.maximum(even, odd).astype(o_ref.dtype)
        return carry

    lax.fori_loop(0, rb, body, 0)


def conv1_prelu_pool(patches, w, b, a, *, row_block_cap=32):
    """patches: (N, Ho, Wo, kh*kw*cin);  w: (kh*kw*cin, 32) bf16."""
    n, ho, wo, kdim = patches.shape
    c = w.shape[1]
    hp, wp = ho // 2, wo // 2
    rb = _largest_divisor(hp, row_block_cap)   # row tiling (no halo needed)
    return pl.pallas_call(
        _conv1_kernel,
        out_shape=jax.ShapeDtypeStruct((n, hp, wp, c), jnp.bfloat16),
        grid=(n, hp // rb),
        in_specs=[
            pl.BlockSpec((None, 2 * rb, wo, kdim), lambda i, r: (i, r, 0, 0)),
            pl.BlockSpec((kdim, c), lambda i, r: (0, 0)),
            pl.BlockSpec((1, c), lambda i, r: (0, 0)),
            pl.BlockSpec((1, c), lambda i, r: (0, 0)),
        ],
        out_specs=pl.BlockSpec((None, rb, wp, c), lambda i, r: (i, r, 0, 0)),
        scratch_shapes=[pltpu.VMEM((2 * wp, c), jnp.float32)],
        compiler_params=pltpu.CompilerParams(
            dimension_semantics=("parallel", "parallel"),
            vmem_limit_bytes=32 * 1024 * 1024,
        ),
    )(patches.astype(jnp.bfloat16), w, b, a)


# ----------------------------------------------------------------------------
# Kernel 2: conv2 (5x5 tap loop, K = real 32 channels) + bias + PReLU +
# MaxPool2d(2, 2).  Grid: (batch [parallel]); the intermediate is small.
# ----------------------------------------------------------------------------
def _conv2_kernel(x_ref, w_ref, b_ref, a_ref, o_ref, pool_sc, *, kh, kw):
    """x_ref  : (H1, W1, 32)    bf16  pooled conv1 output (one image)
       w_ref  : (kh*kw*32, 64)  bf16  rows ordered (kh, kw, cin)
       b_ref  : (1, 64)         f32
       a_ref  : (1, 64)         f32
       o_ref  : (Hp, Wp, 64)    bf16
       pool_sc: (2*Wp, 64)      f32
    """
    cin = x_ref.shape[-1]
    hp, wp, cout = o_ref.shape
    wo_u = 2 * wp
    bias = b_ref[...]
    alpha = a_ref[...]

    def body(r, carry):
        r0 = 2 * r
        acc = jnp.zeros((2 * wo_u, cout), jnp.float32)
        # In-VMEM patch gather; each tiny (32, 64) weight slice feeds a single
        # tall-M (2*Wo rows) matmul over real channels only.
        for i in range(kh):
            for j in range(kw):
                w_ij = w_ref[pl.ds((i * kw + j) * cin, cin), :]   # (32, 64)
                p0 = x_ref[r0 + i, pl.ds(j, wo_u), :]
                p1 = x_ref[r0 + 1 + i, pl.ds(j, wo_u), :]
                p = jnp.concatenate([p0, p1], axis=0)             # (2*Wo, 32)
                acc = acc + jnp.dot(p, w_ij,
                                    preferred_element_type=jnp.float32)
        z = acc + bias
        z = jnp.where(z > 0, z, alpha * z)
        pool_sc[...] = jnp.maximum(z[:wo_u], z[wo_u:])
        even = pool_sc[pl.ds(0, wp, stride=2), :]
        odd = pool_sc[pl.ds(1, wp, stride=2), :]
        o_ref[r, :, :] = jnp.maximum(even, odd).astype(o_ref.dtype)
        return carry

    lax.fori_loop(0, hp, body, 0)


def conv2_prelu_pool(x_nhwc, w, b, a, *, kh=5, kw=5):
    n, h1, w1, cin = x_nhwc.shape
    cout = w.shape[1]
    ho, wo = h1 - kh + 1, w1 - kw + 1
    hp, wp = ho // 2, wo // 2
    kernel = functools.partial(_conv2_kernel, kh=kh, kw=kw)
    return pl.pallas_call(
        kernel,
        out_shape=jax.ShapeDtypeStruct((n, hp, wp, cout), jnp.bfloat16),
        grid=(n,),
        in_specs=[
            pl.BlockSpec((None, h1, w1, cin), lambda i: (i, 0, 0, 0)),
            pl.BlockSpec((kh * kw * cin, cout), lambda i: (0, 0)),
            pl.BlockSpec((1, cout), lambda i: (0, 0)),
            pl.BlockSpec((1, cout), lambda i: (0, 0)),
        ],
        out_specs=pl.BlockSpec((None, hp, wp, cout), lambda i: (i, 0, 0, 0)),
        scratch_shapes=[pltpu.VMEM((2 * wp, cout), jnp.float32)],
        compiler_params=pltpu.CompilerParams(
            dimension_semantics=("parallel",),
            vmem_limit_bytes=32 * 1024 * 1024,
        ),
    )(x_nhwc.astype(jnp.bfloat16), w, b, a)


# ----------------------------------------------------------------------------
# Kernel 3: fused FC stack  (fc1 -> PReLU -> fc2 -> PReLU -> fc3)
# Grid: (M tiles [parallel], K tiles over fc1 in_features [arbitrary]).
# ----------------------------------------------------------------------------
def _fc_stack_kernel(x_ref, w1_ref, b1_ref, a1_ref, w2_ref, b2_ref, a2_ref,
                     w3_ref, b3_ref, o_ref, acc_ref):
    k = pl.program_id(1)

    @pl.when(k == 0)
    def _():
        acc_ref[...] = jnp.zeros_like(acc_ref)

    # fc1 partial product for this K slice (bf16 MXU, f32 accumulate).
    acc_ref[...] += jnp.dot(x_ref[...], w1_ref[...],
                            preferred_element_type=jnp.float32)

    @pl.when(k == pl.num_programs(1) - 1)
    def _():
        h = acc_ref[...] + b1_ref[...]
        h = jnp.where(h > 0, h, a1_ref[...] * h)
        h = jnp.dot(h.astype(jnp.bfloat16), w2_ref[...],
                    preferred_element_type=jnp.float32) + b2_ref[...]
        h = jnp.where(h > 0, h, a2_ref[...] * h)
        out = jnp.dot(h.astype(jnp.bfloat16), w3_ref[...],
                      preferred_element_type=jnp.float32) + b3_ref[...]
        o_ref[...] = out.astype(o_ref.dtype)


def _pick_tile_k(f, max_tk=8192):
    """Largest multiple-of-128 divisor of f that is <= max_tk (else f)."""
    if f <= max_tk:
        return f
    best = None
    t = 128
    while t <= max_tk:
        if f % t == 0:
            best = t
        t += 128
    return best if best is not None else f   # TODO(synk): ragged-K fallback


def fc_stack(feats, w1, b1, a1, w2, b2, a2, w3, b3):
    n, f = feats.shape
    # Big M tiles so the huge fc1 weight is re-streamed as few times as
    # possible (w1 is the dominant HBM traffic in this network).
    tile_m = min(128, _round_up(n, 8))
    n_pad = _round_up(n, tile_m)
    if n_pad != n:
        feats = jnp.pad(feats, ((0, n_pad - n), (0, 0)))
    d1 = w1.shape[1]
    d2 = w2.shape[1]
    e_pad = w3.shape[1]
    tk = _pick_tile_k(f)
    grid = (n_pad // tile_m, f // tk)

    out = pl.pallas_call(
        _fc_stack_kernel,
        out_shape=jax.ShapeDtypeStruct((n_pad, e_pad), jnp.float32),
        grid=grid,
        in_specs=[
            pl.BlockSpec((tile_m, tk), lambda m, k: (m, k)),   # activations
            pl.BlockSpec((tk, d1), lambda m, k: (k, 0)),       # fc1 w (K-tiled)
            pl.BlockSpec((1, d1), lambda m, k: (0, 0)),        # fc1 bias
            pl.BlockSpec((1, d1), lambda m, k: (0, 0)),        # PReLU3 slope
            pl.BlockSpec((d1, d2), lambda m, k: (0, 0)),       # fc2 weight
            pl.BlockSpec((1, d2), lambda m, k: (0, 0)),        # fc2 bias
            pl.BlockSpec((1, d2), lambda m, k: (0, 0)),        # PReLU4 slope
            pl.BlockSpec((d2, e_pad), lambda m, k: (0, 0)),    # fc3 weight
            pl.BlockSpec((1, e_pad), lambda m, k: (0, 0)),     # fc3 bias
        ],
        out_specs=pl.BlockSpec((tile_m, e_pad), lambda m, k: (m, 0)),
        scratch_shapes=[pltpu.VMEM((tile_m, d1), jnp.float32)],
        compiler_params=pltpu.CompilerParams(
            dimension_semantics=("parallel", "arbitrary"),
            vmem_limit_bytes=32 * 1024 * 1024,
        ),
    )(feats.astype(jnp.bfloat16), w1, b1, a1, w2, b2, a2, w3, b3)
    return out[:n]


# ----------------------------------------------------------------------------
# Parameters: canonical (PyTorch-equivalent) init + one-time kernel packing
# ----------------------------------------------------------------------------
def init_params(key, emsize, in_hw, grayscale=False):
    # NOTE: conv weights are kept as (KH, KW, Cin, Cout); when importing from
    # PyTorch ((Cout, Cin, KH, KW)) permute with (2, 3, 1, 0) first.  fc
    # weights are kept as (in_features, out_features) = PyTorch weight.T.
    cin = 1 if grayscale else 3
    h1 = (in_hw - 4) // 2            # after conv1 (5x5 valid) + pool
    h2 = (h1 - 4) // 2               # after conv2 (5x5 valid) + pool
    flat = 64 * h2 * h2
    ks = jax.random.split(key, 10)
    s = 0.05
    return dict(
        conv1_w=s * jax.random.normal(ks[0], (5, 5, cin, 32), jnp.float32),
        conv1_b=s * jax.random.normal(ks[1], (32,), jnp.float32),
        prelu1_a=jnp.float32(0.25),      # nn.PReLU() default single slope
        conv2_w=s * jax.random.normal(ks[2], (5, 5, 32, 64), jnp.float32),
        conv2_b=s * jax.random.normal(ks[3], (64,), jnp.float32),
        prelu2_a=jnp.float32(0.25),
        fc1_w=s * jax.random.normal(ks[4], (flat, 256), jnp.float32),
        fc1_b=s * jax.random.normal(ks[5], (256,), jnp.float32),
        prelu3_a=jnp.float32(0.25),
        fc2_w=s * jax.random.normal(ks[6], (256, 256), jnp.float32),
        fc2_b=s * jax.random.normal(ks[7], (256,), jnp.float32),
        prelu4_a=jnp.float32(0.25),
        fc3_w=s * jax.random.normal(ks[8], (256, emsize), jnp.float32),
        fc3_b=s * jax.random.normal(ks[9], (emsize,), jnp.float32),
    )


def pack_params(params, h2, w2):
    """One-time repack into kernel-friendly bf16 layouts (no channel pad)."""
    kh, kw, cin, c1 = params['conv1_w'].shape
    c2 = params['conv2_w'].shape[3]
    d1 = params['fc1_w'].shape[1]
    d2 = params['fc2_w'].shape[1]
    emsize = params['fc3_w'].shape[1]
    e_pad = _round_up(emsize, 128)
    f32 = jnp.float32
    bf16 = jnp.bfloat16

    # conv weights: flatten rows in (kh, kw, cin) order; real channel counts.
    c1_w = params['conv1_w'].reshape(kh * kw * cin, c1).astype(bf16)
    c2_w = params['conv2_w'].reshape(kh * kw * c1, c2).astype(bf16)

    # fc1: canonical rows follow PyTorch's NCHW flatten (c, h, w).  Fold the
    # NHWC->NCHW transpose into the weight once so the conv2 output can be
    # flattened directly (h, w, c) at runtime.  Rows stay at the real
    # h2*w2*64 features (no padding of the network's dominant tensor).
    w1 = params['fc1_w'].reshape(c2, h2, w2, d1)
    w1 = jnp.transpose(w1, (1, 2, 0, 3)).reshape(h2 * w2 * c2, d1)

    # fc3: pad the tiny output dim to 128 for a lane-dense final store.
    fc3_w = jnp.pad(params['fc3_w'], ((0, 0), (0, e_pad - emsize)))
    fc3_b = jnp.pad(params['fc3_b'], (0, e_pad - emsize))

    return dict(
        c1_w=c1_w, c1_b=params['conv1_b'].reshape(1, c1).astype(f32),
        a1=jnp.full((1, c1), params['prelu1_a'], f32),
        c2_w=c2_w, c2_b=params['conv2_b'].reshape(1, c2).astype(f32),
        a2=jnp.full((1, c2), params['prelu2_a'], f32),
        fc1_w=w1.astype(bf16),
        fc1_b=params['fc1_b'].reshape(1, d1).astype(f32),
        a3=jnp.full((1, d1), params['prelu3_a'], f32),
        fc2_w=params['fc2_w'].astype(bf16),
        fc2_b=params['fc2_b'].reshape(1, d2).astype(f32),
        a4=jnp.full((1, d2), params['prelu4_a'], f32),
        fc3_w=fc3_w.astype(bf16),
        fc3_b=fc3_b.reshape(1, e_pad).astype(f32),
    )


# ----------------------------------------------------------------------------
# Forward pass
# ----------------------------------------------------------------------------
def embedding_net_forward(packed, x_nchw, *, emsize):
    # NCHW (PyTorch convention) -> NHWC, then dense-K patch packing for conv1.
    x = jnp.transpose(x_nchw, (0, 2, 3, 1))
    patches = _im2col_5x5(x)                                   # (N, Ho, Wo, 75)
    y = conv1_prelu_pool(patches, packed['c1_w'], packed['c1_b'], packed['a1'])
    y = conv2_prelu_pool(y, packed['c2_w'], packed['c2_b'], packed['a2'])
    # Direct NHWC flatten; fc1_w was packed to match, so the original module's
    # NCHW view(N, -1) ordering is preserved without a runtime transpose.
    feats = y.reshape(y.shape[0], -1)
    out = fc_stack(feats,
                   packed['fc1_w'], packed['fc1_b'], packed['a3'],
                   packed['fc2_w'], packed['fc2_b'], packed['a4'],
                   packed['fc3_w'], packed['fc3_b'])
    return out[:, :emsize]


if __name__ == "__main__":
    key = jax.random.PRNGKey(0)
    kx, kp = jax.random.split(key)

    emsize = 32
    in_hw = 32                                   # small 32x32 RGB test images
    x = jax.random.normal(kx, (2, 3, in_hw, in_hw), jnp.float32)

    params = init_params(kp, emsize, in_hw, grayscale=False)
    h1 = (in_hw - 4) // 2
    h2 = (h1 - 4) // 2
    packed = pack_params(params, h2, h2)         # one-time, outside the jit

    fwd = jax.jit(functools.partial(embedding_net_forward, emsize=emsize))
    out = fwd(packed, x)
    out = jax.block_until_ready(out)
    assert out.shape == (2, emsize) and out.dtype == jnp.float32
    print("KERNEL_OK")
</pallas_src>

<mosaic_0001>
module attributes {stable_mosaic.version = 11 : i64} {
  func.func @_conv1_kernel(%arg0: i32, %arg1: i32, %arg2: memref<1x28x28x75xbf16, #tpu.memory_space<vmem>>, %arg3: memref<75x32xbf16, #tpu.memory_space<vmem>>, %arg4: memref<1x32xf32, #tpu.memory_space<vmem>>, %arg5: memref<1x32xf32, #tpu.memory_space<vmem>>, %arg6: memref<1x14x14x32xbf16, #tpu.memory_space<vmem>>, %arg7: memref<28x32xf32, #tpu.memory_space<vmem>>) attributes {dimension_semantics = [#tpu.dimension_semantics<parallel>, #tpu.dimension_semantics<parallel>], iteration_bounds = array<i64: 2, 1>, scalar_prefetch = 0 : i64, scratch_operands = 1 : i64, tpu.core_type = #tpu.core_type<tc>, window_params = [{transform_indices = @transform_0, window_bounds = array<i64: 1, 28, 28, 75>}, {pipeline_mode = #tpu.pipeline_mode<synchronous>, transform_indices = @transform_1, window_bounds = array<i64: 75, 32>}, {pipeline_mode = #tpu.pipeline_mode<synchronous>, transform_indices = @transform_2, window_bounds = array<i64: 1, 32>}, {pipeline_mode = #tpu.pipeline_mode<synchronous>, transform_indices = @transform_3, window_bounds = array<i64: 1, 32>}, {transform_indices = @transform_4, window_bounds = array<i64: 1, 14, 14, 32>}]} {
    %c0 = arith.constant 0 : index
    %c0_0 = arith.constant 0 : index
    %0 = vector.load %arg3[%c0, %c0_0] : memref<75x32xbf16, #tpu.memory_space<vmem>>, vector<75x32xbf16>
    %c0_1 = arith.constant 0 : index
    %c0_2 = arith.constant 0 : index
    %1 = vector.load %arg4[%c0_1, %c0_2] : memref<1x32xf32, #tpu.memory_space<vmem>>, vector<1x32xf32>
    %c0_3 = arith.constant 0 : index
    %c0_4 = arith.constant 0 : index
    %2 = vector.load %arg5[%c0_3, %c0_4] : memref<1x32xf32, #tpu.memory_space<vmem>>, vector<1x32xf32>
    %c0_i32 = arith.constant 0 : i32
    %c14_i32 = arith.constant 14 : i32
    %3 = arith.addi %c0_i32, %c14_i32 : i32
    %c1_i32 = arith.constant 1 : i32
    scf.for %arg8 = %c0_i32 to %3 step %c1_i32  : i32 {
      %c2_i32 = arith.constant 2 : i32
      %4 = arith.muli %c2_i32, %arg8 : i32
      %c0_6 = arith.constant 0 : index
      %5 = arith.index_cast %4 : i32 to index
      %c0_7 = arith.constant 0 : index
      %c0_8 = arith.constant 0 : index
      %6 = vector.load %arg2[%c0_6, %5, %c0_7, %c0_8] : memref<1x28x28x75xbf16, #tpu.memory_space<vmem>>, vector<1x1x28x75xbf16>
      %7 = vector.shape_cast %6 : vector<1x1x28x75xbf16> to vector<28x75xbf16>
      %c1_i32_9 = arith.constant 1 : i32
      %8 = arith.addi %4, %c1_i32_9 : i32
      %c0_10 = arith.constant 0 : index
      %9 = arith.index_cast %8 : i32 to index
      %c0_11 = arith.constant 0 : index
      %c0_12 = arith.constant 0 : index
      %10 = vector.load %arg2[%c0_10, %9, %c0_11, %c0_12] : memref<1x28x28x75xbf16, #tpu.memory_space<vmem>>, vector<1x1x28x75xbf16>
      %11 = vector.shape_cast %10 : vector<1x1x28x75xbf16> to vector<28x75xbf16>
      %12 = tpu.concatenate %7, %11 in 0 : vector<28x75xbf16>, vector<28x75xbf16> -> vector<56x75xbf16>
      %cst = arith.constant dense<0.000000e+00> : vector<56x32xf32>
      %13 = tpu.matmul %12, %0, %cst {dimension_numbers = #tpu.dot_dimension_numbers<[1], [0], [0], [1], [0, 0, 1, 1], [], []>} : vector<56x75xbf16>, vector<75x32xbf16>, vector<56x32xf32> -> vector<56x32xf32>
      %14 = vector.broadcast %1 : vector<1x32xf32> to vector<56x32xf32>
      %15 = arith.addf %13, %14 : vector<56x32xf32>
      %cst_13 = arith.constant 0.000000e+00 : f32
      %16 = vector.broadcast %cst_13 : f32 to vector<56x32xf32>
      %17 = arith.cmpf ogt, %15, %16 : vector<56x32xf32>
      %18 = vector.broadcast %2 : vector<1x32xf32> to vector<56x32xf32>
      %19 = arith.mulf %18, %15 : vector<56x32xf32>
      %20 = arith.select %17, %15, %19 : vector<56x32xi1>, vector<56x32xf32>
      %21 = vector.extract_strided_slice %20 {offsets = [0, 0], sizes = [28, 32], strides = [1, 1]} : vector<56x32xf32> to vector<28x32xf32>
      %22 = vector.extract_strided_slice %20 {offsets = [28, 0], sizes = [28, 32], strides = [1, 1]} : vector<56x32xf32> to vector<28x32xf32>
      %23 = arith.maximumf %21, %22 : vector<28x32xf32>
      %c0_14 = arith.constant 0 : index
      %c0_15 = arith.constant 0 : index
      %24 = vector.load %arg7[%c0_14, %c0_15] : memref<28x32xf32, #tpu.memory_space<vmem>>, vector<28x32xf32>
      tpu.vector_store %arg7[%c0_14, %c0_15], %23 {strides = array<i32>} : memref<28x32xf32, #tpu.memory_space<vmem>>, vector<28x32xf32>,
      %c0_16 = arith.constant 0 : index
      %c0_17 = arith.constant 0 : index
      %25 = tpu.strided_load %arg7[%c0_16, %c0_17] {strides = array<i32: 2, 1>} : memref<28x32xf32, #tpu.memory_space<vmem>>, vector<14x32xf32>
      %c1 = arith.constant 1 : index
      %c0_18 = arith.constant 0 : index
      %26 = tpu.strided_load %arg7[%c1, %c0_18] {strides = array<i32: 2, 1>} : memref<28x32xf32, #tpu.memory_space<vmem>>, vector<14x32xf32>
      %27 = arith.maximumf %25, %26 : vector<14x32xf32>
      %28 = arith.truncf %27 : vector<14x32xf32> to vector<14x32xbf16>
      %c0_19 = arith.constant 0 : index
      %29 = arith.index_cast %arg8 : i32 to index
      %c0_20 = arith.constant 0 : index
      %c0_21 = arith.constant 0 : index
      %30 = vector.load %arg6[%c0_19, %29, %c0_20, %c0_21] : memref<1x14x14x32xbf16, #tpu.memory_space<vmem>>, vector<1x1x14x32xbf16>
      %31 = vector.shape_cast %30 : vector<1x1x14x32xbf16> to vector<14x32xbf16>
      %32 = vector.shape_cast %28 : vector<14x32xbf16> to vector<1x1x14x32xbf16>
      tpu.vector_store %arg6[%c0_19, %29, %c0_20, %c0_21], %32 {strides = array<i32>} : memref<1x14x14x32xbf16, #tpu.memory_space<vmem>>, vector<1x1x14x32xbf16>,
    }
    %c14_i32_5 = arith.constant 14 : i32
    return
  }
  func.func @transform_0(%arg0: i32, %arg1: i32) -> (i32, i32, i32, i32) {
    %c0_i32 = arith.constant 0 : i32
    %c0_i32_0 = arith.constant 0 : i32
    %c0_i32_1 = arith.constant 0 : i32
    return %arg0, %arg1, %c0_i32, %c0_i32_0 : i32, i32, i32, i32
  }
  func.func @transform_1(%arg0: i32, %arg1: i32) -> (i32, i32) {
    %c0_i32 = arith.constant 0 : i32
    %c0_i32_0 = arith.constant 0 : i32
    %c0_i32_1 = arith.constant 0 : i32
    return %c0_i32, %c0_i32_0 : i32, i32
  }
  func.func @transform_2(%arg0: i32, %arg1: i32) -> (i32, i32) {
    %c0_i32 = arith.constant 0 : i32
    %c0_i32_0 = arith.constant 0 : i32
    %c0_i32_1 = arith.constant 0 : i32
    return %c0_i32, %c0_i32_0 : i32, i32
  }
  func.func @transform_3(%arg0: i32, %arg1: i32) -> (i32, i32) {
    %c0_i32 = arith.constant 0 : i32
    %c0_i32_0 = arith.constant 0 : i32
    %c0_i32_1 = arith.constant 0 : i32
    return %c0_i32, %c0_i32_0 : i32, i32
  }
  func.func @transform_4(%arg0: i32, %arg1: i32) -> (i32, i32, i32, i32) {
    %c0_i32 = arith.constant 0 : i32
    %c0_i32_0 = arith.constant 0 : i32
    %c0_i32_1 = arith.constant 0 : i32
    return %arg0, %arg1, %c0_i32, %c0_i32_0 : i32, i32, i32, i32
  }
}

module attributes {stable_mosaic.version = 11 : i64} {
  func.func @_conv2_kernel(%arg0: i32, %arg1: memref<1x14x14x32xbf16, #tpu.memory_space<vmem>>, %arg2: memref<800x64xbf16, #tpu.memory_space<vmem>>, %arg3: memref<1x64xf32, #tpu.memory_space<vmem>>, %arg4: memref<1x64xf32, #tpu.memory_space<vmem>>, %arg5: memref<1x5x5x64xbf16, #tpu.memory_space<vmem>>, %arg6: memref<10x64xf32, #tpu.memory_space<vmem>>) attributes {dimension_semantics = [#tpu.dimension_semantics<parallel>], iteration_bounds = array<i64: 2>, scalar_prefetch = 0 : i64, scratch_operands = 1 : i64, tpu.core_type = #tpu.core_type<tc>, window_params = [{transform_indices = @transform_0, window_bounds = array<i64: 1, 14, 14, 32>}, {pipeline_mode = #tpu.pipeline_mode<synchronous>, transform_indices = @transform_1, window_bounds = array<i64: 800, 64>}, {pipeline_mode = #tpu.pipeline_mode<synchronous>, transform_indices = @transform_2, window_bounds = array<i64: 1, 64>}, {pipeline_mode = #tpu.pipeline_mode<synchronous>, transform_indices = @transform_3, window_bounds = array<i64: 1, 64>}, {transform_indices = @transform_4, window_bounds = array<i64: 1, 5, 5, 64>}]} {
    %c0 = arith.constant 0 : index
    %c0_0 = arith.constant 0 : index
    %0 = vector.load %arg3[%c0, %c0_0] : memref<1x64xf32, #tpu.memory_space<vmem>>, vector<1x64xf32>
    %c0_1 = arith.constant 0 : index
    %c0_2 = arith.constant 0 : index
    %1 = vector.load %arg4[%c0_1, %c0_2] : memref<1x64xf32, #tpu.memory_space<vmem>>, vector<1x64xf32>
    %c0_i32 = arith.constant 0 : i32
    %c5_i32 = arith.constant 5 : i32
    %2 = arith.addi %c0_i32, %c5_i32 : i32
    %c1_i32 = arith.constant 1 : i32
    scf.for %arg7 = %c0_i32 to %2 step %c1_i32  : i32 {
      %c2_i32 = arith.constant 2 : i32
      %3 = arith.muli %c2_i32, %arg7 : i32
      %cst = arith.constant 0.000000e+00 : f32
      %4 = vector.broadcast %cst : f32 to vector<20x64xf32>
      %c0_4 = arith.constant 0 : index
      %c0_5 = arith.constant 0 : index
      %5 = vector.load %arg2[%c0_4, %c0_5] : memref<800x64xbf16, #tpu.memory_space<vmem>>, vector<32x64xbf16>
      %c0_i32_6 = arith.constant 0 : i32
      %6 = arith.addi %3, %c0_i32_6 : i32
      %c0_7 = arith.constant 0 : index
      %7 = arith.index_cast %6 : i32 to index
      %c0_8 = arith.constant 0 : index
      %c0_9 = arith.constant 0 : index
      %8 = vector.load %arg1[%c0_7, %7, %c0_8, %c0_9] : memref<1x14x14x32xbf16, #tpu.memory_space<vmem>>, vector<1x1x10x32xbf16>
      %9 = vector.shape_cast %8 : vector<1x1x10x32xbf16> to vector<10x32xbf16>
      %c1_i32_10 = arith.constant 1 : i32
      %10 = arith.addi %3, %c1_i32_10 : i32
      %c0_i32_11 = arith.constant 0 : i32
      %11 = arith.addi %10, %c0_i32_11 : i32
      %c0_12 = arith.constant 0 : index
      %12 = arith.index_cast %11 : i32 to index
      %c0_13 = arith.constant 0 : index
      %c0_14 = arith.constant 0 : index
      %13 = vector.load %arg1[%c0_12, %12, %c0_13, %c0_14] : memref<1x14x14x32xbf16, #tpu.memory_space<vmem>>, vector<1x1x10x32xbf16>
      %14 = vector.shape_cast %13 : vector<1x1x10x32xbf16> to vector<10x32xbf16>
      %15 = tpu.concatenate %9, %14 in 0 : vector<10x32xbf16>, vector<10x32xbf16> -> vector<20x32xbf16>
      %cst_15 = arith.constant dense<0.000000e+00> : vector<20x64xf32>
      %16 = tpu.matmul %15, %5, %cst_15 {dimension_numbers = #tpu.dot_dimension_numbers<[1], [0], [0], [1], [0, 0, 1, 1], [], []>} : vector<20x32xbf16>, vector<32x64xbf16>, vector<20x64xf32> -> vector<20x64xf32>
      %17 = arith.addf %4, %16 : vector<20x64xf32>
      %c32 = arith.constant 32 : index
      %c0_16 = arith.constant 0 : index
      %18 = vector.load %arg2[%c32, %c0_16] : memref<800x64xbf16, #tpu.memory_space<vmem>>, vector<32x64xbf16>
      %c0_i32_17 = arith.constant 0 : i32
      %19 = arith.addi %3, %c0_i32_17 : i32
      %c0_18 = arith.constant 0 : index
      %20 = arith.index_cast %19 : i32 to index
      %c1 = arith.constant 1 : index
      %c0_19 = arith.constant 0 : index
      %21 = vector.load %arg1[%c0_18, %20, %c1, %c0_19] : memref<1x14x14x32xbf16, #tpu.memory_space<vmem>>, vector<1x1x10x32xbf16>
      %22 = vector.shape_cast %21 : vector<1x1x10x32xbf16> to vector<10x32xbf16>
      %c1_i32_20 = arith.constant 1 : i32
      %23 = arith.addi %3, %c1_i32_20 : i32
      %c0_i32_21 = arith.constant 0 : i32
      %24 = arith.addi %23, %c0_i32_21 : i32
      %c0_22 = arith.constant 0 : index
      %25 = arith.index_cast %24 : i32 to index
      %c1_23 = arith.constant 1 : index
      %c0_24 = arith.constant 0 : index
      %26 = vector.load %arg1[%c0_22, %25, %c1_23, %c0_24] : memref<1x14x14x32xbf16, #tpu.memory_space<vmem>>, vector<1x1x10x32xbf16>
      %27 = vector.shape_cast %26 : vector<1x1x10x32xbf16> to vector<10x32xbf16>
      %28 = tpu.concatenate %22, %27 in 0 : vector<10x32xbf16>, vector<10x32xbf16> -> vector<20x32xbf16>
      %cst_25 = arith.constant dense<0.000000e+00> : vector<20x64xf32>
      %29 = tpu.matmul %28, %18, %cst_25 {dimension_numbers = #tpu.dot_dimension_numbers<[1], [0], [0], [1], [0, 0, 1, 1], [], []>} : vector<20x32xbf16>, vector<32x64xbf16>, vector<20x64xf32> -> vector<20x64xf32>
      %30 = arith.addf %17, %29 : vector<20x64xf32>
      %c64 = arith.constant 64 : index
      %c0_26 = arith.constant 0 : index
      %31 = vector.load %arg2[%c64, %c0_26] : memref<800x64xbf16, #tpu.memory_space<vmem>>, vector<32x64xbf16>
      %c0_i32_27 = arith.constant 0 : i32
      %32 = arith.addi %3, %c0_i32_27 : i32
      %c0_28 = arith.constant 0 : index
      %33 = arith.index_cast %32 : i32 to index
      %c2 = arith.constant 2 : index
      %c0_29 = arith.constant 0 : index
      %34 = vector.load %arg1[%c0_28, %33, %c2, %c0_29] : memref<1x14x14x32xbf16, #tpu.memory_space<vmem>>, vector<1x1x10x32xbf16>
      %35 = vector.shape_cast %34 : vector<1x1x10x32xbf16> to vector<10x32xbf16>
      %c1_i32_30 = arith.constant 1 : i32
      %36 = arith.addi %3, %c1_i32_30 : i32
      %c0_i32_31 = arith.constant 0 : i32
      %37 = arith.addi %36, %c0_i32_31 : i32
      %c0_32 = arith.constant 0 : index
      %38 = arith.index_cast %37 : i32 to index
      %c2_33 = arith.constant 2 : index
      %c0_34 = arith.constant 0 : index
      %39 = vector.load %arg1[%c0_32, %38, %c2_33, %c0_34] : memref<1x14x14x32xbf16, #tpu.memory_space<vmem>>, vector<1x1x10x32xbf16>
      %40 = vector.shape_cast %39 : vector<1x1x10x32xbf16> to vector<10x32xbf16>
      %41 = tpu.concatenate %35, %40 in 0 : vector<10x32xbf16>, vector<10x32xbf16> -> vector<20x32xbf16>
      %cst_35 = arith.constant dense<0.000000e+00> : vector<20x64xf32>
      %42 = tpu.matmul %41, %31, %cst_35 {dimension_numbers = #tpu.dot_dimension_numbers<[1], [0], [0], [1], [0, 0, 1, 1], [], []>} : vector<20x32xbf16>, vector<32x64xbf16>, vector<20x64xf32> -> vector<20x64xf32>
      %43 = arith.addf %30, %42 : vector<20x64xf32>
      %c96 = arith.constant 96 : index
      %c0_36 = arith.constant 0 : index
      %44 = vector.load %arg2[%c96, %c0_36] : memref<800x64xbf16, #tpu.memory_space<vmem>>, vector<32x64xbf16>
      %c0_i32_37 = arith.constant 0 : i32
      %45 = arith.addi %3, %c0_i32_37 : i32
      %c0_38 = arith.constant 0 : index
      %46 = arith.index_cast %45 : i32 to index
      %c3 = arith.constant 3 : index
      %c0_39 = arith.constant 0 : index
      %47 = vector.load %arg1[%c0_38, %46, %c3, %c0_39] : memref<1x14x14x32xbf16, #tpu.memory_space<vmem>>, vector<1x1x10x32xbf16>
      %48 = vector.shape_cast %47 : vector<1x1x10x32xbf16> to vector<10x32xbf16>
      %c1_i32_40 = arith.constant 1 : i32
      %49 = arith.addi %3, %c1_i32_40 : i32
      %c0_i32_41 = arith.constant 0 : i32
      %50 = arith.addi %49, %c0_i32_41 : i32
      %c0_42 = arith.constant 0 : index
      %51 = arith.index_cast %50 : i32 to index
      %c3_43 = arith.constant 3 : index
      %c0_44 = arith.constant 0 : index
      %52 = vector.load %arg1[%c0_42, %51, %c3_43, %c0_44] : memref<1x14x14x32xbf16, #tpu.memory_space<vmem>>, vector<1x1x10x32xbf16>
      %53 = vector.shape_cast %52 : vector<1x1x10x32xbf16> to vector<10x32xbf16>
      %54 = tpu.concatenate %48, %53 in 0 : vector<10x32xbf16>, vector<10x32xbf16> -> vector<20x32xbf16>
      %cst_45 = arith.constant dense<0.000000e+00> : vector<20x64xf32>
      %55 = tpu.matmul %54, %44, %cst_45 {dimension_numbers = #tpu.dot_dimension_numbers<[1], [0], [0], [1], [0, 0, 1, 1], [], []>} : vector<20x32xbf16>, vector<32x64xbf16>, vector<20x64xf32> -> vector<20x64xf32>
      %56 = arith.addf %43, %55 : vector<20x64xf32>
      %c128 = arith.constant 128 : index
      %c0_46 = arith.constant 0 : index
      %57 = vector.load %arg2[%c128, %c0_46] : memref<800x64xbf16, #tpu.memory_space<vmem>>, vector<32x64xbf16>
      %c0_i32_47 = arith.constant 0 : i32
      %58 = arith.addi %3, %c0_i32_47 : i32
      %c0_48 = arith.constant 0 : index
      %59 = arith.index_cast %58 : i32 to index
      %c4 = arith.constant 4 : index
      %c0_49 = arith.constant 0 : index
      %60 = vector.load %arg1[%c0_48, %59, %c4, %c0_49] : memref<1x14x14x32xbf16, #tpu.memory_space<vmem>>, vector<1x1x10x32xbf16>
      %61 = vector.shape_cast %60 : vector<1x1x10x32xbf16> to vector<10x32xbf16>
      %c1_i32_50 = arith.constant 1 : i32
      %62 = arith.addi %3, %c1_i32_50 : i32
      %c0_i32_51 = arith.constant 0 : i32
      %63 = arith.addi %62, %c0_i32_51 : i32
      %c0_52 = arith.constant 0 : index
      %64 = arith.index_cast %63 : i32 to index
      %c4_53 = arith.constant 4 : index
      %c0_54 = arith.constant 0 : index
      %65 = vector.load %arg1[%c0_52, %64, %c4_53, %c0_54] : memref<1x14x14x32xbf16, #tpu.memory_space<vmem>>, vector<1x1x10x32xbf16>
      %66 = vector.shape_cast %65 : vector<1x1x10x32xbf16> to vector<10x32xbf16>
      %67 = tpu.concatenate %61, %66 in 0 : vector<10x32xbf16>, vector<10x32xbf16> -> vector<20x32xbf16>
      %cst_55 = arith.constant dense<0.000000e+00> : vector<20x64xf32>
      %68 = tpu.matmul %67, %57, %cst_55 {dimension_numbers = #tpu.dot_dimension_numbers<[1], [0], [0], [1], [0, 0, 1, 1], [], []>} : vector<20x32xbf16>, vector<32x64xbf16>, vector<20x64xf32> -> vector<20x64xf32>
      %69 = arith.addf %56, %68 : vector<20x64xf32>
      %c160 = arith.constant 160 : index
      %c0_56 = arith.constant 0 : index
      %70 = vector.load %arg2[%c160, %c0_56] : memref<800x64xbf16, #tpu.memory_space<vmem>>, vector<32x64xbf16>
      %c1_i32_57 = arith.constant 1 : i32
      %71 = arith.addi %3, %c1_i32_57 : i32
      %c0_58 = arith.constant 0 : index
      %72 = arith.index_cast %71 : i32 to index
      %c0_59 = arith.constant 0 : index
      %c0_60 = arith.constant 0 : index
      %73 = vector.load %arg1[%c0_58, %72, %c0_59, %c0_60] : memref<1x14x14x32xbf16, #tpu.memory_space<vmem>>, vector<1x1x10x32xbf16>
      %74 = vector.shape_cast %73 : vector<1x1x10x32xbf16> to vector<10x32xbf16>
      %c1_i32_61 = arith.constant 1 : i32
      %75 = arith.addi %3, %c1_i32_61 : i32
      %c1_i32_62 = arith.constant 1 : i32
      %76 = arith.addi %75, %c1_i32_62 : i32
      %c0_63 = arith.constant 0 : index
      %77 = arith.index_cast %76 : i32 to index
      %c0_64 = arith.constant 0 : index
      %c0_65 = arith.constant 0 : index
      %78 = vector.load %arg1[%c0_63, %77, %c0_64, %c0_65] : memref<1x14x14x32xbf16, #tpu.memory_space<vmem>>, vector<1x1x10x32xbf16>
      %79 = vector.shape_cast %78 : vector<1x1x10x32xbf16> to vector<10x32xbf16>
      %80 = tpu.concatenate %74, %79 in 0 : vector<10x32xbf16>, vector<10x32xbf16> -> vector<20x32xbf16>
      %cst_66 = arith.constant dense<0.000000e+00> : vector<20x64xf32>
      %81 = tpu.matmul %80, %70, %cst_66 {dimension_numbers = #tpu.dot_dimension_numbers<[1], [0], [0], [1], [0, 0, 1, 1], [], []>} : vector<20x32xbf16>, vector<32x64xbf16>, vector<20x64xf32> -> vector<20x64xf32>
      %82 = arith.addf %69, %81 : vector<20x64xf32>
      %c192 = arith.constant 192 : index
      %c0_67 = arith.constant 0 : index
      %83 = vector.load %arg2[%c192, %c0_67] : memref<800x64xbf16, #tpu.memory_space<vmem>>, vector<32x64xbf16>
      %c1_i32_68 = arith.constant 1 : i32
      %84 = arith.addi %3, %c1_i32_68 : i32
      %c0_69 = arith.constant 0 : index
      %85 = arith.index_cast %84 : i32 to index
      %c1_70 = arith.constant 1 : index
      %c0_71 = arith.constant 0 : index
      %86 = vector.load %arg1[%c0_69, %85, %c1_70, %c0_71] : memref<1x14x14x32xbf16, #tpu.memory_space<vmem>>, vector<1x1x10x32xbf16>
      %87 = vector.shape_cast %86 : vector<1x1x10x32xbf16> to vector<10x32xbf16>
      %c1_i32_72 = arith.constant 1 : i32
      %88 = arith.addi %3, %c1_i32_72 : i32
      %c1_i32_73 = arith.constant 1 : i32
      %89 = arith.addi %88, %c1_i32_73 : i32
      %c0_74 = arith.constant 0 : index
      %90 = arith.index_cast %89 : i32 to index
      %c1_75 = arith.constant 1 : index
      %c0_76 = arith.constant 0 : index
      %91 = vector.load %arg1[%c0_74, %90, %c1_75, %c0_76] : memref<1x14x14x32xbf16, #tpu.memory_space<vmem>>, vector<1x1x10x32xbf16>
      %92 = vector.shape_cast %91 : vector<1x1x10x32xbf16> to vector<10x32xbf16>
      %93 = tpu.concatenate %87, %92 in 0 : vector<10x32xbf16>, vector<10x32xbf16> -> vector<20x32xbf16>
      %cst_77 = arith.constant dense<0.000000e+00> : vector<20x64xf32>
      %94 = tpu.matmul %93, %83, %cst_77 {dimension_numbers = #tpu.dot_dimension_numbers<[1], [0], [0], [1], [0, 0, 1, 1], [], []>} : vector<20x32xbf16>, vector<32x64xbf16>, vector<20x64xf32> -> vector<20x64xf32>
      %95 = arith.addf %82, %94 : vector<20x64xf32>
      %c224 = arith.constant 224 : index
      %c0_78 = arith.constant 0 : index
      %96 = vector.load %arg2[%c224, %c0_78] : memref<800x64xbf16, #tpu.memory_space<vmem>>, vector<32x64xbf16>
      %c1_i32_79 = arith.constant 1 : i32
      %97 = arith.addi %3, %c1_i32_79 : i32
      %c0_80 = arith.constant 0 : index
      %98 = arith.index_cast %97 : i32 to index
      %c2_81 = arith.constant 2 : index
      %c0_82 = arith.constant 0 : index
      %99 = vector.load %arg1[%c0_80, %98, %c2_81, %c0_82] : memref<1x14x14x32xbf16, #tpu.memory_space<vmem>>, vector<1x1x10x32xbf16>
      %100 = vector.shape_cast %99 : vector<1x1x10x32xbf16> to vector<10x32xbf16>
      %c1_i32_83 = arith.constant 1 : i32
      %101 = arith.addi %3, %c1_i32_83 : i32
      %c1_i32_84 = arith.constant 1 : i32
      %102 = arith.addi %101, %c1_i32_84 : i32
      %c0_85 = arith.constant 0 : index
      %103 = arith.index_cast %102 : i32 to index
      %c2_86 = arith.constant 2 : index
      %c0_87 = arith.constant 0 : index
      %104 = vector.load %arg1[%c0_85, %103, %c2_86, %c0_87] : memref<1x14x14x32xbf16, #tpu.memory_space<vmem>>, vector<1x1x10x32xbf16>
      %105 = vector.shape_cast %104 : vector<1x1x10x32xbf16> to vector<10x32xbf16>
      %106 = tpu.concatenate %100, %105 in 0 : vector<10x32xbf16>, vector<10x32xbf16> -> vector<20x32xbf16>
      %cst_88 = arith.constant dense<0.000000e+00> : vector<20x64xf32>
      %107 = tpu.matmul %106, %96, %cst_88 {dimension_numbers = #tpu.dot_dimension_numbers<[1], [0], [0], [1], [0, 0, 1, 1], [], []>} : vector<20x32xbf16>, vector<32x64xbf16>, vector<20x64xf32> -> vector<20x64xf32>
      %108 = arith.addf %95, %107 : vector<20x64xf32>
      %c256 = arith.constant 256 : index
      %c0_89 = arith.constant 0 : index
      %109 = vector.load %arg2[%c256, %c0_89] : memref<800x64xbf16, #tpu.memory_space<vmem>>, vector<32x64xbf16>
      %c1_i32_90 = arith.constant 1 : i32
      %110 = arith.addi %3, %c1_i32_90 : i32
      %c0_91 = arith.constant 0 : index
      %111 = arith.index_cast %110 : i32 to index
      %c3_92 = arith.constant 3 : index
      %c0_93 = arith.constant 0 : index
      %112 = vector.load %arg1[%c0_91, %111, %c3_92, %c0_93] : memref<1x14x14x32xbf16, #tpu.memory_space<vmem>>, vector<1x1x10x32xbf16>
      %113 = vector.shape_cast %112 : vector<1x1x10x32xbf16> to vector<10x32xbf16>
      %c1_i32_94 = arith.constant 1 : i32
      %114 = arith.addi %3, %c1_i32_94 : i32
      %c1_i32_95 = arith.constant 1 : i32
      %115 = arith.addi %114, %c1_i32_95 : i32
      %c0_96 = arith.constant 0 : index
      %116 = arith.index_cast %115 : i32 to index
      %c3_97 = arith.constant 3 : index
      %c0_98 = arith.constant 0 : index
      %117 = vector.load %arg1[%c0_96, %116, %c3_97, %c0_98] : memref<1x14x14x32xbf16, #tpu.memory_space<vmem>>, vector<1x1x10x32xbf16>
      %118 = vector.shape_cast %117 : vector<1x1x10x32xbf16> to vector<10x32xbf16>
      %119 = tpu.concatenate %113, %118 in 0 : vector<10x32xbf16>, vector<10x32xbf16> -> vector<20x32xbf16>
      %cst_99 = arith.constant dense<0.000000e+00> : vector<20x64xf32>
      %120 = tpu.matmul %119, %109, %cst_99 {dimension_numbers = #tpu.dot_dimension_numbers<[1], [0], [0], [1], [0, 0, 1, 1], [], []>} : vector<20x32xbf16>, vector<32x64xbf16>, vector<20x64xf32> -> vector<20x64xf32>
      %121 = arith.addf %108, %120 : vector<20x64xf32>
      %c288 = arith.constant 288 : index
      %c0_100 = arith.constant 0 : index
      %122 = vector.load %arg2[%c288, %c0_100] : memref<800x64xbf16, #tpu.memory_space<vmem>>, vector<32x64xbf16>
      %c1_i32_101 = arith.constant 1 : i32
      %123 = arith.addi %3, %c1_i32_101 : i32
      %c0_102 = arith.constant 0 : index
      %124 = arith.index_cast %123 : i32 to index
      %c4_103 = arith.constant 4 : index
      %c0_104 = arith.constant 0 : index
      %125 = vector.load %arg1[%c0_102, %124, %c4_103, %c0_104] : memref<1x14x14x32xbf16, #tpu.memory_space<vmem>>, vector<1x1x10x32xbf16>
      %126 = vector.shape_cast %125 : vector<1x1x10x32xbf16> to vector<10x32xbf16>
      %c1_i32_105 = arith.constant 1 : i32
      %127 = arith.addi %3, %c1_i32_105 : i32
      %c1_i32_106 = arith.constant 1 : i32
      %128 = arith.addi %127, %c1_i32_106 : i32
      %c0_107 = arith.constant 0 : index
      %129 = arith.index_cast %128 : i32 to index
      %c4_108 = arith.constant 4 : index
      %c0_109 = arith.constant 0 : index
      %130 = vector.load %arg1[%c0_107, %129, %c4_108, %c0_109] : memref<1x14x14x32xbf16, #tpu.memory_space<vmem>>, vector<1x1x10x32xbf16>
      %131 = vector.shape_cast %130 : vector<1x1x10x32xbf16> to vector<10x32xbf16>
      %132 = tpu.concatenate %126, %131 in 0 : vector<10x32xbf16>, vector<10x32xbf16> -> vector<20x32xbf16>
      %cst_110 = arith.constant dense<0.000000e+00> : vector<20x64xf32>
      %133 = tpu.matmul %132, %122, %cst_110 {dimension_numbers = #tpu.dot_dimension_numbers<[1], [0], [0], [1], [0, 0, 1, 1], [], []>} : vector<20x32xbf16>, vector<32x64xbf16>, vector<20x64xf32> -> vector<20x64xf32>
      %134 = arith.addf %121, %133 : vector<20x64xf32>
      %c320 = arith.constant 320 : index
      %c0_111 = arith.constant 0 : index
      %135 = vector.load %arg2[%c320, %c0_111] : memref<800x64xbf16, #tpu.memory_space<vmem>>, vector<32x64xbf16>
      %c2_i32_112 = arith.constant 2 : i32
      %136 = arith.addi %3, %c2_i32_112 : i32
      %c0_113 = arith.constant 0 : index
      %137 = arith.index_cast %136 : i32 to index
      %c0_114 = arith.constant 0 : index
      %c0_115 = arith.constant 0 : index
      %138 = vector.load %arg1[%c0_113, %137, %c0_114, %c0_115] : memref<1x14x14x32xbf16, #tpu.memory_space<vmem>>, vector<1x1x10x32xbf16>
      %139 = vector.shape_cast %138 : vector<1x1x10x32xbf16> to vector<10x32xbf16>
      %c1_i32_116 = arith.constant 1 : i32
      %140 = arith.addi %3, %c1_i32_116 : i32
      %c2_i32_117 = arith.constant 2 : i32
      %141 = arith.addi %140, %c2_i32_117 : i32
      %c0_118 = arith.constant 0 : index
      %142 = arith.index_cast %141 : i32 to index
      %c0_119 = arith.constant 0 : index
      %c0_120 = arith.constant 0 : index
      %143 = vector.load %arg1[%c0_118, %142, %c0_119, %c0_120] : memref<1x14x14x32xbf16, #tpu.memory_space<vmem>>, vector<1x1x10x32xbf16>
      %144 = vector.shape_cast %143 : vector<1x1x10x32xbf16> to vector<10x32xbf16>
      %145 = tpu.concatenate %139, %144 in 0 : vector<10x32xbf16>, vector<10x32xbf16> -> vector<20x32xbf16>
      %cst_121 = arith.constant dense<0.000000e+00> : vector<20x64xf32>
      %146 = tpu.matmul %145, %135, %cst_121 {dimension_numbers = #tpu.dot_dimension_numbers<[1], [0], [0], [1], [0, 0, 1, 1], [], []>} : vector<20x32xbf16>, vector<32x64xbf16>, vector<20x64xf32> -> vector<20x64xf32>
      %147 = arith.addf %134, %146 : vector<20x64xf32>
      %c352 = arith.constant 352 : index
      %c0_122 = arith.constant 0 : index
      %148 = vector.load %arg2[%c352, %c0_122] : memref<800x64xbf16, #tpu.memory_space<vmem>>, vector<32x64xbf16>
      %c2_i32_123 = arith.constant 2 : i32
      %149 = arith.addi %3, %c2_i32_123 : i32
      %c0_124 = arith.constant 0 : index
      %150 = arith.index_cast %149 : i32 to index
      %c1_125 = arith.constant 1 : index
      %c0_126 = arith.constant 0 : index
      %151 = vector.load %arg1[%c0_124, %150, %c1_125, %c0_126] : memref<1x14x14x32xbf16, #tpu.memory_space<vmem>>, vector<1x1x10x32xbf16>
      %152 = vector.shape_cast %151 : vector<1x1x10x32xbf16> to vector<10x32xbf16>
      %c1_i32_127 = arith.constant 1 : i32
      %153 = arith.addi %3, %c1_i32_127 : i32
      %c2_i32_128 = arith.constant 2 : i32
      %154 = arith.addi %153, %c2_i32_128 : i32
      %c0_129 = arith.constant 0 : index
      %155 = arith.index_cast %154 : i32 to index
      %c1_130 = arith.constant 1 : index
      %c0_131 = arith.constant 0 : index
      %156 = vector.load %arg1[%c0_129, %155, %c1_130, %c0_131] : memref<1x14x14x32xbf16, #tpu.memory_space<vmem>>, vector<1x1x10x32xbf16>
      %157 = vector.shape_cast %156 : vector<1x1x10x32xbf16> to vector<10x32xbf16>
      %158 = tpu.concatenate %152, %157 in 0 : vector<10x32xbf16>, vector<10x32xbf16> -> vector<20x32xbf16>
      %cst_132 = arith.constant dense<0.000000e+00> : vector<20x64xf32>
      %159 = tpu.matmul %158, %148, %cst_132 {dimension_numbers = #tpu.dot_dimension_numbers<[1], [0], [0], [1], [0, 0, 1, 1], [], []>} : vector<20x32xbf16>, vector<32x64xbf16>, vector<20x64xf32> -> vector<20x64xf32>
      %160 = arith.addf %147, %159 : vector<20x64xf32>
      %c384 = arith.constant 384 : index
      %c0_133 = arith.constant 0 : index
      %161 = vector.load %arg2[%c384, %c0_133] : memref<800x64xbf16, #tpu.memory_space<vmem>>, vector<32x64xbf16>
      %c2_i32_134 = arith.constant 2 : i32
      %162 = arith.addi %3, %c2_i32_134 : i32
      %c0_135 = arith.constant 0 : index
      %163 = arith.index_cast %162 : i32 to index
      %c2_136 = arith.constant 2 : index
      %c0_137 = arith.constant 0 : index
      %164 = vector.load %arg1[%c0_135, %163, %c2_136, %c0_137] : memref<1x14x14x32xbf16, #tpu.memory_space<vmem>>, vector<1x1x10x32xbf16>
      %165 = vector.shape_cast %164 : vector<1x1x10x32xbf16> to vector<10x32xbf16>
      %c1_i32_138 = arith.constant 1 : i32
      %166 = arith.addi %3, %c1_i32_138 : i32
      %c2_i32_139 = arith.constant 2 : i32
      %167 = arith.addi %166, %c2_i32_139 : i32
      %c0_140 = arith.constant 0 : index
      %168 = arith.index_cast %167 : i32 to index
      %c2_141 = arith.constant 2 : index
      %c0_142 = arith.constant 0 : index
      %169 = vector.load %arg1[%c0_140, %168, %c2_141, %c0_142] : memref<1x14x14x32xbf16, #tpu.memory_space<vmem>>, vector<1x1x10x32xbf16>
      %170 = vector.shape_cast %169 : vector<1x1x10x32xbf16> to vector<10x32xbf16>
      %171 = tpu.concatenate %165, %170 in 0 : vector<10x32xbf16>, vector<10x32xbf16> -> vector<20x32xbf16>
      %cst_143 = arith.constant dense<0.000000e+00> : vector<20x64xf32>
      %172 = tpu.matmul %171, %161, %cst_143 {dimension_numbers = #tpu.dot_dimension_numbers<[1], [0], [0], [1], [0, 0, 1, 1], [], []>} : vector<20x32xbf16>, vector<32x64xbf16>, vector<20x64xf32> -> vector<20x64xf32>
      %173 = arith.addf %160, %172 : vector<20x64xf32>
      %c416 = arith.constant 416 : index
      %c0_144 = arith.constant 0 : index
      %174 = vector.load %arg2[%c416, %c0_144] : memref<800x64xbf16, #tpu.memory_space<vmem>>, vector<32x64xbf16>
      %c2_i32_145 = arith.constant 2 : i32
      %175 = arith.addi %3, %c2_i32_145 : i32
      %c0_146 = arith.constant 0 : index
      %176 = arith.index_cast %175 : i32 to index
      %c3_147 = arith.constant 3 : index
      %c0_148 = arith.constant 0 : index
      %177 = vector.load %arg1[%c0_146, %176, %c3_147, %c0_148] : memref<1x14x14x32xbf16, #tpu.memory_space<vmem>>, vector<1x1x10x32xbf16>
      %178 = vector.shape_cast %177 : vector<1x1x10x32xbf16> to vector<10x32xbf16>
      %c1_i32_149 = arith.constant 1 : i32
      %179 = arith.addi %3, %c1_i32_149 : i32
      %c2_i32_150 = arith.constant 2 : i32
      %180 = arith.addi %179, %c2_i32_150 : i32
      %c0_151 = arith.constant 0 : index
      %181 = arith.index_cast %180 : i32 to index
      %c3_152 = arith.constant 3 : index
      %c0_153 = arith.constant 0 : index
      %182 = vector.load %arg1[%c0_151, %181, %c3_152, %c0_153] : memref<1x14x14x32xbf16, #tpu.memory_space<vmem>>, vector<1x1x10x32xbf16>
      %183 = vector.shape_cast %182 : vector<1x1x10x32xbf16> to vector<10x32xbf16>
      %184 = tpu.concatenate %178, %183 in 0 : vector<10x32xbf16>, vector<10x32xbf16> -> vector<20x32xbf16>
      %cst_154 = arith.constant dense<0.000000e+00> : vector<20x64xf32>
      %185 = tpu.matmul %184, %174, %cst_154 {dimension_numbers = #tpu.dot_dimension_numbers<[1], [0], [0], [1], [0, 0, 1, 1], [], []>} : vector<20x32xbf16>, vector<32x64xbf16>, vector<20x64xf32> -> vector<20x64xf32>
      %186 = arith.addf %173, %185 : vector<20x64xf32>
      %c448 = arith.constant 448 : index
      %c0_155 = arith.constant 0 : index
      %187 = vector.load %arg2[%c448, %c0_155] : memref<800x64xbf16, #tpu.memory_space<vmem>>, vector<32x64xbf16>
      %c2_i32_156 = arith.constant 2 : i32
      %188 = arith.addi %3, %c2_i32_156 : i32
      %c0_157 = arith.constant 0 : index
      %189 = arith.index_cast %188 : i32 to index
      %c4_158 = arith.constant 4 : index
      %c0_159 = arith.constant 0 : index
      %190 = vector.load %arg1[%c0_157, %189, %c4_158, %c0_159] : memref<1x14x14x32xbf16, #tpu.memory_space<vmem>>, vector<1x1x10x32xbf16>
      %191 = vector.shape_cast %190 : vector<1x1x10x32xbf16> to vector<10x32xbf16>
      %c1_i32_160 = arith.constant 1 : i32
      %192 = arith.addi %3, %c1_i32_160 : i32
      %c2_i32_161 = arith.constant 2 : i32
      %193 = arith.addi %192, %c2_i32_161 : i32
      %c0_162 = arith.constant 0 : index
      %194 = arith.index_cast %193 : i32 to index
      %c4_163 = arith.constant 4 : index
      %c0_164 = arith.constant 0 : index
      %195 = vector.load %arg1[%c0_162, %194, %c4_163, %c0_164] : memref<1x14x14x32xbf16, #tpu.memory_space<vmem>>, vector<1x1x10x32xbf16>
      %196 = vector.shape_cast %195 : vector<1x1x10x32xbf16> to vector<10x32xbf16>
      %197 = tpu.concatenate %191, %196 in 0 : vector<10x32xbf16>, vector<10x32xbf16> -> vector<20x32xbf16>
      %cst_165 = arith.constant dense<0.000000e+00> : vector<20x64xf32>
      %198 = tpu.matmul %197, %187, %cst_165 {dimension_numbers = #tpu.dot_dimension_numbers<[1], [0], [0], [1], [0, 0, 1, 1], [], []>} : vector<20x32xbf16>, vector<32x64xbf16>, vector<20x64xf32> -> vector<20x64xf32>
      %199 = arith.addf %186, %198 : vector<20x64xf32>
      %c480 = arith.constant 480 : index
      %c0_166 = arith.constant 0 : index
      %200 = vector.load %arg2[%c480, %c0_166] : memref<800x64xbf16, #tpu.memory_space<vmem>>, vector<32x64xbf16>
      %c3_i32 = arith.constant 3 : i32
      %201 = arith.addi %3, %c3_i32 : i32
      %c0_167 = arith.constant 0 : index
      %202 = arith.index_cast %201 : i32 to index
      %c0_168 = arith.constant 0 : index
      %c0_169 = arith.constant 0 : index
      %203 = vector.load %arg1[%c0_167, %202, %c0_168, %c0_169] : memref<1x14x14x32xbf16, #tpu.memory_space<vmem>>, vector<1x1x10x32xbf16>
      %204 = vector.shape_cast %203 : vector<1x1x10x32xbf16> to vector<10x32xbf16>
      %c1_i32_170 = arith.constant 1 : i32
      %205 = arith.addi %3, %c1_i32_170 : i32
      %c3_i32_171 = arith.constant 3 : i32
      %206 = arith.addi %205, %c3_i32_171 : i32
      %c0_172 = arith.constant 0 : index
      %207 = arith.index_cast %206 : i32 to index
      %c0_173 = arith.constant 0 : index
      %c0_174 = arith.constant 0 : index
      %208 = vector.load %arg1[%c0_172, %207, %c0_173, %c0_174] : memref<1x14x14x32xbf16, #tpu.memory_space<vmem>>, vector<1x1x10x32xbf16>
      %209 = vector.shape_cast %208 : vector<1x1x10x32xbf16> to vector<10x32xbf16>
      %210 = tpu.concatenate %204, %209 in 0 : vector<10x32xbf16>, vector<10x32xbf16> -> vector<20x32xbf16>
      %cst_175 = arith.constant dense<0.000000e+00> : vector<20x64xf32>
      %211 = tpu.matmul %210, %200, %cst_175 {dimension_numbers = #tpu.dot_dimension_numbers<[1], [0], [0], [1], [0, 0, 1, 1], [], []>} : vector<20x32xbf16>, vector<32x64xbf16>, vector<20x64xf32> -> vector<20x64xf32>
      %212 = arith.addf %199, %211 : vector<20x64xf32>
      %c512 = arith.constant 512 : index
      %c0_176 = arith.constant 0 : index
      %213 = vector.load %arg2[%c512, %c0_176] : memref<800x64xbf16, #tpu.memory_space<vmem>>, vector<32x64xbf16>
      %c3_i32_177 = arith.constant 3 : i32
      %214 = arith.addi %3, %c3_i32_177 : i32
      %c0_178 = arith.constant 0 : index
      %215 = arith.index_cast %214 : i32 to index
      %c1_179 = arith.constant 1 : index
      %c0_180 = arith.constant 0 : index
      %216 = vector.load %arg1[%c0_178, %215, %c1_179, %c0_180] : memref<1x14x14x32xbf16, #tpu.memory_space<vmem>>, vector<1x1x10x32xbf16>
      %217 = vector.shape_cast %216 : vector<1x1x10x32xbf16> to vector<10x32xbf16>
      %c1_i32_181 = arith.constant 1 : i32
      %218 = arith.addi %3, %c1_i32_181 : i32
      %c3_i32_182 = arith.constant 3 : i32
      %219 = arith.addi %218, %c3_i32_182 : i32
      %c0_183 = arith.constant 0 : index
      %220 = arith.index_cast %219 : i32 to index
      %c1_184 = arith.constant 1 : index
      %c0_185 = arith.constant 0 : index
      %221 = vector.load %arg1[%c0_183, %220, %c1_184, %c0_185] : memref<1x14x14x32xbf16, #tpu.memory_space<vmem>>, vector<1x1x10x32xbf16>
      %222 = vector.shape_cast %221 : vector<1x1x10x32xbf16> to vector<10x32xbf16>
      %223 = tpu.concatenate %217, %222 in 0 : vector<10x32xbf16>, vector<10x32xbf16> -> vector<20x32xbf16>
      %cst_186 = arith.constant dense<0.000000e+00> : vector<20x64xf32>
      %224 = tpu.matmul %223, %213, %cst_186 {dimension_numbers = #tpu.dot_dimension_numbers<[1], [0], [0], [1], [0, 0, 1, 1], [], []>} : vector<20x32xbf16>, vector<32x64xbf16>, vector<20x64xf32> -> vector<20x64xf32>
      %225 = arith.addf %212, %224 : vector<20x64xf32>
      %c544 = arith.constant 544 : index
      %c0_187 = arith.constant 0 : index
      %226 = vector.load %arg2[%c544, %c0_187] : memref<800x64xbf16, #tpu.memory_space<vmem>>, vector<32x64xbf16>
      %c3_i32_188 = arith.constant 3 : i32
      %227 = arith.addi %3, %c3_i32_188 : i32
      %c0_189 = arith.constant 0 : index
      %228 = arith.index_cast %227 : i32 to index
      %c2_190 = arith.constant 2 : index
      %c0_191 = arith.constant 0 : index
      %229 = vector.load %arg1[%c0_189, %228, %c2_190, %c0_191] : memref<1x14x14x32xbf16, #tpu.memory_space<vmem>>, vector<1x1x10x32xbf16>
      %230 = vector.shape_cast %229 : vector<1x1x10x32xbf16> to vector<10x32xbf16>
      %c1_i32_192 = arith.constant 1 : i32
      %231 = arith.addi %3, %c1_i32_192 : i32
      %c3_i32_193 = arith.constant 3 : i32
      %232 = arith.addi %231, %c3_i32_193 : i32
      %c0_194 = arith.constant 0 : index
      %233 = arith.index_cast %232 : i32 to index
      %c2_195 = arith.constant 2 : index
      %c0_196 = arith.constant 0 : index
      %234 = vector.load %arg1[%c0_194, %233, %c2_195, %c0_196] : memref<1x14x14x32xbf16, #tpu.memory_space<vmem>>, vector<1x1x10x32xbf16>
      %235 = vector.shape_cast %234 : vector<1x1x10x32xbf16> to vector<10x32xbf16>
      %236 = tpu.concatenate %230, %235 in 0 : vector<10x32xbf16>, vector<10x32xbf16> -> vector<20x32xbf16>
      %cst_197 = arith.constant dense<0.000000e+00> : vector<20x64xf32>
      %237 = tpu.matmul %236, %226, %cst_197 {dimension_numbers = #tpu.dot_dimension_numbers<[1], [0], [0], [1], [0, 0, 1, 1], [], []>} : vector<20x32xbf16>, vector<32x64xbf16>, vector<20x64xf32> -> vector<20x64xf32>
      %238 = arith.addf %225, %237 : vector<20x64xf32>
      %c576 = arith.constant 576 : index
      %c0_198 = arith.constant 0 : index
      %239 = vector.load %arg2[%c576, %c0_198] : memref<800x64xbf16, #tpu.memory_space<vmem>>, vector<32x64xbf16>
      %c3_i32_199 = arith.constant 3 : i32
      %240 = arith.addi %3, %c3_i32_199 : i32
      %c0_200 = arith.constant 0 : index
      %241 = arith.index_cast %240 : i32 to index
      %c3_201 = arith.constant 3 : index
      %c0_202 = arith.constant 0 : index
      %242 = vector.load %arg1[%c0_200, %241, %c3_201, %c0_202] : memref<1x14x14x32xbf16, #tpu.memory_space<vmem>>, vector<1x1x10x32xbf16>
      %243 = vector.shape_cast %242 : vector<1x1x10x32xbf16> to vector<10x32xbf16>
      %c1_i32_203 = arith.constant 1 : i32
      %244 = arith.addi %3, %c1_i32_203 : i32
      %c3_i32_204 = arith.constant 3 : i32
      %245 = arith.addi %244, %c3_i32_204 : i32
      %c0_205 = arith.constant 0 : index
      %246 = arith.index_cast %245 : i32 to index
      %c3_206 = arith.constant 3 : index
      %c0_207 = arith.constant 0 : index
      %247 = vector.load %arg1[%c0_205, %246, %c3_206, %c0_207] : memref<1x14x14x32xbf16, #tpu.memory_space<vmem>>, vector<1x1x10x32xbf16>
      %248 = vector.shape_cast %247 : vector<1x1x10x32xbf16> to vector<10x32xbf16>
      %249 = tpu.concatenate %243, %248 in 0 : vector<10x32xbf16>, vector<10x32xbf16> -> vector<20x32xbf16>
      %cst_208 = arith.constant dense<0.000000e+00> : vector<20x64xf32>
      %250 = tpu.matmul %249, %239, %cst_208 {dimension_numbers = #tpu.dot_dimension_numbers<[1], [0], [0], [1], [0, 0, 1, 1], [], []>} : vector<20x32xbf16>, vector<32x64xbf16>, vector<20x64xf32> -> vector<20x64xf32>
      %251 = arith.addf %238, %250 : vector<20x64xf32>
      %c608 = arith.constant 608 : index
      %c0_209 = arith.constant 0 : index
      %252 = vector.load %arg2[%c608, %c0_209] : memref<800x64xbf16, #tpu.memory_space<vmem>>, vector<32x64xbf16>
      %c3_i32_210 = arith.constant 3 : i32
      %253 = arith.addi %3, %c3_i32_210 : i32
      %c0_211 = arith.constant 0 : index
      %254 = arith.index_cast %253 : i32 to index
      %c4_212 = arith.constant 4 : index
      %c0_213 = arith.constant 0 : index
      %255 = vector.load %arg1[%c0_211, %254, %c4_212, %c0_213] : memref<1x14x14x32xbf16, #tpu.memory_space<vmem>>, vector<1x1x10x32xbf16>
      %256 = vector.shape_cast %255 : vector<1x1x10x32xbf16> to vector<10x32xbf16>
      %c1_i32_214 = arith.constant 1 : i32
      %257 = arith.addi %3, %c1_i32_214 : i32
      %c3_i32_215 = arith.constant 3 : i32
      %258 = arith.addi %257, %c3_i32_215 : i32
      %c0_216 = arith.constant 0 : index
      %259 = arith.index_cast %258 : i32 to index
      %c4_217 = arith.constant 4 : index
      %c0_218 = arith.constant 0 : index
      %260 = vector.load %arg1[%c0_216, %259, %c4_217, %c0_218] : memref<1x14x14x32xbf16, #tpu.memory_space<vmem>>, vector<1x1x10x32xbf16>
      %261 = vector.shape_cast %260 : vector<1x1x10x32xbf16> to vector<10x32xbf16>
      %262 = tpu.concatenate %256, %261 in 0 : vector<10x32xbf16>, vector<10x32xbf16> -> vector<20x32xbf16>
      %cst_219 = arith.constant dense<0.000000e+00> : vector<20x64xf32>
      %263 = tpu.matmul %262, %252, %cst_219 {dimension_numbers = #tpu.dot_dimension_numbers<[1], [0], [0], [1], [0, 0, 1, 1], [], []>} : vector<20x32xbf16>, vector<32x64xbf16>, vector<20x64xf32> -> vector<20x64xf32>
      %264 = arith.addf %251, %263 : vector<20x64xf32>
      %c640 = arith.constant 640 : index
      %c0_220 = arith.constant 0 : index
      %265 = vector.load %arg2[%c640, %c0_220] : memref<800x64xbf16, #tpu.memory_space<vmem>>, vector<32x64xbf16>
      %c4_i32 = arith.constant 4 : i32
      %266 = arith.addi %3, %c4_i32 : i32
      %c0_221 = arith.constant 0 : index
      %267 = arith.index_cast %266 : i32 to index
      %c0_222 = arith.constant 0 : index
      %c0_223 = arith.constant 0 : index
      %268 = vector.load %arg1[%c0_221, %267, %c0_222, %c0_223] : memref<1x14x14x32xbf16, #tpu.memory_space<vmem>>, vector<1x1x10x32xbf16>
      %269 = vector.shape_cast %268 : vector<1x1x10x32xbf16> to vector<10x32xbf16>
      %c1_i32_224 = arith.constant 1 : i32
      %270 = arith.addi %3, %c1_i32_224 : i32
      %c4_i32_225 = arith.constant 4 : i32
      %271 = arith.addi %270, %c4_i32_225 : i32
      %c0_226 = arith.constant 0 : index
      %272 = arith.index_cast %271 : i32 to index
      %c0_227 = arith.constant 0 : index
      %c0_228 = arith.constant 0 : index
      %273 = vector.load %arg1[%c0_226, %272, %c0_227, %c0_228] : memref<1x14x14x32xbf16, #tpu.memory_space<vmem>>, vector<1x1x10x32xbf16>
      %274 = vector.shape_cast %273 : vector<1x1x10x32xbf16> to vector<10x32xbf16>
      %275 = tpu.concatenate %269, %274 in 0 : vector<10x32xbf16>, vector<10x32xbf16> -> vector<20x32xbf16>
      %cst_229 = arith.constant dense<0.000000e+00> : vector<20x64xf32>
      %276 = tpu.matmul %275, %265, %cst_229 {dimension_numbers = #tpu.dot_dimension_numbers<[1], [0], [0], [1], [0, 0, 1, 1], [], []>} : vector<20x32xbf16>, vector<32x64xbf16>, vector<20x64xf32> -> vector<20x64xf32>
      %277 = arith.addf %264, %276 : vector<20x64xf32>
      %c672 = arith.constant 672 : index
      %c0_230 = arith.constant 0 : index
      %278 = vector.load %arg2[%c672, %c0_230] : memref<800x64xbf16, #tpu.memory_space<vmem>>, vector<32x64xbf16>
      %c4_i32_231 = arith.constant 4 : i32
      %279 = arith.addi %3, %c4_i32_231 : i32
      %c0_232 = arith.constant 0 : index
      %280 = arith.index_cast %279 : i32 to index
      %c1_233 = arith.constant 1 : index
      %c0_234 = arith.constant 0 : index
      %281 = vector.load %arg1[%c0_232, %280, %c1_233, %c0_234] : memref<1x14x14x32xbf16, #tpu.memory_space<vmem>>, vector<1x1x10x32xbf16>
      %282 = vector.shape_cast %281 : vector<1x1x10x32xbf16> to vector<10x32xbf16>
      %c1_i32_235 = arith.constant 1 : i32
      %283 = arith.addi %3, %c1_i32_235 : i32
      %c4_i32_236 = arith.constant 4 : i32
      %284 = arith.addi %283, %c4_i32_236 : i32
      %c0_237 = arith.constant 0 : index
      %285 = arith.index_cast %284 : i32 to index
      %c1_238 = arith.constant 1 : index
      %c0_239 = arith.constant 0 : index
      %286 = vector.load %arg1[%c0_237, %285, %c1_238, %c0_239] : memref<1x14x14x32xbf16, #tpu.memory_space<vmem>>, vector<1x1x10x32xbf16>
      %287 = vector.shape_cast %286 : vector<1x1x10x32xbf16> to vector<10x32xbf16>
      %288 = tpu.concatenate %282, %287 in 0 : vector<10x32xbf16>, vector<10x32xbf16> -> vector<20x32xbf16>
      %cst_240 = arith.constant dense<0.000000e+00> : vector<20x64xf32>
      %289 = tpu.matmul %288, %278, %cst_240 {dimension_numbers = #tpu.dot_dimension_numbers<[1], [0], [0], [1], [0, 0, 1, 1], [], []>} : vector<20x32xbf16>, vector<32x64xbf16>, vector<20x64xf32> -> vector<20x64xf32>
      %290 = arith.addf %277, %289 : vector<20x64xf32>
      %c704 = arith.constant 704 : index
      %c0_241 = arith.constant 0 : index
      %291 = vector.load %arg2[%c704, %c0_241] : memref<800x64xbf16, #tpu.memory_space<vmem>>, vector<32x64xbf16>
      %c4_i32_242 = arith.constant 4 : i32
      %292 = arith.addi %3, %c4_i32_242 : i32
      %c0_243 = arith.constant 0 : index
      %293 = arith.index_cast %292 : i32 to index
      %c2_244 = arith.constant 2 : index
      %c0_245 = arith.constant 0 : index
      %294 = vector.load %arg1[%c0_243, %293, %c2_244, %c0_245] : memref<1x14x14x32xbf16, #tpu.memory_space<vmem>>, vector<1x1x10x32xbf16>
      %295 = vector.shape_cast %294 : vector<1x1x10x32xbf16> to vector<10x32xbf16>
      %c1_i32_246 = arith.constant 1 : i32
      %296 = arith.addi %3, %c1_i32_246 : i32
      %c4_i32_247 = arith.constant 4 : i32
      %297 = arith.addi %296, %c4_i32_247 : i32
      %c0_248 = arith.constant 0 : index
      %298 = arith.index_cast %297 : i32 to index
      %c2_249 = arith.constant 2 : index
      %c0_250 = arith.constant 0 : index
      %299 = vector.load %arg1[%c0_248, %298, %c2_249, %c0_250] : memref<1x14x14x32xbf16, #tpu.memory_space<vmem>>, vector<1x1x10x32xbf16>
      %300 = vector.shape_cast %299 : vector<1x1x10x32xbf16> to vector<10x32xbf16>
      %301 = tpu.concatenate %295, %300 in 0 : vector<10x32xbf16>, vector<10x32xbf16> -> vector<20x32xbf16>
      %cst_251 = arith.constant dense<0.000000e+00> : vector<20x64xf32>
      %302 = tpu.matmul %301, %291, %cst_251 {dimension_numbers = #tpu.dot_dimension_numbers<[1], [0], [0], [1], [0, 0, 1, 1], [], []>} : vector<20x32xbf16>, vector<32x64xbf16>, vector<20x64xf32> -> vector<20x64xf32>
      %303 = arith.addf %290, %302 : vector<20x64xf32>
      %c736 = arith.constant 736 : index
      %c0_252 = arith.constant 0 : index
      %304 = vector.load %arg2[%c736, %c0_252] : memref<800x64xbf16, #tpu.memory_space<vmem>>, vector<32x64xbf16>
      %c4_i32_253 = arith.constant 4 : i32
      %305 = arith.addi %3, %c4_i32_253 : i32
      %c0_254 = arith.constant 0 : index
      %306 = arith.index_cast %305 : i32 to index
      %c3_255 = arith.constant 3 : index
      %c0_256 = arith.constant 0 : index
      %307 = vector.load %arg1[%c0_254, %306, %c3_255, %c0_256] : memref<1x14x14x32xbf16, #tpu.memory_space<vmem>>, vector<1x1x10x32xbf16>
      %308 = vector.shape_cast %307 : vector<1x1x10x32xbf16> to vector<10x32xbf16>
      %c1_i32_257 = arith.constant 1 : i32
      %309 = arith.addi %3, %c1_i32_257 : i32
      %c4_i32_258 = arith.constant 4 : i32
      %310 = arith.addi %309, %c4_i32_258 : i32
      %c0_259 = arith.constant 0 : index
      %311 = arith.index_cast %310 : i32 to index
      %c3_260 = arith.constant 3 : index
      %c0_261 = arith.constant 0 : index
      %312 = vector.load %arg1[%c0_259, %311, %c3_260, %c0_261] : memref<1x14x14x32xbf16, #tpu.memory_space<vmem>>, vector<1x1x10x32xbf16>
      %313 = vector.shape_cast %312 : vector<1x1x10x32xbf16> to vector<10x32xbf16>
      %314 = tpu.concatenate %308, %313 in 0 : vector<10x32xbf16>, vector<10x32xbf16> -> vector<20x32xbf16>
      %cst_262 = arith.constant dense<0.000000e+00> : vector<20x64xf32>
      %315 = tpu.matmul %314, %304, %cst_262 {dimension_numbers = #tpu.dot_dimension_numbers<[1], [0], [0], [1], [0, 0, 1, 1], [], []>} : vector<20x32xbf16>, vector<32x64xbf16>, vector<20x64xf32> -> vector<20x64xf32>
      %316 = arith.addf %303, %315 : vector<20x64xf32>
      %c768 = arith.constant 768 : index
      %c0_263 = arith.constant 0 : index
      %317 = vector.load %arg2[%c768, %c0_263] : memref<800x64xbf16, #tpu.memory_space<vmem>>, vector<32x64xbf16>
      %c4_i32_264 = arith.constant 4 : i32
      %318 = arith.addi %3, %c4_i32_264 : i32
      %c0_265 = arith.constant 0 : index
      %319 = arith.index_cast %318 : i32 to index
      %c4_266 = arith.constant 4 : index
      %c0_267 = arith.constant 0 : index
      %320 = vector.load %arg1[%c0_265, %319, %c4_266, %c0_267] : memref<1x14x14x32xbf16, #tpu.memory_space<vmem>>, vector<1x1x10x32xbf16>
      %321 = vector.shape_cast %320 : vector<1x1x10x32xbf16> to vector<10x32xbf16>
      %c1_i32_268 = arith.constant 1 : i32
      %322 = arith.addi %3, %c1_i32_268 : i32
      %c4_i32_269 = arith.constant 4 : i32
      %323 = arith.addi %322, %c4_i32_269 : i32
      %c0_270 = arith.constant 0 : index
      %324 = arith.index_cast %323 : i32 to index
      %c4_271 = arith.constant 4 : index
      %c0_272 = arith.constant 0 : index
      %325 = vector.load %arg1[%c0_270, %324, %c4_271, %c0_272] : memref<1x14x14x32xbf16, #tpu.memory_space<vmem>>, vector<1x1x10x32xbf16>
      %326 = vector.shape_cast %325 : vector<1x1x10x32xbf16> to vector<10x32xbf16>
      %327 = tpu.concatenate %321, %326 in 0 : vector<10x32xbf16>, vector<10x32xbf16> -> vector<20x32xbf16>
      %cst_273 = arith.constant dense<0.000000e+00> : vector<20x64xf32>
      %328 = tpu.matmul %327, %317, %cst_273 {dimension_numbers = #tpu.dot_dimension_numbers<[1], [0], [0], [1], [0, 0, 1, 1], [], []>} : vector<20x32xbf16>, vector<32x64xbf16>, vector<20x64xf32> -> vector<20x64xf32>
      %329 = arith.addf %316, %328 : vector<20x64xf32>
      %330 = vector.broadcast %0 : vector<1x64xf32> to vector<20x64xf32>
      %331 = arith.addf %329, %330 : vector<20x64xf32>
      %cst_274 = arith.constant 0.000000e+00 : f32
      %332 = vector.broadcast %cst_274 : f32 to vector<20x64xf32>
      %333 = arith.cmpf ogt, %331, %332 : vector<20x64xf32>
      %334 = vector.broadcast %1 : vector<1x64xf32> to vector<20x64xf32>
      %335 = arith.mulf %334, %331 : vector<20x64xf32>
      %336 = arith.select %333, %331, %335 : vector<20x64xi1>, vector<20x64xf32>
      %337 = vector.extract_strided_slice %336 {offsets = [0, 0], sizes = [10, 64], strides = [1, 1]} : vector<20x64xf32> to vector<10x64xf32>
      %338 = vector.extract_strided_slice %336 {offsets = [10, 0], sizes = [10, 64], strides = [1, 1]} : vector<20x64xf32> to vector<10x64xf32>
      %339 = arith.maximumf %337, %338 : vector<10x64xf32>
      %c0_275 = arith.constant 0 : index
      %c0_276 = arith.constant 0 : index
      %340 = vector.load %arg6[%c0_275, %c0_276] : memref<10x64xf32, #tpu.memory_space<vmem>>, vector<10x64xf32>
      tpu.vector_store %arg6[%c0_275, %c0_276], %339 {strides = array<i32>} : memref<10x64xf32, #tpu.memory_space<vmem>>, vector<10x64xf32>,
      %c0_277 = arith.constant 0 : index
      %c0_278 = arith.constant 0 : index
      %341 = tpu.strided_load %arg6[%c0_277, %c0_278] {strides = array<i32: 2, 1>} : memref<10x64xf32, #tpu.memory_space<vmem>>, vector<5x64xf32>
      %c1_279 = arith.constant 1 : index
      %c0_280 = arith.constant 0 : index
      %342 = tpu.strided_load %arg6[%c1_279, %c0_280] {strides = array<i32: 2, 1>} : memref<10x64xf32, #tpu.memory_space<vmem>>, vector<5x64xf32>
      %343 = arith.maximumf %341, %342 : vector<5x64xf32>
      %344 = arith.truncf %343 : vector<5x64xf32> to vector<5x64xbf16>
      %c0_281 = arith.constant 0 : index
      %345 = arith.index_cast %arg7 : i32 to index
      %c0_282 = arith.constant 0 : index
      %c0_283 = arith.constant 0 : index
      %346 = vector.load %arg5[%c0_281, %345, %c0_282, %c0_283] : memref<1x5x5x64xbf16, #tpu.memory_space<vmem>>, vector<1x1x5x64xbf16>
      %347 = vector.shape_cast %346 : vector<1x1x5x64xbf16> to vector<5x64xbf16>
      %348 = vector.shape_cast %344 : vector<5x64xbf16> to vector<1x1x5x64xbf16>
      tpu.vector_store %arg5[%c0_281, %345, %c0_282, %c0_283], %348 {strides = array<i32>} : memref<1x5x5x64xbf16, #tpu.memory_space<vmem>>, vector<1x1x5x64xbf16>,
    }
    %c5_i32_3 = arith.constant 5 : i32
    return
  }
  func.func @transform_0(%arg0: i32) -> (i32, i32, i32, i32) {
    %c0_i32 = arith.constant 0 : i32
    %c0_i32_0 = arith.constant 0 : i32
    %c0_i32_1 = arith.constant 0 : i32
    %c0_i32_2 = arith.constant 0 : i32
    return %arg0, %c0_i32, %c0_i32_0, %c0_i32_1 : i32, i32, i32, i32
  }
  func.func @transform_1(%arg0: i32) -> (i32, i32) {
    %c0_i32 = arith.constant 0 : i32
    %c0_i32_0 = arith.constant 0 : i32
    %c0_i32_1 = arith.constant 0 : i32
    return %c0_i32, %c0_i32_0 : i32, i32
  }
  func.func @transform_2(%arg0: i32) -> (i32, i32) {
    %c0_i32 = arith.constant 0 : i32
    %c0_i32_0 = arith.constant 0 : i32
    %c0_i32_1 = arith.constant 0 : i32
    return %c0_i32, %c0_i32_0 : i32, i32
  }
  func.func @transform_3(%arg0: i32) -> (i32, i32) {
    %c0_i32 = arith.constant 0 : i32
    %c0_i32_0 = arith.constant 0 : i32
    %c0_i32_1 = arith.constant 0 : i32
    return %c0_i32, %c0_i32_0 : i32, i32
  }
  func.func @transform_4(%arg0: i32) -> (i32, i32, i32, i32) {
    %c0_i32 = arith.constant 0 : i32
    %c0_i32_0 = arith.constant 0 : i32
    %c0_i32_1 = arith.constant 0 : i32
    %c0_i32_2 = arith.constant 0 : i32
    return %arg0, %c0_i32, %c0_i32_0, %c0_i32_1 : i32, i32, i32, i32
  }
}

module attributes {stable_mosaic.version = 11 : i64} {
  func.func @_fc_stack_kernel(%arg0: i32, %arg1: i32, %arg2: memref<8x1600xbf16, #tpu.memory_space<vmem>>, %arg3: memref<1600x256xbf16, #tpu.memory_space<vmem>>, %arg4: memref<1x256xf32, #tpu.memory_space<vmem>>, %arg5: memref<1x256xf32, #tpu.memory_space<vmem>>, %arg6: memref<256x256xbf16, #tpu.memory_space<vmem>>, %arg7: memref<1x256xf32, #tpu.memory_space<vmem>>, %arg8: memref<1x256xf32, #tpu.memory_space<vmem>>, %arg9: memref<256x128xbf16, #tpu.memory_space<vmem>>, %arg10: memref<1x128xf32, #tpu.memory_space<vmem>>, %arg11: memref<8x128xf32, #tpu.memory_space<vmem>>, %arg12: memref<8x256xf32, #tpu.memory_space<vmem>>) attributes {dimension_semantics = [#tpu.dimension_semantics<parallel>, #tpu.dimension_semantics<arbitrary>], iteration_bounds = array<i64: 1, 1>, scalar_prefetch = 0 : i64, scratch_operands = 1 : i64, tpu.core_type = #tpu.core_type<tc>, window_params = [{transform_indices = @transform_0, window_bounds = array<i64: 8, 1600>}, {transform_indices = @transform_1, window_bounds = array<i64: 1600, 256>}, {pipeline_mode = #tpu.pipeline_mode<synchronous>, transform_indices = @transform_2, window_bounds = array<i64: 1, 256>}, {pipeline_mode = #tpu.pipeline_mode<synchronous>, transform_indices = @transform_3, window_bounds = array<i64: 1, 256>}, {pipeline_mode = #tpu.pipeline_mode<synchronous>, transform_indices = @transform_4, window_bounds = array<i64: 256, 256>}, {pipeline_mode = #tpu.pipeline_mode<synchronous>, transform_indices = @transform_5, window_bounds = array<i64: 1, 256>}, {pipeline_mode = #tpu.pipeline_mode<synchronous>, transform_indices = @transform_6, window_bounds = array<i64: 1, 256>}, {pipeline_mode = #tpu.pipeline_mode<synchronous>, transform_indices = @transform_7, window_bounds = array<i64: 256, 128>}, {pipeline_mode = #tpu.pipeline_mode<synchronous>, transform_indices = @transform_8, window_bounds = array<i64: 1, 128>}, {transform_indices = @transform_9, window_bounds = array<i64: 8, 128>}]} {
    %c0_i32 = arith.constant 0 : i32
    %0 = arith.cmpi eq, %arg1, %c0_i32 : i32
    %1 = arith.extui %0 : i1 to i32
    %c0_i32_0 = arith.constant 0 : i32
    %2 = arith.cmpi ne, %1, %c0_i32_0 : i32
    scf.if %2 {
      %cst_10 = arith.constant 0.000000e+00 : f32
      %12 = vector.broadcast %cst_10 : f32 to vector<8x256xf32>
      %c0_11 = arith.constant 0 : index
      %c0_12 = arith.constant 0 : index
      %13 = vector.load %arg12[%c0_11, %c0_12] : memref<8x256xf32, #tpu.memory_space<vmem>>, vector<8x256xf32>
      tpu.vector_store %arg12[%c0_11, %c0_12], %12 {strides = array<i32>} : memref<8x256xf32, #tpu.memory_space<vmem>>, vector<8x256xf32>,
    } else {
    }
    %c0 = arith.constant 0 : index
    %c0_1 = arith.constant 0 : index
    %3 = vector.load %arg12[%c0, %c0_1] : memref<8x256xf32, #tpu.memory_space<vmem>>, vector<8x256xf32>
    %c0_2 = arith.constant 0 : index
    %c0_3 = arith.constant 0 : index
    %4 = vector.load %arg2[%c0_2, %c0_3] : memref<8x1600xbf16, #tpu.memory_space<vmem>>, vector<8x1600xbf16>
    %c0_4 = arith.constant 0 : index
    %c0_5 = arith.constant 0 : index
    %5 = vector.load %arg3[%c0_4, %c0_5] : memref<1600x256xbf16, #tpu.memory_space<vmem>>, vector<1600x256xbf16>
    %cst = arith.constant dense<0.000000e+00> : vector<8x256xf32>
    %6 = tpu.matmul %4, %5, %cst {dimension_numbers = #tpu.dot_dimension_numbers<[1], [0], [0], [1], [0, 0, 1, 1], [], []>} : vector<8x1600xbf16>, vector<1600x256xbf16>, vector<8x256xf32> -> vector<8x256xf32>
    %7 = arith.addf %3, %6 : vector<8x256xf32>
    %c0_6 = arith.constant 0 : index
    %c0_7 = arith.constant 0 : index
    %8 = vector.load %arg12[%c0_6, %c0_7] : memref<8x256xf32, #tpu.memory_space<vmem>>, vector<8x256xf32>
    tpu.vector_store %arg12[%c0_6, %c0_7], %7 {strides = array<i32>} : memref<8x256xf32, #tpu.memory_space<vmem>>, vector<8x256xf32>,
    %c0_i32_8 = arith.constant 0 : i32
    %9 = arith.cmpi eq, %arg1, %c0_i32_8 : i32
    %10 = arith.extui %9 : i1 to i32
    %c0_i32_9 = arith.constant 0 : i32
    %11 = arith.cmpi ne, %10, %c0_i32_9 : i32
    scf.if %11 {
      %c0_10 = arith.constant 0 : index
      %c0_11 = arith.constant 0 : index
      %12 = vector.load %arg12[%c0_10, %c0_11] : memref<8x256xf32, #tpu.memory_space<vmem>>, vector<8x256xf32>
      %c0_12 = arith.constant 0 : index
      %c0_13 = arith.constant 0 : index
      %13 = vector.load %arg4[%c0_12, %c0_13] : memref<1x256xf32, #tpu.memory_space<vmem>>, vector<1x256xf32>
      %14 = vector.broadcast %13 : vector<1x256xf32> to vector<8x256xf32>
      %15 = arith.addf %12, %14 : vector<8x256xf32>
      %cst_14 = arith.constant 0.000000e+00 : f32
      %16 = vector.broadcast %cst_14 : f32 to vector<8x256xf32>
      %17 = arith.cmpf ogt, %15, %16 : vector<8x256xf32>
      %c0_15 = arith.constant 0 : index
      %c0_16 = arith.constant 0 : index
      %18 = vector.load %arg5[%c0_15, %c0_16] : memref<1x256xf32, #tpu.memory_space<vmem>>, vector<1x256xf32>
      %19 = vector.broadcast %18 : vector<1x256xf32> to vector<8x256xf32>
      %20 = arith.mulf %19, %15 : vector<8x256xf32>
      %21 = arith.select %17, %15, %20 : vector<8x256xi1>, vector<8x256xf32>
      %22 = arith.truncf %21 : vector<8x256xf32> to vector<8x256xbf16>
      %c0_17 = arith.constant 0 : index
      %c0_18 = arith.constant 0 : index
      %23 = vector.load %arg6[%c0_17, %c0_18] : memref<256x256xbf16, #tpu.memory_space<vmem>>, vector<256x256xbf16>
      %cst_19 = arith.constant dense<0.000000e+00> : vector<8x256xf32>
      %24 = tpu.matmul %22, %23, %cst_19 {dimension_numbers = #tpu.dot_dimension_numbers<[1], [0], [0], [1], [0, 0, 1, 1], [], []>} : vector<8x256xbf16>, vector<256x256xbf16>, vector<8x256xf32> -> vector<8x256xf32>
      %c0_20 = arith.constant 0 : index
      %c0_21 = arith.constant 0 : index
      %25 = vector.load %arg7[%c0_20, %c0_21] : memref<1x256xf32, #tpu.memory_space<vmem>>, vector<1x256xf32>
      %26 = vector.broadcast %25 : vector<1x256xf32> to vector<8x256xf32>
      %27 = arith.addf %24, %26 : vector<8x256xf32>
      %cst_22 = arith.constant 0.000000e+00 : f32
      %28 = vector.broadcast %cst_22 : f32 to vector<8x256xf32>
      %29 = arith.cmpf ogt, %27, %28 : vector<8x256xf32>
      %c0_23 = arith.constant 0 : index
      %c0_24 = arith.constant 0 : index
      %30 = vector.load %arg8[%c0_23, %c0_24] : memref<1x256xf32, #tpu.memory_space<vmem>>, vector<1x256xf32>
      %31 = vector.broadcast %30 : vector<1x256xf32> to vector<8x256xf32>
      %32 = arith.mulf %31, %27 : vector<8x256xf32>
      %33 = arith.select %29, %27, %32 : vector<8x256xi1>, vector<8x256xf32>
      %34 = arith.truncf %33 : vector<8x256xf32> to vector<8x256xbf16>
      %c0_25 = arith.constant 0 : index
      %c0_26 = arith.constant 0 : index
      %35 = vector.load %arg9[%c0_25, %c0_26] : memref<256x128xbf16, #tpu.memory_space<vmem>>, vector<256x128xbf16>
      %cst_27 = arith.constant dense<0.000000e+00> : vector<8x128xf32>
      %36 = tpu.matmul %34, %35, %cst_27 {dimension_numbers = #tpu.dot_dimension_numbers<[1], [0], [0], [1], [0, 0, 1, 1], [], []>} : vector<8x256xbf16>, vector<256x128xbf16>, vector<8x128xf32> -> vector<8x128xf32>
      %c0_28 = arith.constant 0 : index
      %c0_29 = arith.constant 0 : index
      %37 = vector.load %arg10[%c0_28, %c0_29] : memref<1x128xf32, #tpu.memory_space<vmem>>, vector<1x128xf32>
      %38 = vector.broadcast %37 : vector<1x128xf32> to vector<8x128xf32>
      %39 = arith.addf %36, %38 : vector<8x128xf32>
      %c0_30 = arith.constant 0 : index
      %c0_31 = arith.constant 0 : index
      %40 = vector.load %arg11[%c0_30, %c0_31] : memref<8x128xf32, #tpu.memory_space<vmem>>, vector<8x128xf32>
      tpu.vector_store %arg11[%c0_30, %c0_31], %39 {strides = array<i32>} : memref<8x128xf32, #tpu.memory_space<vmem>>, vector<8x128xf32>,
    } else {
    }
    return
  }
  func.func @transform_0(%arg0: i32, %arg1: i32) -> (i32, i32) {
    %c0_i32 = arith.constant 0 : i32
    return %arg0, %arg1 : i32, i32
  }
  func.func @transform_1(%arg0: i32, %arg1: i32) -> (i32, i32) {
    %c0_i32 = arith.constant 0 : i32
    %c0_i32_0 = arith.constant 0 : i32
    return %arg1, %c0_i32 : i32, i32
  }
  func.func @transform_2(%arg0: i32, %arg1: i32) -> (i32, i32) {
    %c0_i32 = arith.constant 0 : i32
    %c0_i32_0 = arith.constant 0 : i32
    %c0_i32_1 = arith.constant 0 : i32
    return %c0_i32, %c0_i32_0 : i32, i32
  }
  func.func @transform_3(%arg0: i32, %arg1: i32) -> (i32, i32) {
    %c0_i32 = arith.constant 0 : i32
    %c0_i32_0 = arith.constant 0 : i32
    %c0_i32_1 = arith.constant 0 : i32
    return %c0_i32, %c0_i32_0 : i32, i32
  }
  func.func @transform_4(%arg0: i32, %arg1: i32) -> (i32, i32) {
    %c0_i32 = arith.constant 0 : i32
    %c0_i32_0 = arith.constant 0 : i32
    %c0_i32_1 = arith.constant 0 : i32
    return %c0_i32, %c0_i32_0 : i32, i32
  }
  func.func @transform_5(%arg0: i32, %arg1: i32) -> (i32, i32) {
    %c0_i32 = arith.constant 0 : i32
    %c0_i32_0 = arith.constant 0 : i32
    %c0_i32_1 = arith.constant 0 : i32
    return %c0_i32, %c0_i32_0 : i32, i32
  }
  func.func @transform_6(%arg0: i32, %arg1: i32) -> (i32, i32) {
    %c0_i32 = arith.constant 0 : i32
    %c0_i32_0 = arith.constant 0 : i32
    %c0_i32_1 = arith.constant 0 : i32
    return %c0_i32, %c0_i32_0 : i32, i32
  }
  func.func @transform_7(%arg0: i32, %arg1: i32) -> (i32, i32) {
    %c0_i32 = arith.constant 0 : i32
    %c0_i32_0 = arith.constant 0 : i32
    %c0_i32_1 = arith.constant 0 : i32
    return %c0_i32, %c0_i32_0 : i32, i32
  }
  func.func @transform_8(%arg0: i32, %arg1: i32) -> (i32, i32) {
    %c0_i32 = arith.constant 0 : i32
    %c0_i32_0 = arith.constant 0 : i32
    %c0_i32_1 = arith.constant 0 : i32
    return %c0_i32, %c0_i32_0 : i32, i32
  }
  func.func @transform_9(%arg0: i32, %arg1: i32) -> (i32, i32) {
    %c0_i32 = arith.constant 0 : i32
    %c0_i32_0 = arith.constant 0 : i32
    return %arg0, %c0_i32 : i32, i32
  }
}

</mosaic_0001>

<bundles_post_ra>
// kernel: embedding_net_forward.3
= control target key start
LH: loop header
LB: loop body
LE: loop exit
PB: predicated region body
PF: predicated region fallthrough
CT: control target
= control target key end

     0   :  { %s782_s15 = smov 0   ;;  %s784_s16 = smov 0   ;;  %s927_s0 = inlined_call_operand.vmem [shape: bf16[2,28,28,75], index: 0, kind: input, shape index: {}]   ;;  %s928_s1 = inlined_call_operand.vmem [shape: bf16[75,32], index: 1, kind: input, shape index: {}]   ;;  %s929_s2 = inlined_call_operand.vmem [shape: f32[1,32], index: 2, kind: input, shape index: {}]   ;;  %s930_s3 = inlined_call_operand.vmem [shape: f32[1,32], index: 3, kind: input, shape index: {}]   ;;  %s931_s4 = inlined_call_operand.vmem [shape: bf16[2,14,14,32], index: 4, kind: output, shape index: {}]  }
   0x1   :  { %s786_s17 = smov 0  }
   0x2 LB: > { %s26_s18 = sadd.s32 1, %s746_s16  ;;  %p610_p0 = scmp.ge.s32.totalorder %s750_s17, 1  ;;  %s750_s17 = sphi %s786_s17, %s14_s17   ;;  %s746_s16 = sphi %s784_s16, %s933_s16   ;;  %s742_s15 = sphi %s782_s15, %s932_s15  }
   0x3   : > { %p28_p1 = scmp.ge.s32.totalorder %s26_s18, 2  ;;  %p184_p2 = scmp.lt.s32.totalorder %s750_s17, 3 }
   0x5   : > { %s935_s18 = smov (%p28_p1, %s26_s18), 0  ;;  %p185_p3 = pnand %p610_p0, %p184_p2 }
   0x6   : > { %p221_p4 = scmp.lt.s32.totalorder (!%p185_p3), %s742_s15, 1  ;;  %v803_v0 = vld [vmem:[%s928_s1] sm:$0xf] (!%p185_p3)  ;;  %v808_v1 = vld [vmem:[%s928_s1 + $0x4] sm:$0xf] (!%p185_p3)  ;;  %s870_s29 = smov (!%p185_p3), 0  }
   0x7   : > { %188 = sbr.rel (%p185_p3) target bundleno = 282 (0x11a), region = 36  ;;  %v813_v2 = vld [vmem:[%s928_s1 + $0x8] sm:$0xf] (!%p185_p3)  ;;  %v818_v3 = vld [vmem:[%s928_s1 + $0xc] sm:$0xf] (!%p185_p3) }
   0x8   : > { %v823_v4 = vld [vmem:[%s928_s1 + $0x10] sm:$0xf] (!%p185_p3)  ;;  %v828_v5 = vld [vmem:[%s928_s1 + $0x14] sm:$0xf] (!%p185_p3)  ;;  %v833_v6 = vld [vmem:[%s928_s1 + $0x18] sm:$0xf] (!%p185_p3) }
   0x9   : > { %v838_v7 = vld [vmem:[%s928_s1 + $0x1c] sm:$0xf] (!%p185_p3)  ;;  %v843_v8 = vld [vmem:[%s928_s1 + $0x20] sm:$0xf] (!%p185_p3)  ;;  %v848_v9 = vld [vmem:[%s928_s1 + $0x24] sm:$0x3] (!%p185_p3) }
   0xa   : > { %v853_v10 = vld [vmem:[%s929_s2] ss:$0 sm:$0xff] (!%p185_p3) }
   0xb   : > { %v858_v11 = vld [vmem:[%s930_s3] ss:$0 sm:$0xff] (!%p185_p3) }
   0xe   : > { %s937_s15 = smov (!%p221_p4, %s742_s15), 1 }
   0xf   : > { %s685_s13 = smul.u32 448, %s937_s15 }
  0x10   : > { %s686_s22 = smul.u32 112, %s937_s15 }
  0x11   : > { %s863_s25 = scalar_lea.vmem %s927_s0, %s685_s13 }
  0x12   : > { %s868_s28 = scalar_lea.vmem %s931_s4, %s686_s22 }
  0x13 LB: >> { %v627_v12 = vcombine.low %v803_v0, %v808_v1  ;;  %v628_v13 = vcombine.low %v813_v2, %v818_v3  ;;  %s643_s15 = sshll.u32 %s754_s29, 5  ;;  %vm352_vm0 = vcmask 1044480   ;;  %vm340_vm1 = vcmask 613376   ;;  %s647_s5 = sshll.u32 %s754_s29, 3  ;;  %s754_s29 = sphi %s870_s29, %s260_s29  }
  0x14   : >> { %s264_s30 = scalar_lea.vmem %s863_s25, %s643_s15  ;;  %v629_v14 = vcombine.low %v823_v4, %v828_v5  ;;  %vm297_vm2 = vcmask 1045504   ;;  %v756_v16 = vmov 65535   ;;  %v630_v20 = vcombine.low %v833_v6, %v838_v7  ;;  %s493_s6 = scalar_lea.vmem %s868_s28, %s647_s5 }
  0x15   : >> { %657 = vmatprep.subr.bf16.mxu0 %v627_v12  ;;  %675 = vmatprep.subr.bf16.mxu1 %v627_v12  ;;  %v720_v15 = vld [vmem:[%s264_s30] sm:$0xff]   ;;  %v353_v17 = vsel %vm352_vm0, 4294967295, %v756_v16  ;;  %v721_v18 = vld [vmem:[%s264_s30 + $0x10] sm:$0xff]   ;;  %v722_v19 = vld [vmem:[%s264_s30 + $0x18] sm:$0x3f]   ;;  %v631_v21 = vcombine.low %v843_v8, %v848_v9  ;;  %vm453_vm5 = vcmask 1043456  }
  0x16   : >> { %658 = vmatpush3.bf16.msra.mxu0 %v627_v12  ;;  %680 = vmatpush3.bf16.msra.mxu1 %v627_v12  ;;  %v298_v22 = vrot.slane %v721_v18, 2  ;;  %v299_v23 = vrot.slane %v722_v19, 2  ;;  %v354_v24 = vsel %vm297_vm2, %v353_v17, 0  ;;  %v723_v27 = vld [vmem:[%s264_s30 + $0x8] sm:$0x3f]   ;;  %vm473_vm7 = vcmask 257024  }
  0x17   : >> { %659 = vmatprep.subr.bf16.mxu0 %v628_v13  ;;  %676 = vmatprep.subr.bf16.mxu1 %v628_v13  ;;  %v356_v26 = vand.u32 %v631_v21, %v354_v24  ;;  %vm469_vm12 = vcmask 261120   ;;  %vm495_vm13 = vcmask 256000   ;;  %s260_s29 = sadd.s32 1, %s754_s29  }
  0x18   : >> { %667 = vmatprep.mubr.msk.bf16.mxu0 %vm340_vm1, %v720_v15  ;;  %v300_v25 = vsel %vm297_vm2, %v298_v22, %v299_v23  ;;  %v304_v28 = vsel %vm297_vm2, %v723_v27, %v298_v22  ;;  %p257_p5 = scmp.ge.s32.totalorder %s260_s29, 14  }
  0x19   : >> { %671 = vmatprep.mubr.msk.bf16.mxu1 %vm340_vm1, %v300_v25 }
  0x1a   : >> { %660 = vmatpush3.bf16.msra.mxu0 %v628_v13  ;;  %681 = vmatpush3.bf16.msra.mxu1 %v628_v13 }
  0x1b   : >> { %661 = vmatprep.subr.bf16.mxu0 %v629_v14  ;;  %677 = vmatprep.subr.bf16.mxu1 %v629_v14 }
  0x1e   : >> { %662 = vmatpush3.bf16.msra.mxu0 %v629_v14  ;;  %682 = vmatpush3.bf16.msra.mxu1 %v629_v14 }
  0x1f   : >> { %663 = vmatprep.subr.bf16.mxu0 %v630_v20  ;;  %678 = vmatprep.subr.bf16.mxu1 %v630_v20 }
  0x22   : >> { %664 = vmatpush3.bf16.msra.mxu0 %v630_v20  ;;  %683 = vmatpush3.bf16.msra.mxu1 %v630_v20 }
  0x23   : >> { %665 = vmatprep.subr.bf16.mxu0 %v356_v26  ;;  %679 = vmatprep.subr.bf16.mxu1 %v356_v26 }
  0x26   : >> { %666 = vmatpush3.bf16.msra.mxu0 %v356_v26  ;;  %684 = vmatpush3.bf16.msra.mxu1 %v356_v26 }
  0x29   : >> { %668 = vmatmul.mubr.msk.bf16.vlgmr.msra.gmra.mrb[0].mxu0 %vm340_vm1, %v304_v28  ;;  %672 = vmatmul.mubr.msk.bf16.vlgmr.msra.gmra.mrb[0].mxu1 %vm340_vm1, %v299_v23 }
  0xfc   : >> { %v669_v29 = vpop.f32.mrb[0].mxu0  ;;  %v673_v30 = vpop.f32.mrb[0].mxu1 }
  0xfd   : >> { %v417_v31 = vadd.f32 %v673_v30, %v853_v10  ;;  %v392_v32 = vpop.f32.mrb[1].mxu0  ;;  %v408_v33 = vpop.f32.mrb[1].mxu1  ;;  %v401_v37 = vadd.f32 %v669_v29, %v853_v10 }
  0xfe   : >> { %v409_v34 = vadd.f32 %v853_v10, %v408_v33  ;;  %v670_v35 = vpop.f32.mrb[2].mxu0  ;;  %v674_v36 = vpop.f32.mrb[2].mxu1  ;;  %v393_v41 = vadd.f32 %v853_v10, %v392_v32 }
  0xff   : >> { %vm428_vm3 = vcmp.gt.f32.partialorder %v417_v31, 0.0  ;;  %v441_v38 = vmul.f32 %v858_v11, %v417_v31  ;;  %v395_v39 = vpop.f32.mrb[3].mxu0  ;;  %v411_v40 = vpop.f32.mrb[3].mxu1  ;;  %v404_v44 = vadd.f32 %v670_v35, %v853_v10  ;;  %v437_v49 = vmul.f32 %v858_v11, %v401_v37 }
 0x100   : >> { %vm426_vm4 = vcmp.gt.f32.partialorder %v409_v34, 0.0  ;;  %v439_v42 = vmul.f32 %v858_v11, %v409_v34  ;;  %v396_v45 = vadd.f32 %v853_v10, %v395_v39  ;;  %v412_v48 = vadd.f32 %v853_v10, %v411_v40 }
 0x101   : >> { %v448_v43 = vsel %vm428_vm3, %v417_v31, %v441_v38  ;;  %vm425_vm6 = vcmp.gt.f32.partialorder %v404_v44, 0.0  ;;  %v438_v50 = vmul.f32 %v858_v11, %v404_v44  ;;  %v435_v51 = vmul.f32 %v858_v11, %v393_v41 }
 0x102   : >> { %v459_v46 = vrot.slane %v448_v43, 4  ;;  %v446_v47 = vsel %vm426_vm4, %v409_v34, %v439_v42  ;;  %vm427_vm8 = vcmp.gt.f32.partialorder %v412_v48, 0.0  ;;  %v440_v53 = vmul.f32 %v858_v11, %v412_v48 }
 0x103   : >> { %v455_v52 = vrot.slane %v446_v47, 4  ;;  %vm424_vm9 = vcmp.gt.f32.partialorder %v401_v37, 0.0  ;;  %vm422_vm10 = vcmp.gt.f32.partialorder %v393_v41, 0.0  ;;  %v445_v54 = vsel %vm425_vm6, %v404_v44, %v438_v50 }
 0x104   : >> { %v436_v55 = vmul.f32 %v858_v11, %v396_v45  ;;  %v454_v56 = vrot.slane %v445_v54, 4  ;;  %v468_v57 = vmax.f32 %v445_v54, %v459_v46  ;;  %vm423_vm11 = vcmp.gt.f32.partialorder %v396_v45, 0.0 }
 0x105   : >> { %v447_v58 = vsel %vm427_vm8, %v412_v48, %v440_v53  ;;  %v444_v60 = vsel %vm424_vm9, %v401_v37, %v437_v49  ;;  %v442_v61 = vsel %vm422_vm10, %v393_v41, %v435_v51 }
 0x106   : >> { %v457_v59 = vrot.slane %v447_v58, 4  ;;  %v456_v62 = vsel %vm453_vm5, %v454_v56, %v455_v52  ;;  %474 = vst.msk [vmem:[#allocation2 + $0x18] sm:$0xf] %vm473_vm7, %v468_v57  ;;  %v443_v12 = vsel %vm423_vm11, %v396_v45, %v436_v55 }
 0x107   : >> { %v465_v63 = vmax.f32 %v442_v61, %v456_v62 }
 0x108   : >> { %v458_v13 = vsel %vm453_vm5, %v455_v52, %v457_v59  ;;  %v460_v14 = vsel %vm453_vm5, %v457_v59, %v459_v46 }
 0x109   : >> { %v466_v15 = vmax.f32 %v443_v12, %v458_v13  ;;  %v467_v16 = vmax.f32 %v444_v60, %v460_v14  ;;  %470 = vst.msk [vmem:[#allocation2] sm:$0xff] %vm469_vm12, %v465_v63 }
 0x10b   : >> { %471 = vst.msk [vmem:[#allocation2 + $0x8] sm:$0xff] %vm469_vm12, %v466_v15  ;;  %472 = vst.msk [vmem:[#allocation2 + $0x10] sm:$0xff] %vm469_vm12, %v467_v16 }
 0x112   : >> { %v475_v17 = vld [vmem:[#allocation2] ss:$2 sm:$0xff]  ;;  %v477_v18 = vld [vmem:[#allocation2 + $0x10] ss:$2 sm:$0x3f] }
 0x113   : >> { %v479_v19 = vld [vmem:[#allocation2 + $0x1] ss:$2 sm:$0xff]  ;;  %v481_v20 = vld [vmem:[#allocation2 + $0x11] ss:$2 sm:$0x3f]  ;;  %259 = sbr.rel (!%p257_p5) target bundleno = 19 (0x13), region = 79 }
 0x114   : >> { %v482_v21 = vmax.f32 %v475_v17, %v479_v19  ;;  %v483_v22 = vmax.f32 %v477_v18, %v481_v20 }
 0x116   : >> { %v645_v23 = vpack.c.bf16 %v482_v21, %v482_v21  ;;  %v646_v24 = vpack.c.bf16 %v483_v22, %v483_v22 }
 0x118   : >> { %494 = vst.msk [vmem:[%s493_s6] sm:$0xf] %vm473_vm7, %v645_v23 }
 0x119   : >> { %496 = vst.msk [vmem:[%s493_s6 + $0x4] sm:$0x7] %vm495_vm13, %v646_v24 }
 0x11a PF: > { %s14_s17 = sadd.s32 1, %s750_s17   ;;  %s932_s15 = smov %s746_s16 }
 0x11b   : > { %p11_p6 = scmp.ge.s32.totalorder %s14_s17, 4   ;;  %s933_s16 = smov %s935_s18 }
 0x11d   :  { %13 = sbr.rel (!%p11_p6) target bundleno = 2 (0x2), region = 90 }

// kernel: embedding_net_forward.4
= control target key start
LH: loop header
LB: loop body
LE: loop exit
PB: predicated region body
PF: predicated region fallthrough
CT: control target
= control target key end

     0   :  { %s3148_s15 = smov 0   ;;  %s3675_s0 = inlined_call_operand.vmem [shape: bf16[2,14,14,32], index: 0, kind: input, shape index: {}]   ;;  %s3676_s1 = inlined_call_operand.vmem [shape: bf16[800,64], index: 1, kind: input, shape index: {}]   ;;  %s3677_s2 = inlined_call_operand.vmem [shape: f32[1,64], index: 2, kind: input, shape index: {}]   ;;  %s3678_s3 = inlined_call_operand.vmem [shape: f32[1,64], index: 3, kind: input, shape index: {}]   ;;  %s3679_s4 = inlined_call_operand.vmem [shape: bf16[2,5,5,64], index: 4, kind: output, shape index: {}]  }
   0x1 LB: > { %s2499_s16 = sadd.s32 4294967295, %s3117_s15   ;;  %p2503_p0 = scmp.ge.s32.totalorder %s3117_s15, 1  ;;  %s3117_s15 = sphi %s3148_s15, %s14_s15  }
   0x2   : > { %p162_p1 = scmp.lt.s32.totalorder %s3117_s15, 3 }
   0x4   : > { %p163_p2 = pnand %p2503_p0, %p162_p1 }
   0x5   : > { %p188_p3 = scmp.lt.s32.totalorder (!%p163_p2), %s2499_s16, 1  ;;  %v3159_v0 = vld [vmem:[%s3677_s2] ss:$0 sm:$0xff] (!%p163_p2)  ;;  %s3176_s29 = smov (!%p163_p2), 0  }
   0x6   : > { %166 = sbr.rel (%p163_p2) target bundleno = 370 (0x172), region = 36  ;;  %v3164_v1 = vld [vmem:[%s3678_s3] ss:$0 sm:$0xff] (!%p163_p2) }
   0xd   : > { %s3681_s16 = smov (!%p188_p3, %s2499_s16), 1 }
   0xe   : > { %s3000_s21 = smul.u32 112, %s3681_s16 }
   0xf   : > { %s3001_s22 = smul.u32 20, %s3681_s16 }
  0x10   : > { %s3169_s25 = scalar_lea.vmem %s3675_s0, %s3000_s21 }
  0x11   : > { %s3174_s28 = scalar_lea.vmem %s3679_s4, %s3001_s22 }
  0x12 LB: >> { %v3018_v2 = vld [vmem:[%s3676_s1 + $0x10] sm:$0xff]   ;;  %v3019_v3 = vld [vmem:[%s3676_s1] sm:$0xff]   ;;  %v3020_v4 = vld [vmem:[%s3676_s1 + $0x18] sm:$0xff]   ;;  %s2694_s10 = sshll.u32 %s3121_s29, 4  ;;  %vm234_vm0 = vcmask 1044480   ;;  %vm280_vm1 = vcmask 261120   ;;  %s3121_s29 = sphi %s3176_s29, %s206_s29  }
  0x13   : >> { %2800 = vmatprep.subr.bf16.mxu0 %v3018_v2  ;;  %2808 = vmatprep.subr.bf16.mxu1 %v3019_v3  ;;  %v3021_v5 = vld [vmem:[%s3676_s1 + $0x8] sm:$0xff]   ;;  %s3195_s13 = scalar_lea.vmem %s3169_s25, %s2694_s10  ;;  %v3026_v16 = vld [vmem:[%s3676_s1 + $0x20] sm:$0xff]   ;;  %v3027_v22 = vld [vmem:[%s3676_s1 + $0x30] sm:$0xff]   ;;  %vm2390_vm5 = vcmask 1045504   ;;  %vm2400_vm6 = vcmask 517120   ;;  %vm2398_vm7 = vcmask 523264  }
  0x14   : >> { %2801 = vmatpush3.bf16.msra.mxu0 %v3018_v2  ;;  %2809 = vmatpush3.bf16.msra.mxu1 %v3019_v3  ;;  %v215_v6 = vld [vmem:[%s3195_s13] sm:$0xf]  ;;  %v2511_v7 = vld [vmem:[%s3195_s13 + $0x8] sm:$0xf]  ;;  %v242_v8 = vld [vmem:[%s3195_s13 + $0x4] sm:$0x3] }
  0x15   : >> { %2802 = vmatprep.subr.bf16.mxu0 %v3020_v4  ;;  %2810 = vmatprep.subr.bf16.mxu1 %v3021_v5  ;;  %v3201_v9 = vld [vmem:[%s3195_s13 + $0xc] sm:$0x3]  ;;  %v2516_v10 = vcombine.low %v215_v6, %v242_v8  ;;  %v216_v11 = vld [vmem:[%s3195_s13 + $0x4] sm:$0x1]  ;;  %v3029_v27 = vld [vmem:[%s3676_s1 + $0x38] sm:$0xff]   ;;  %s2690_s21 = sshll.u32 %s3121_s29, 2 }
  0x16   : >> { %v2512_v12 = vld [vmem:[%s3195_s13 + $0xc] sm:$0x1]  ;;  %v3206_v13 = vcombine.low %v2511_v7, %v3201_v9  ;;  %v2513_v14 = vcombine.low %v215_v6, %v216_v11  ;;  %v401_v29 = vld [vmem:[%s3195_s13] sm:$0xe]  ;;  %v3230_v30 = vld [vmem:[%s3195_s13 + $0x8] sm:$0xe]  ;;  %v2529_v58 = vcombine.low %v3201_v9, %v3201_v9  ;;  %s2408_s22 = scalar_lea.vmem %s3174_s28, %s2690_s21 }
  0x17   : >> { %v3208_v15 = vcombine.low %v2511_v7, %v2512_v12  ;;  %v248_v17 = vshrl.u32 %v2516_v10, 16  ;;  %v250_v18 = vshll.u32 %v2516_v10, 16  ;;  %v486_v31 = vld [vmem:[%s3195_s13 + $0x4] sm:$0x7]  ;;  %v2527_v33 = vcombine.low %v401_v29, %v242_v8  ;;  %v2534_v35 = vld [vmem:[%s3195_s13 + $0xc] sm:$0x7] }
  0x18   : >> { %2803 = vmatpush3.bf16.msra.mxu0 %v3020_v4  ;;  %2811 = vmatpush3.bf16.msra.mxu1 %v3021_v5  ;;  %v258_v19 = vshrl.u32 %v3206_v13, 16  ;;  %v261_v20 = vshll.u32 %v3206_v13, 16  ;;  %v2528_v34 = vcombine.low %v3230_v30, %v3230_v30  ;;  %v2535_v36 = vcombine.low %v401_v29, %v486_v31  ;;  %v3028_v37 = vld [vmem:[%s3676_s1 + $0x28] sm:$0xff]   ;;  %v3036_v43 = vld [vmem:[%s3676_s1 + $0x50] sm:$0xff]   ;;  %v3034_v47 = vld [vmem:[%s3676_s1 + $0x40] sm:$0xff]   ;;  %s206_s29 = sadd.s32 1, %s3121_s29  }
  0x19   : >> { %v233_v21 = vrot.slane %v3208_v15, 3  ;;  %2816 = vmatprep.subr.bf16.mxu0 %v3026_v16  ;;  %v252_v23 = vrot.slane %v250_v18, 1  ;;  %2824 = vmatprep.subr.bf16.mxu1 %v3027_v22  ;;  %v3241_v38 = vcombine.low %v3230_v30, %v2534_v35  ;;  %v406_v40 = vrot.slane %v2527_v33, 1  ;;  %v584_v52 = vld [vmem:[%s3195_s13] sm:$0xc]  ;;  %v3038_v62 = vld [vmem:[%s3676_s1 + $0x58] sm:$0xff]  }
  0x1a   : >> { %v260_v24 = vrot.slane %v258_v19, 3  ;;  %v263_v25 = vrot.slane %v261_v20, 4  ;;  %v492_v41 = vshrl.u32 %v2535_v36, 16  ;;  %v495_v42 = vshll.u32 %v2535_v36, 16  ;;  %v2541_v53 = vld [vmem:[%s3195_s13 + $0x8] sm:$0xc] }
  0x1b   : >> { %v237_v26 = vsel %vm234_vm0, %v2513_v14, %v233_v21  ;;  %v253_v28 = vor.u32 %v252_v23, %v248_v17  ;;  %v503_v44 = vshrl.u32 %v3241_v38, 16  ;;  %v506_v45 = vshll.u32 %v3241_v38, 16  ;;  %v2550_v57 = vld [vmem:[%s3195_s13 + $0x10] sm:$0xf]  ;;  %v2551_v60 = vld [vmem:[%s3195_s13 + $0x14] sm:$0x1] }
  0x1c   : >> { %2812 = vmatprep.mubr.msk.bf16.mxu1 %vm280_vm1, %v237_v26  ;;  %v264_v32 = vor.u32 %v263_v25, %v260_v24  ;;  %v413_v46 = vsel %vm234_vm0, %v406_v40, %v2528_v34  ;;  %v494_v48 = vrot.slane %v492_v41, 1  ;;  %v497_v49 = vrot.slane %v495_v42, 2  ;;  %v3269_v61 = vld [vmem:[%s3195_s13 + $0x14] sm:$0x3]  ;;  %v3037_v6 = vld [vmem:[%s3676_s1 + $0x48] sm:$0xff]   ;;  %v3041_v23 = vld [vmem:[%s3676_s1 + $0x60] sm:$0xff]  }
  0x1d   : >> { %2813 = vmatmul.mubr.msk.bf16.vlgmr.msra.gmra.mrb[0].mxu1 %vm280_vm1, %v233_v21  ;;  %v505_v50 = vrot.slane %v503_v44, 4  ;;  %v508_v51 = vrot.slane %v506_v45, 5  ;;  %v2542_v55 = vcombine.low %v584_v52, %v486_v31  ;;  %v3262_v56 = vcombine.low %v2541_v53, %v2534_v35  ;;  %v3300_v18 = vld [vmem:[%s3195_s13 + $0x10] sm:$0xe]  ;;  %v3045_v26 = vld [vmem:[%s3676_s1 + $0x68] sm:$0xff]   ;;  %v3046_v13 = vld [vmem:[%s3676_s1 + $0x78] sm:$0xff]  }
  0x1e   : >> { %2825 = vmatpush3.bf16.msra.mxu1 %v3027_v22  ;;  %v267_v39 = vsel %vm234_vm0, %v253_v28, %v264_v32  ;;  %v498_v54 = vor.u32 %v497_v49, %v494_v48  ;;  %v3275_v3 = vcombine.low %v2550_v57, %v2551_v60  ;;  %v3278_v4 = vcombine.low %v2550_v57, %v3269_v61  ;;  %v2571_v22 = vld [vmem:[%s3195_s13 + $0x14] sm:$0x7]  ;;  %v3047_v40 = vld [vmem:[%s3676_s1 + $0x80] sm:$0xff]   ;;  %v3053_v48 = vld [vmem:[%s3676_s1 + $0x88] sm:$0xff]   ;;  %p203_p4 = scmp.ge.s32.totalorder %s206_s29, 5  }
  0x1f   : >> { %2826 = vmatprep.subr.bf16.mxu1 %v3029_v27  ;;  %2804 = vmatprep.mubr.msk.bf16.mxu0 %vm280_vm1, %v267_v39  ;;  %v509_v59 = vor.u32 %v508_v51, %v505_v50  ;;  %v589_v63 = vrot.slane %v2542_v55, 2  ;;  %v593_v2 = vrot.slane %v3262_v56, 5  ;;  %v755_v12 = vrot.slane %v261_v20, 1  ;;  %v3044_v20 = vld [vmem:[%s3676_s1 + $0x70] sm:$0xff]   ;;  %v3348_v39 = vld [vmem:[%s3195_s13 + $0x1c] sm:$0x3] }
  0x20   : >> { %2805 = vmatmul.mubr.msk.bf16.vlgmr.msra.gmra.mrb[0].mxu0 %vm280_vm1, %v264_v32  ;;  %v679_v7 = vrot.slane %v3275_v3, 3  ;;  %v761_v8 = vshrl.u32 %v3278_v4, 16  ;;  %v764_v10 = vshll.u32 %v3278_v4, 16  ;;  %v2564_v21 = vcombine.low %v3230_v30, %v3201_v9  ;;  %v3052_v38 = vld [vmem:[%s3676_s1 + $0x90] sm:$0xff]   ;;  %v3054_v49 = vld [vmem:[%s3676_s1 + $0x98] sm:$0xff]  }
  0x21   : >> { %2817 = vmatpush3.bf16.msra.mxu0 %v3026_v16  ;;  %2820 = vmatprep.mubr.msk.bf16.mxu0 %vm280_vm1, %v413_v46  ;;  %v512_v5 = vsel %vm234_vm0, %v498_v54, %v509_v59  ;;  %v596_v11 = vsel %vm234_vm0, %v589_v63, %v593_v2  ;;  %v756_v9 = vor.u32 %v755_v12, %v258_v19  ;;  %v2577_v19 = vld [vmem:[%s3195_s13 + $0x10] sm:$0xc]  ;;  %v925_v30 = vrot.slane %v503_v44, 1  ;;  %v3372_v52 = vld [vmem:[%s3195_s13 + $0x18] sm:$0xe] }
  0x22   : >> { %2818 = vmatprep.subr.bf16.mxu0 %v3028_v37  ;;  %2827 = vmatpush3.bf16.msra.mxu1 %v3029_v27  ;;  %v682_v14 = vsel %vm234_vm0, %v3208_v15, %v679_v7  ;;  %v763_v16 = vrot.slane %v761_v8, 3  ;;  %v766_v17 = vrot.slane %v764_v10, 4  ;;  %v3309_v15 = vcombine.low %v3300_v18, %v2571_v22  ;;  %v2606_v53 = vld [vmem:[%s3195_s13 + $0x1c] sm:$0x7]  ;;  %v3057_v63 = vld [vmem:[%s3676_s1 + $0xb0] sm:$0xff]  }
  0x23   : >> { %2840 = vmatprep.subr.bf16.mxu1 %v3036_v43  ;;  %2828 = vmatprep.mubr.msk.bf16.mxu1 %vm280_vm1, %v512_v5  ;;  %v844_v27 = vrot.slane %v2564_v21, 1  ;;  %v2565_v28 = vcombine.low %v3300_v18, %v3300_v18  ;;  %v926_v31 = vrot.slane %v506_v45, 2  ;;  %v3339_v35 = vcombine.low %v2577_v19, %v2571_v22  ;;  %v3062_v22 = vld [vmem:[%s3676_s1 + $0xc0] sm:$0xff]  }
  0x24   : >> { %v767_v24 = vor.u32 %v766_v17, %v763_v16  ;;  %v932_v25 = vshrl.u32 %v3309_v15, 16  ;;  %v935_v29 = vshll.u32 %v3309_v15, 16  ;;  %v2566_v41 = vcombine.low %v3269_v61, %v3269_v61  ;;  %v2612_v16 = vld [vmem:[%s3195_s13 + $0x18] sm:$0xc]  ;;  %v3063_v15 = vld [vmem:[%s3676_s1 + $0xd0] sm:$0xff]  }
  0x25   : >> { %2819 = vmatpush3.bf16.msra.mxu0 %v3028_v37  ;;  %2829 = vmatmul.mubr.msk.bf16.vlgmr.msra.gmra.mrb[4].mxu1 %vm280_vm1, %v509_v59  ;;  %v851_v36 = vsel %vm234_vm0, %v844_v27, %v2565_v28  ;;  %v2585_v37 = vld [vmem:[%s3195_s13 + $0x18] sm:$0xf]  ;;  %v927_v42 = vor.u32 %v926_v31, %v925_v30  ;;  %v1014_v44 = vrot.slane %v3262_v56, 2  ;;  %v1018_v45 = vrot.slane %v3339_v35, 5  ;;  %v2641_v19 = vld [vmem:[%s3195_s13 + $0x24] sm:$0x7] }
  0x26   : >> { %2832 = vmatprep.subr.bf16.mxu0 %v3034_v47  ;;  %2841 = vmatpush3.bf16.msra.mxu1 %v3036_v43  ;;  %v770_v32 = vsel %vm234_vm0, %v756_v9, %v767_v24  ;;  %v934_v33 = vrot.slane %v932_v25, 4  ;;  %v937_v34 = vrot.slane %v935_v29, 5  ;;  %v3360_v46 = vcombine.low %v2585_v37, %v3348_v39  ;;  %v3065_v30 = vld [vmem:[%s3676_s1 + $0xd8] sm:$0xff]  }
  0x27   : >> { %2842 = vmatprep.subr.bf16.mxu1 %v3038_v62  ;;  %2844 = vmatprep.mubr.msk.bf16.mxu1 %vm280_vm1, %v682_v14  ;;  %v1180_v56 = vrot.slane %v764_v10, 1  ;;  %v2599_v57 = vcombine.low %v3300_v18, %v3269_v61  ;;  %v3055_v61 = vld [vmem:[%s3676_s1 + $0xa0] sm:$0xff]   ;;  %v2634_v4 = vcombine.low %v3372_v52, %v3348_v39  ;;  %v1350_v18 = vrot.slane %v932_v25, 1 }
  0x28   : >> { %2821 = vmatmul.mubr.msk.bf16.vlgmr.msra.gmra.mrb[4].mxu0 %vm280_vm1, %v2529_v58  ;;  %v938_v43 = vor.u32 %v937_v34, %v934_v33  ;;  %v1186_v50 = vshrl.u32 %v3360_v46, 16  ;;  %v1189_v51 = vshll.u32 %v3360_v46, 16  ;;  %v1021_v58 = vsel %vm234_vm0, %v1014_v44, %v1018_v45  ;;  %v3064_v34 = vld [vmem:[%s3676_s1 + $0xc8] sm:$0xff]  }
  0x29   : >> { %2833 = vmatpush3.bf16.msra.mxu0 %v3034_v47  ;;  %2836 = vmatprep.mubr.msk.bf16.mxu0 %vm280_vm1, %v596_v11  ;;  %v2586_v47 = vld [vmem:[%s3195_s13 + $0x1c] sm:$0x1]  ;;  %v1181_v5 = vor.u32 %v1180_v56, %v761_v8  ;;  %v1269_v11 = vrot.slane %v2599_v57, 1  ;;  %v3411_v8 = vld [vmem:[%s3195_s13 + $0x24] sm:$0x3]  ;;  %v1351_v21 = vrot.slane %v935_v29, 2  ;;  %v2600_v28 = vcombine.low %v3372_v52, %v3372_v52 }
  0x2a   : >> { %2834 = vmatprep.subr.bf16.mxu0 %v3037_v6  ;;  %2843 = vmatpush3.bf16.msra.mxu1 %v3038_v62  ;;  %v941_v54 = vsel %vm234_vm0, %v927_v42, %v938_v43  ;;  %v3377_v55 = vcombine.low %v2585_v37, %v2586_v47  ;;  %v1188_v59 = vrot.slane %v1186_v50, 3  ;;  %v1191_v60 = vrot.slane %v1189_v51, 4  ;;  %v2621_v29 = vld [vmem:[%s3195_s13 + $0x24] sm:$0x1]  ;;  %v3079_v46 = vld [vmem:[%s3676_s1 + $0x108] sm:$0xff]  }
  0x2b   : >> { %2856 = vmatprep.subr.bf16.mxu1 %v3044_v20  ;;  %v2607_v62 = vcombine.low %v3372_v52, %v2606_v53  ;;  %v1694_v27 = vrot.slane %v2634_v4, 1  ;;  %v1352_v31 = vor.u32 %v1351_v21, %v1350_v18  ;;  %v1439_v37 = vrot.slane %v3339_v35, 2  ;;  %v3069_v57 = vld [vmem:[%s3676_s1 + $0xe0] sm:$0xff]   ;;  %v3073_v4 = vld [vmem:[%s3676_s1 + $0xf8] sm:$0xff]  }
  0x2c   : >> { %v1192_v10 = vor.u32 %v1191_v60, %v1188_v59  ;;  %vm2409_vm8 = vcmask 518144   ;;  %vm2410_vm9 = vsmask.f32 2304 }
  0x2d   : >> { %2835 = vmatpush3.bf16.msra.mxu0 %v3037_v6  ;;  %2845 = vmatmul.mubr.msk.bf16.vlgmr.msra.gmra.mrb[8].mxu1 %vm280_vm1, %v679_v7  ;;  %v3058_v6 = vld [vmem:[%s3676_s1 + $0xa8] sm:$0xff]   ;;  %v3059_v7 = vld [vmem:[%s3676_s1 + $0xb8] sm:$0xff]   ;;  %v1357_v12 = vshrl.u32 %v2607_v62, 16  ;;  %v1360_v14 = vshll.u32 %v2607_v62, 16  ;;  %vm2411_vm10 = vmand %vm2409_vm8, %vm2410_vm9 }
  0x2e   : >> { %2848 = vmatprep.subr.bf16.mxu0 %v3041_v23  ;;  %2857 = vmatpush3.bf16.msra.mxu1 %v3044_v20  ;;  %v1195_v20 = vsel %vm234_vm0, %v1181_v5, %v1192_v10 }
  0x2f   : >> { %2858 = vmatprep.subr.bf16.mxu1 %v3046_v13  ;;  %2860 = vmatprep.mubr.msk.bf16.mxu1 %vm280_vm1, %v851_v36  ;;  %v1362_v9 = vrot.slane %v1360_v14, 5  ;;  %v1775_v33 = vrot.slane %v1357_v12, 1 }
  0x30   : >> { %2837 = vmatmul.mubr.msk.bf16.vlgmr.msra.gmra.mrb[8].mxu0 %vm280_vm1, %v593_v2  ;;  %v1104_v2 = vrot.slane %v3377_v55, 3 }
  0x31   : >> { %2849 = vmatpush3.bf16.msra.mxu0 %v3041_v23  ;;  %2852 = vmatprep.mubr.msk.bf16.mxu0 %vm280_vm1, %v770_v32  ;;  %v1359_v23 = vrot.slane %v1357_v12, 4  ;;  %v3507_v12 = vld [vmem:[%s3195_s13 + $0x2c] sm:$0x3] }
  0x32   : >> { %2850 = vmatprep.subr.bf16.mxu0 %v3045_v26  ;;  %2859 = vmatpush3.bf16.msra.mxu1 %v3046_v13  ;;  %v1107_v17 = vsel %vm234_vm0, %v3275_v3, %v1104_v2  ;;  %v2620_v3 = vld [vmem:[%s3195_s13 + $0x20] sm:$0xf] }
  0x33   : >> { %2872 = vmatprep.subr.bf16.mxu1 %v3052_v38  ;;  %v3434_v25 = vcombine.low %v2620_v3, %v3411_v8  ;;  %v1363_v36 = vor.u32 %v1362_v9, %v1359_v23  ;;  %v3465_v47 = vcombine.low %v2620_v3, %v2621_v29 }
  0x35   : >> { %2851 = vmatpush3.bf16.msra.mxu0 %v3045_v26  ;;  %2861 = vmatmul.mubr.msk.bf16.vlgmr.msra.gmra.mrb[12].mxu1 %vm280_vm1, %v2566_v41  ;;  %v3437_v26 = vld [vmem:[%s3195_s13 + $0x20] sm:$0xe]  ;;  %v1614_v42 = vshll.u32 %v3434_v25, 16  ;;  %v1611_v59 = vshrl.u32 %v3434_v25, 16 }
  0x36   : >> { %2864 = vmatprep.subr.bf16.mxu0 %v3047_v40  ;;  %2873 = vmatpush3.bf16.msra.mxu1 %v3052_v38  ;;  %v2635_v13 = vcombine.low %v3437_v26, %v3437_v26  ;;  %v3451_v32 = vcombine.low %v3437_v26, %v2641_v19 }
  0x37   : >> { %2874 = vmatprep.subr.bf16.mxu1 %v3054_v49  ;;  %2876 = vmatprep.mubr.msk.bf16.mxu1 %vm280_vm1, %v1021_v58  ;;  %v1366_v58 = vsel %vm234_vm0, %v1352_v31, %v1363_v36  ;;  %v2030_v5 = vrot.slane %v1614_v42, 1  ;;  %v1613_v21 = vrot.slane %v1611_v59, 3 }
  0x38   : >> { %2853 = vmatmul.mubr.msk.bf16.vlgmr.msra.gmra.mrb[12].mxu0 %vm280_vm1, %v767_v24  ;;  %v3431_v24 = vcombine.low %v2612_v16, %v2606_v53  ;;  %v3458_v38 = vsel %vm234_vm0, %v1694_v27, %v2635_v13  ;;  %v1785_v44 = vshll.u32 %v3451_v32, 16  ;;  %v3072_v16 = vld [vmem:[%s3676_s1 + $0xe8] sm:$0xff]  }
  0x39   : >> { %2865 = vmatpush3.bf16.msra.mxu0 %v3047_v40  ;;  %2868 = vmatprep.mubr.msk.bf16.mxu0 %vm280_vm1, %v941_v54  ;;  %v1776_v40 = vrot.slane %v1360_v14, 2  ;;  %v2601_v14 = vcombine.low %v3348_v39, %v3348_v39  ;;  %v1616_v39 = vrot.slane %v1614_v42, 4  ;;  %v2031_v25 = vor.u32 %v2030_v5, %v1611_v59  ;;  %v2676_v27 = vld [vmem:[%s3195_s13 + $0x2c] sm:$0x7]  ;;  %v2682_v42 = vld [vmem:[%s3195_s13 + $0x28] sm:$0xc] }
  0x3a   : >> { %2866 = vmatprep.subr.bf16.mxu0 %v3053_v48  ;;  %2875 = vmatpush3.bf16.msra.mxu1 %v3054_v49  ;;  %v1443_v41 = vrot.slane %v3431_v24, 5  ;;  %v3071_v49 = vld [vmem:[%s3676_s1 + $0xf0] sm:$0xff]   ;;  %v1787_v53 = vrot.slane %v1785_v44, 5  ;;  %v1864_v54 = vrot.slane %v3431_v24, 2  ;;  %v2636_v24 = vcombine.low %v3411_v8, %v3411_v8  ;;  %v3092_v5 = vld [vmem:[%s3676_s1 + $0x148] sm:$0xff]  }
  0x3b   : >> { %2888 = vmatprep.subr.bf16.mxu1 %v3057_v63  ;;  %v1777_v35 = vor.u32 %v1776_v40, %v1775_v33  ;;  %v2201_v33 = vrot.slane %v1785_v44, 2  ;;  %v2683_v44 = vcombine.low %v2682_v42, %v2676_v27 }
  0x3d   : >> { %2867 = vmatpush3.bf16.msra.mxu0 %v3053_v48  ;;  %2877 = vmatmul.mubr.msk.bf16.vlgmr.msra.gmra.mrb[16].mxu1 %vm280_vm1, %v1018_v45  ;;  %v1276_v45 = vsel %vm234_vm0, %v1269_v11, %v2600_v28  ;;  %v2647_v48 = vld [vmem:[%s3195_s13 + $0x20] sm:$0xc] }
  0x3e   : >> { %2880 = vmatprep.subr.bf16.mxu0 %v3055_v61  ;;  %2889 = vmatpush3.bf16.msra.mxu1 %v3057_v63  ;;  %v3477_v56 = vcombine.low %v2647_v48, %v2641_v19  ;;  %v1529_v63 = vrot.slane %v3465_v47, 3 }
  0x3f   : >> { %2890 = vmatprep.subr.bf16.mxu1 %v3059_v7  ;;  %2892 = vmatprep.mubr.msk.bf16.mxu1 %vm280_vm1, %v1195_v20 }
  0x40   : >> { %2869 = vmatmul.mubr.msk.bf16.vlgmr.msra.gmra.mrb[16].mxu0 %vm280_vm1, %v938_v43  ;;  %v1782_v43 = vshrl.u32 %v3451_v32, 16  ;;  %v1868_v62 = vrot.slane %v3477_v56, 5  ;;  %v1532_v3 = vsel %vm234_vm0, %v3377_v55, %v1529_v63  ;;  %v3075_v55 = vld [vmem:[%s3676_s1 + $0x100] sm:$0xff]   ;;  %v2289_v32 = vrot.slane %v3477_v56, 2 }
  0x41   : >> { %2881 = vmatpush3.bf16.msra.mxu0 %v3055_v61  ;;  %2884 = vmatprep.mubr.msk.bf16.mxu0 %vm280_vm1, %v1107_v17  ;;  %v2655_v61 = vld [vmem:[%s3195_s13 + $0x28] sm:$0xf]  ;;  %v1605_v17 = vrot.slane %v1189_v51, 1  ;;  %v1446_v51 = vsel %vm234_vm0, %v1439_v37, %v1443_v41  ;;  %v3096_v56 = vld [vmem:[%s3676_s1 + $0x160] sm:$0xff]  }
  0x42   : >> { %2882 = vmatprep.subr.bf16.mxu0 %v3058_v6  ;;  %2891 = vmatpush3.bf16.msra.mxu1 %v3059_v7  ;;  %v1784_v52 = vrot.slane %v1782_v43, 4  ;;  %v2663_v18 = vcombine.low %v2655_v61, %v3507_v12  ;;  %v2200_v31 = vrot.slane %v1782_v43, 1  ;;  %v1617_v43 = vor.u32 %v1616_v39, %v1613_v21 }
  0x43   : >> { %2904 = vmatprep.subr.bf16.mxu1 %v3063_v15 }
  0x44   : >> { %v3487_v60 = vor.u32 %v1787_v53, %v1784_v52  ;;  %v2036_v20 = vshrl.u32 %v2663_v18, 16  ;;  %v2039_v23 = vshll.u32 %v2663_v18, 16  ;;  %v2202_v48 = vor.u32 %v2201_v33, %v2200_v31  ;;  %v3080_v53 = vld [vmem:[%s3676_s1 + $0x118] sm:$0xff]  }
  0x45   : >> { %2883 = vmatpush3.bf16.msra.mxu0 %v3058_v6  ;;  %2893 = vmatmul.mubr.msk.bf16.vlgmr.msra.gmra.mrb[20].mxu1 %vm280_vm1, %v1192_v10  ;;  %v2669_v6 = vcombine.low %v3437_v26, %v3411_v8  ;;  %v3504_v10 = vsel %vm234_vm0, %v1864_v54, %v1868_v62  ;;  %v2668_v26 = vld [vmem:[%s3195_s13 + $0x28] sm:$0xe]  ;;  %v3564_v54 = vrot.slane %v2683_v44, 5  ;;  %v3091_v8 = vld [vmem:[%s3676_s1 + $0x150] sm:$0xff]  }
  0x46   : >> { %2896 = vmatprep.subr.bf16.mxu0 %v3062_v22  ;;  %2905 = vmatpush3.bf16.msra.mxu1 %v3063_v15  ;;  %v3499_v7 = vsel %vm234_vm0, %v1777_v35, %v3487_v60  ;;  %v2038_v28 = vrot.slane %v2036_v20, 3  ;;  %v2041_v29 = vrot.slane %v2039_v23, 4  ;;  %v2670_v13 = vcombine.low %v2668_v26, %v2668_v26 }
  0x47   : >> { %2906 = vmatprep.subr.bf16.mxu1 %v3065_v30  ;;  %2908 = vmatprep.mubr.msk.bf16.mxu1 %vm280_vm1, %v1366_v58  ;;  %v2119_v9 = vrot.slane %v2669_v6, 1  ;;  %v2677_v19 = vcombine.low %v2668_v26, %v2676_v27  ;;  %v3577_v58 = vsel %vm234_vm0, %v2289_v32, %v3564_v54  ;;  %v3097_v6 = vld [vmem:[%s3676_s1 + $0x170] sm:$0xff]  }
  0x48   : >> { %2885 = vmatmul.mubr.msk.bf16.vlgmr.msra.gmra.mrb[20].mxu0 %vm280_vm1, %v1104_v2  ;;  %v2656_v2 = vld [vmem:[%s3195_s13 + $0x2c] sm:$0x1] }
  0x49   : >> { %2897 = vmatpush3.bf16.msra.mxu0 %v3062_v22  ;;  %2900 = vmatprep.mubr.msk.bf16.mxu0 %vm280_vm1, %v1276_v45  ;;  %v2657_v11 = vcombine.low %v2655_v61, %v2656_v2  ;;  %v2207_v37 = vshrl.u32 %v2677_v19, 16  ;;  %v2210_v40 = vshll.u32 %v2677_v19, 16  ;;  %v1606_v45 = vor.u32 %v1605_v17, %v1186_v50  ;;  %v3087_v61 = vld [vmem:[%s3676_s1 + $0x128] sm:$0xff]   ;;  %v3093_v2 = vld [vmem:[%s3676_s1 + $0x158] sm:$0xff]  }
  0x4a   : >> { %2898 = vmatprep.subr.bf16.mxu0 %v3064_v34  ;;  %2907 = vmatpush3.bf16.msra.mxu1 %v3065_v30  ;;  %v3078_v30 = vld [vmem:[%s3676_s1 + $0x110] sm:$0xff]  }
  0x4b   : >> { %2920 = vmatprep.subr.bf16.mxu1 %v3071_v49  ;;  %v3520_v22 = vrot.slane %v2657_v11, 3  ;;  %v2212_v52 = vrot.slane %v2210_v40, 5  ;;  %v3105_v11 = vld [vmem:[%s3676_s1 + $0x188] sm:$0xff]  }
  0x4d   : >> { %2899 = vmatpush3.bf16.msra.mxu0 %v3064_v34  ;;  %2909 = vmatmul.mubr.msk.bf16.vlgmr.msra.gmra.mrb[24].mxu1 %vm280_vm1, %v1363_v36  ;;  %v3533_v15 = vsel %vm234_vm0, %v3465_v47, %v3520_v22  ;;  %v3549_v34 = vor.u32 %v2041_v29, %v2038_v28  ;;  %v3552_v36 = vsel %vm234_vm0, %v2119_v9, %v2670_v13  ;;  %v3086_v47 = vld [vmem:[%s3676_s1 + $0x130] sm:$0xff]  }
  0x4e   : >> { %2912 = vmatprep.subr.bf16.mxu0 %v3069_v57  ;;  %2921 = vmatpush3.bf16.msra.mxu1 %v3071_v49  ;;  %v2209_v49 = vrot.slane %v2207_v37, 4 }
  0x4f   : >> { %2922 = vmatprep.subr.bf16.mxu1 %v3073_v4  ;;  %2924 = vmatprep.mubr.msk.bf16.mxu1 %vm280_vm1, %v1532_v3  ;;  %v2045_v35 = vsel %vm234_vm0, %v2031_v25, %v3549_v34 }
  0x50   : >> { %2901 = vmatmul.mubr.msk.bf16.vlgmr.msra.gmra.mrb[24].mxu0 %vm280_vm1, %v2601_v14  ;;  %v3569_v50 = vor.u32 %v2212_v52, %v2209_v49 }
  0x51   : >> { %2913 = vmatpush3.bf16.msra.mxu0 %v3069_v57  ;;  %2916 = vmatprep.mubr.msk.bf16.mxu0 %vm280_vm1, %v1446_v51  ;;  %v1620_v57 = vsel %vm234_vm0, %v1606_v45, %v1617_v43 }
  0x52   : >> { %2914 = vmatprep.subr.bf16.mxu0 %v3072_v16  ;;  %2923 = vmatpush3.bf16.msra.mxu1 %v3073_v4  ;;  %v2216_v59 = vsel %vm234_vm0, %v2202_v48, %v3569_v50 }
  0x53   : >> { %2936 = vmatprep.subr.bf16.mxu1 %v3078_v30 }
  0x55   : >> { %2915 = vmatpush3.bf16.msra.mxu0 %v3072_v16  ;;  %2925 = vmatmul.mubr.msk.bf16.vlgmr.msra.gmra.mrb[28].mxu1 %vm280_vm1, %v1529_v63  ;;  %v3081_v63 = vld [vmem:[%s3676_s1 + $0x120] sm:$0xff]  }
  0x56   : >> { %2928 = vmatprep.subr.bf16.mxu0 %v3075_v55  ;;  %2937 = vmatpush3.bf16.msra.mxu1 %v3078_v30 }
  0x57   : >> { %2938 = vmatprep.subr.bf16.mxu1 %v3080_v53  ;;  %2940 = vmatprep.mubr.msk.bf16.mxu1 %vm280_vm1, %v3458_v38  ;;  %v3089_v38 = vld [vmem:[%s3676_s1 + $0x140] sm:$0xff]  }
  0x58   : >> { %2917 = vmatmul.mubr.msk.bf16.vlgmr.msra.gmra.mrb[28].mxu0 %vm280_vm1, %v1443_v41  ;;  %v3088_v41 = vld [vmem:[%s3676_s1 + $0x138] sm:$0xff]  }
  0x59   : >> { %2929 = vmatpush3.bf16.msra.mxu0 %v3075_v55  ;;  %2932 = vmatprep.mubr.msk.bf16.mxu0 %vm280_vm1, %v1620_v57 }
  0x5a   : >> { %2930 = vmatprep.subr.bf16.mxu0 %v3079_v46  ;;  %2939 = vmatpush3.bf16.msra.mxu1 %v3080_v53 }
  0x5b   : >> { %2952 = vmatprep.subr.bf16.mxu1 %v3086_v47 }
  0x5d   : >> { %2931 = vmatpush3.bf16.msra.mxu0 %v3079_v46  ;;  %2941 = vmatmul.mubr.msk.bf16.vlgmr.msra.gmra.mrb[32].mxu1 %vm280_vm1, %v2636_v24 }
  0x5e   : >> { %2944 = vmatprep.subr.bf16.mxu0 %v3081_v63  ;;  %2953 = vmatpush3.bf16.msra.mxu1 %v3086_v47 }
  0x5f   : >> { %2954 = vmatprep.subr.bf16.mxu1 %v3088_v41  ;;  %2956 = vmatprep.mubr.msk.bf16.mxu1 %vm280_vm1, %v3504_v10  ;;  %v2671_v10 = vcombine.low %v3507_v12, %v3507_v12 }
  0x60   : >> { %2933 = vmatmul.mubr.msk.bf16.vlgmr.msra.gmra.mrb[32].mxu0 %vm280_vm1, %v1617_v43 }
  0x61   : >> { %2945 = vmatpush3.bf16.msra.mxu0 %v3081_v63  ;;  %2948 = vmatprep.mubr.msk.bf16.mxu0 %vm280_vm1, %v3499_v7  ;;  %v3103_v7 = vld [vmem:[%s3676_s1 + $0x180] sm:$0xff]  }
  0x62   : >> { %2946 = vmatprep.subr.bf16.mxu0 %v3087_v61  ;;  %2955 = vmatpush3.bf16.msra.mxu1 %v3088_v41 }
  0x63   : >> { %2968 = vmatprep.subr.bf16.mxu1 %v3091_v8 }
  0x65   : >> { %2947 = vmatpush3.bf16.msra.mxu0 %v3087_v61  ;;  %2957 = vmatmul.mubr.msk.bf16.vlgmr.msra.gmra.mrb[36].mxu1 %vm280_vm1, %v1868_v62  ;;  %v3098_v62 = vld [vmem:[%s3676_s1 + $0x168] sm:$0xff]  }
  0x66   : >> { %2960 = vmatprep.subr.bf16.mxu0 %v3089_v38  ;;  %2969 = vmatpush3.bf16.msra.mxu1 %v3091_v8 }
  0x67   : >> { %2970 = vmatprep.subr.bf16.mxu1 %v3093_v2  ;;  %2972 = vmatprep.mubr.msk.bf16.mxu1 %vm280_vm1, %v2045_v35 }
  0x68   : >> { %2949 = vmatmul.mubr.msk.bf16.vlgmr.msra.gmra.mrb[36].mxu0 %vm280_vm1, %v3487_v60  ;;  %v3099_v60 = vld [vmem:[%s3676_s1 + $0x178] sm:$0xff]  }
  0x69   : >> { %2961 = vmatpush3.bf16.msra.mxu0 %v3089_v38  ;;  %2964 = vmatprep.mubr.msk.bf16.mxu0 %vm280_vm1, %v3533_v15 }
  0x6a   : >> { %2962 = vmatprep.subr.bf16.mxu0 %v3092_v5  ;;  %2971 = vmatpush3.bf16.msra.mxu1 %v3093_v2 }
  0x6b   : >> { %2984 = vmatprep.subr.bf16.mxu1 %v3097_v6 }
  0x6d   : >> { %2963 = vmatpush3.bf16.msra.mxu0 %v3092_v5  ;;  %2973 = vmatmul.mubr.msk.bf16.vlgmr.msra.gmra.mrb[40].mxu1 %vm280_vm1, %v3549_v34 }
  0x6e   : >> { %2976 = vmatprep.subr.bf16.mxu0 %v3096_v56  ;;  %2985 = vmatpush3.bf16.msra.mxu1 %v3097_v6 }
  0x6f   : >> { %2986 = vmatprep.subr.bf16.mxu1 %v3099_v60  ;;  %2988 = vmatprep.mubr.msk.bf16.mxu1 %vm280_vm1, %v2216_v59 }
  0x70   : >> { %2965 = vmatmul.mubr.msk.bf16.vlgmr.msra.gmra.mrb[40].mxu0 %vm280_vm1, %v3520_v22 }
  0x71   : >> { %2977 = vmatpush3.bf16.msra.mxu0 %v3096_v56  ;;  %2980 = vmatprep.mubr.msk.bf16.mxu0 %vm280_vm1, %v3552_v36 }
  0x72   : >> { %2978 = vmatprep.subr.bf16.mxu0 %v3098_v62  ;;  %2987 = vmatpush3.bf16.msra.mxu1 %v3099_v60 }
  0x75   : >> { %2979 = vmatpush3.bf16.msra.mxu0 %v3098_v62  ;;  %2989 = vmatmul.mubr.msk.bf16.vlgmr.msra.gmra.mrb[44].mxu1 %vm280_vm1, %v3569_v50 }
  0x76   : >> { %2992 = vmatprep.subr.bf16.mxu0 %v3103_v7 }
  0x78   : >> { %2981 = vmatmul.mubr.msk.bf16.vlgmr.msra.gmra.mrb[44].mxu0 %vm280_vm1, %v2671_v10 }
  0x79   : >> { %2993 = vmatpush3.bf16.msra.mxu0 %v3103_v7  ;;  %2996 = vmatprep.mubr.msk.bf16.mxu0 %vm280_vm1, %v3577_v58 }
  0x7a   : >> { %2994 = vmatprep.subr.bf16.mxu0 %v3105_v11 }
  0x7d   : >> { %2995 = vmatpush3.bf16.msra.mxu0 %v3105_v11 }
  0x80   : >> { %2997 = vmatmul.mubr.msk.bf16.vlgmr.msra.gmra.mrb[48].mxu0 %vm280_vm1, %v3564_v54 }
  0xf0   : >> { %v2814_v12 = vpop.f32.mrb[0].mxu1 }
  0xf1   : >> { %v383_v14 = vpop.f32.mrb[1].mxu1 }
  0xf2   : >> { %v2815_v16 = vpop.f32.mrb[2].mxu1 }
  0xf3   : >> { %v386_v4 = vpop.f32.mrb[3].mxu1  ;;  %v2806_v17 = vpop.f32.mrb[0].mxu0 }
  0xf4   : >> { %v392_v18 = vadd.f32 %v2814_v12, %v2806_v17  ;;  %v319_v21 = vpop.f32.mrb[1].mxu0 }
  0xf5   : >> { %v384_v22 = vadd.f32 %v383_v14, %v319_v21  ;;  %v2807_v39 = vpop.f32.mrb[2].mxu0 }
  0xf6   : >> { %v322_v20 = vpop.f32.mrb[3].mxu0 }
  0xf7   : >> { %v387_v23 = vadd.f32 %v386_v4, %v322_v20 }
  0xf8   : >> { %v2830_v9 = vpop.f32.mrb[4].mxu1 }
  0xf9   : >> { %v563_v3 = vpop.f32.mrb[5].mxu1 }
  0xfa   : >> { %v2831_v26 = vpop.f32.mrb[6].mxu1 }
  0xfb   : >> { %v2822_v51 = vpop.f32.mrb[4].mxu0  ;;  %v566_v29 = vpop.f32.mrb[7].mxu1 }
  0xfc   : >> { %v481_v15 = vadd.f32 %v2822_v51, %v392_v18  ;;  %v465_v25 = vpop.f32.mrb[5].mxu0 }
  0xfd   : >> { %v479_v27 = vadd.f32 %v465_v25, %v384_v22  ;;  %v2823_v28 = vpop.f32.mrb[6].mxu0 }
  0xfe   : >> { %v579_v13 = vadd.f32 %v2830_v9, %v481_v15  ;;  %v468_v19 = vpop.f32.mrb[7].mxu0 }
  0xff   : >> { %v480_v55 = vadd.f32 %v468_v19, %v387_v23  ;;  %v577_v30 = vadd.f32 %v563_v3, %v479_v27 }
 0x100   : >> { %v2846_v33 = vpop.f32.mrb[8].mxu1 }
 0x101   : >> { %v578_v31 = vadd.f32 %v566_v29, %v480_v55  ;;  %v733_v36 = vpop.f32.mrb[9].mxu1 }
 0x102   : >> { %v2847_v42 = vpop.f32.mrb[10].mxu1 }
 0x103   : >> { %v2838_v34 = vpop.f32.mrb[8].mxu0  ;;  %v736_v32 = vpop.f32.mrb[11].mxu1 }
 0x104   : >> { %v663_v37 = vadd.f32 %v2838_v34, %v579_v13  ;;  %v647_v40 = vpop.f32.mrb[9].mxu0 }
 0x105   : >> { %v661_v45 = vadd.f32 %v647_v40, %v577_v30  ;;  %v2839_v43 = vpop.f32.mrb[10].mxu0 }
 0x106   : >> { %v749_v44 = vadd.f32 %v2846_v33, %v663_v37  ;;  %v650_v35 = vpop.f32.mrb[11].mxu0 }
 0x107   : >> { %v662_v48 = vadd.f32 %v650_v35, %v578_v31  ;;  %v747_v49 = vadd.f32 %v733_v36, %v661_v45 }
 0x108   : >> { %v2862_v53 = vpop.f32.mrb[12].mxu1 }
 0x109   : >> { %v748_v52 = vadd.f32 %v736_v32, %v662_v48  ;;  %v903_v46 = vpop.f32.mrb[13].mxu1 }
 0x10a   : >> { %v2863_v58 = vpop.f32.mrb[14].mxu1 }
 0x10b   : >> { %v2854_v54 = vpop.f32.mrb[12].mxu0  ;;  %v906_v63 = vpop.f32.mrb[15].mxu1 }
 0x10c   : >> { %v837_v50 = vadd.f32 %v2854_v54, %v749_v44  ;;  %v821_v57 = vpop.f32.mrb[13].mxu0 }
 0x10d   : >> { %v835_v59 = vadd.f32 %v821_v57, %v747_v49  ;;  %v2855_v47 = vpop.f32.mrb[14].mxu0 }
 0x10e   : >> { %v919_v24 = vadd.f32 %v2862_v53, %v837_v50  ;;  %v824_v41 = vpop.f32.mrb[15].mxu0 }
 0x10f   : >> { %v836_v61 = vadd.f32 %v824_v41, %v748_v52  ;;  %v917_v8 = vadd.f32 %v903_v46, %v835_v59 }
 0x110   : >> { %v2878_v2 = vpop.f32.mrb[16].mxu1 }
 0x111   : >> { %v918_v38 = vadd.f32 %v906_v63, %v836_v61  ;;  %v1072_v6 = vpop.f32.mrb[17].mxu1 }
 0x112   : >> { %v2879_v62 = vpop.f32.mrb[18].mxu1 }
 0x113   : >> { %v2870_v5 = vpop.f32.mrb[16].mxu0  ;;  %v1075_v11 = vpop.f32.mrb[19].mxu1 }
 0x114   : >> { %v1008_v56 = vadd.f32 %v2870_v5, %v919_v24  ;;  %v992_v60 = vpop.f32.mrb[17].mxu0 }
 0x115   : >> { %v1006_v7 = vadd.f32 %v992_v60, %v917_v8  ;;  %v2871_v10 = vpop.f32.mrb[18].mxu0 }
 0x116   : >> { %v1088_v12 = vadd.f32 %v2878_v2, %v1008_v56  ;;  %v995_v14 = vpop.f32.mrb[19].mxu0 }
 0x117   : >> { %v1007_v16 = vadd.f32 %v995_v14, %v918_v38  ;;  %v1086_v4 = vadd.f32 %v1072_v6, %v1006_v7 }
 0x118   : >> { %v2894_v18 = vpop.f32.mrb[20].mxu1 }
 0x119   : >> { %v1087_v17 = vadd.f32 %v1075_v11, %v1007_v16  ;;  %v1246_v22 = vpop.f32.mrb[21].mxu1 }
 0x11a   : >> { %v2895_v23 = vpop.f32.mrb[22].mxu1 }
 0x11b   : >> { %v2886_v21 = vpop.f32.mrb[20].mxu0  ;;  %v1249_v3 = vpop.f32.mrb[23].mxu1 }
 0x11c   : >> { %v1174_v39 = vadd.f32 %v2886_v21, %v1088_v12  ;;  %v1158_v20 = vpop.f32.mrb[21].mxu0 }
 0x11d   : >> { %v1172_v9 = vadd.f32 %v1158_v20, %v1086_v4  ;;  %v2887_v51 = vpop.f32.mrb[22].mxu0 }
 0x11e   : >> { %v1262_v15 = vadd.f32 %v2894_v18, %v1174_v39  ;;  %v1161_v25 = vpop.f32.mrb[23].mxu0 }
 0x11f   : >> { %v1173_v26 = vadd.f32 %v1161_v25, %v1087_v17  ;;  %v1260_v27 = vadd.f32 %v1246_v22, %v1172_v9 }
 0x120   : >> { %v2910_v29 = vpop.f32.mrb[24].mxu1 }
 0x121   : >> { %v1261_v28 = vadd.f32 %v1249_v3, %v1173_v26  ;;  %v1417_v19 = vpop.f32.mrb[25].mxu1 }
 0x122   : >> { %v2911_v31 = vpop.f32.mrb[26].mxu1 }
 0x123   : >> { %v2902_v13 = vpop.f32.mrb[24].mxu0  ;;  %v1420_v36 = vpop.f32.mrb[27].mxu1 }
 0x124   : >> { %v1344_v55 = vadd.f32 %v2902_v13, %v1262_v15  ;;  %v1328_v30 = vpop.f32.mrb[25].mxu0 }
 0x125   : >> { %v1342_v33 = vadd.f32 %v1328_v30, %v1260_v27  ;;  %v2903_v34 = vpop.f32.mrb[26].mxu0 }
 0x126   : >> { %v1433_v37 = vadd.f32 %v2910_v29, %v1344_v55  ;;  %v1331_v40 = vpop.f32.mrb[27].mxu0 }
 0x127   : >> { %v1343_v42 = vadd.f32 %v1331_v40, %v1261_v28  ;;  %v1431_v45 = vadd.f32 %v1417_v19, %v1342_v33 }
 0x128   : >> { %v2926_v32 = vpop.f32.mrb[28].mxu1 }
 0x129   : >> { %v1432_v43 = vadd.f32 %v1420_v36, %v1343_v42  ;;  %v1583_v35 = vpop.f32.mrb[29].mxu1 }
 0x12a   : >> { %v2927_v52 = vpop.f32.mrb[30].mxu1 }
 0x12b   : >> { %v2918_v44 = vpop.f32.mrb[28].mxu0  ;;  %v1586_v46 = vpop.f32.mrb[31].mxu1 }
 0x12c   : >> { %v1513_v48 = vadd.f32 %v2918_v44, %v1433_v37  ;;  %v1497_v49 = vpop.f32.mrb[29].mxu0 }
 0x12d   : >> { %v1511_v53 = vadd.f32 %v1497_v49, %v1431_v45  ;;  %v2919_v54 = vpop.f32.mrb[30].mxu0 }
 0x12e   : >> { %v1599_v50 = vadd.f32 %v2926_v32, %v1513_v48  ;;  %v1500_v57 = vpop.f32.mrb[31].mxu0 }
 0x12f   : >> { %v1512_v58 = vadd.f32 %v1500_v57, %v1432_v43  ;;  %v1597_v59 = vadd.f32 %v1583_v35, %v1511_v53 }
 0x130   : >> { %v2942_v63 = vpop.f32.mrb[32].mxu1 }
 0x131   : >> { %v1598_v47 = vadd.f32 %v1586_v46, %v1512_v58  ;;  %v1753_v41 = vpop.f32.mrb[33].mxu1 }
 0x132   : >> { %v2943_v38 = vpop.f32.mrb[34].mxu1 }
 0x133   : >> { %v2934_v24 = vpop.f32.mrb[32].mxu0  ;;  %v1756_v6 = vpop.f32.mrb[35].mxu1 }
 0x134   : >> { %v1687_v61 = vadd.f32 %v2934_v24, %v1599_v50  ;;  %v1671_v8 = vpop.f32.mrb[33].mxu0 }
 0x135   : >> { %v1685_v2 = vadd.f32 %v1671_v8, %v1597_v59  ;;  %v2935_v5 = vpop.f32.mrb[34].mxu0 }
 0x136   : >> { %v1769_v56 = vadd.f32 %v2942_v63, %v1687_v61  ;;  %v1674_v60 = vpop.f32.mrb[35].mxu0 }
 0x137   : >> { %v1686_v62 = vadd.f32 %v1674_v60, %v1598_v47  ;;  %v1767_v7 = vadd.f32 %v1753_v41, %v1685_v2 }
 0x138   : >> { %v2958_v11 = vpop.f32.mrb[36].mxu1 }
 0x139   : >> { %v1768_v10 = vadd.f32 %v1756_v6, %v1686_v62  ;;  %v1922_v14 = vpop.f32.mrb[37].mxu1 }
 0x13a   : >> { %v2959_v17 = vpop.f32.mrb[38].mxu1 }
 0x13b   : >> { %v2950_v12 = vpop.f32.mrb[36].mxu0  ;;  %v1925_v22 = vpop.f32.mrb[39].mxu1 }
 0x13c   : >> { %v1858_v16 = vadd.f32 %v2950_v12, %v1769_v56  ;;  %v1842_v4 = vpop.f32.mrb[37].mxu0 }
 0x13d   : >> { %v1856_v18 = vadd.f32 %v1842_v4, %v1767_v7  ;;  %v2951_v21 = vpop.f32.mrb[38].mxu0  ;;  %v2412_v4 = vld [vmem:[%s2408_s22] sm:$0x7] }
 0x13e   : >> { %v1938_v39 = vadd.f32 %v2958_v11, %v1858_v16  ;;  %v1845_v20 = vpop.f32.mrb[39].mxu0 }
 0x13f   : >> { %v1857_v23 = vadd.f32 %v1845_v20, %v1768_v10  ;;  %v1936_v9 = vadd.f32 %v1922_v14, %v1856_v18 }
 0x140   : >> { %v2974_v3 = vpop.f32.mrb[40].mxu1 }
 0x141   : >> { %v1937_v51 = vadd.f32 %v1925_v22, %v1857_v23  ;;  %v2096_v25 = vpop.f32.mrb[41].mxu1 }
 0x142   : >> { %v2975_v28 = vpop.f32.mrb[42].mxu1 }
 0x143   : >> { %v2966_v15 = vpop.f32.mrb[40].mxu0  ;;  %v2099_v19 = vpop.f32.mrb[43].mxu1 }
 0x144   : >> { %v2024_v26 = vadd.f32 %v2966_v15, %v1938_v39  ;;  %v2008_v27 = vpop.f32.mrb[41].mxu0 }
 0x145   : >> { %v2022_v29 = vadd.f32 %v2008_v27, %v1936_v9  ;;  %v2967_v13 = vpop.f32.mrb[42].mxu0 }
 0x146   : >> { %v2112_v55 = vadd.f32 %v2974_v3, %v2024_v26  ;;  %v2011_v30 = vpop.f32.mrb[43].mxu0 }
 0x147   : >> { %v2023_v31 = vadd.f32 %v2011_v30, %v1937_v51  ;;  %v2110_v33 = vadd.f32 %v2096_v25, %v2022_v29 }
 0x148   : >> { %v2990_v36 = vpop.f32.mrb[44].mxu1 }
 0x149   : >> { %v2111_v34 = vadd.f32 %v2099_v19, %v2023_v31  ;;  %v2267_v40 = vpop.f32.mrb[45].mxu1 }
 0x14a   : >> { %v2991_v43 = vpop.f32.mrb[46].mxu1 }
 0x14b   : >> { %v2982_v37 = vpop.f32.mrb[44].mxu0  ;;  %v2270_v35 = vpop.f32.mrb[47].mxu1 }
 0x14c   : >> { %v2194_v42 = vadd.f32 %v2982_v37, %v2112_v55  ;;  %v2178_v45 = vpop.f32.mrb[45].mxu0 }
 0x14d   : >> { %v2192_v32 = vadd.f32 %v2178_v45, %v2110_v33  ;;  %v2983_v44 = vpop.f32.mrb[46].mxu0 }
 0x14e   : >> { %v2283_v48 = vadd.f32 %v2990_v36, %v2194_v42  ;;  %v2181_v49 = vpop.f32.mrb[47].mxu0 }
 0x14f   : >> { %v2193_v52 = vadd.f32 %v2181_v49, %v2111_v34  ;;  %v2281_v53 = vadd.f32 %v2267_v40, %v2192_v32 }
 0x151   : >> { %v2282_v54 = vadd.f32 %v2270_v35, %v2193_v52 }
 0x153   : >> { %v2998_v46 = vpop.f32.mrb[48].mxu0 }
 0x154   : >> { %v2363_v50 = vadd.f32 %v2998_v46, %v2283_v48  ;;  %v2347_v57 = vpop.f32.mrb[49].mxu0 }
 0x155   : >> { %v2361_v58 = vadd.f32 %v2347_v57, %v2281_v53  ;;  %v2999_v59 = vpop.f32.mrb[50].mxu0 }
 0x156   : >> { %v2372_v47 = vadd.f32 %v3159_v0, %v2363_v50  ;;  %v2350_v63 = vpop.f32.mrb[51].mxu0 }
 0x157   : >> { %v2362_v24 = vadd.f32 %v2350_v63, %v2282_v54  ;;  %v2370_v61 = vadd.f32 %v3159_v0, %v2361_v58 }
 0x158   : >> { %vm2375_vm2 = vcmp.gt.f32.partialorder %v2372_v47, 0.0  ;;  %v2384_v41 = vmul.f32 %v3164_v1, %v2372_v47 }
 0x159   : >> { %v2371_v8 = vadd.f32 %v3159_v0, %v2362_v24  ;;  %v2382_v6 = vmul.f32 %v3164_v1, %v2370_v61  ;;  %vm2373_vm4 = vcmp.gt.f32.partialorder %v2370_v61, 0.0 }
 0x15a   : >> { %v2387_v38 = vsel %vm2375_vm2, %v2372_v47, %v2384_v41 }
 0x15b   : >> { %v2392_v2 = vrot.slane %v2387_v38, 2  ;;  %vm2374_vm3 = vcmp.gt.f32.partialorder %v2371_v8, 0.0  ;;  %v2383_v5 = vmul.f32 %v3164_v1, %v2371_v8  ;;  %v2385_v7 = vsel %vm2373_vm4, %v2370_v61, %v2382_v6 }
 0x15d   : >> { %v2386_v56 = vsel %vm2374_vm3, %v2371_v8, %v2383_v5 }
 0x15e   : >> { %v2391_v60 = vrot.slane %v2386_v56, 2  ;;  %v2397_v62 = vmax.f32 %v2386_v56, %v2392_v2 }
 0x160   : >> { %v2393_v10 = vsel %vm2390_vm5, %v2391_v60, %v2392_v2  ;;  %2401 = vst.msk [vmem:[#allocation2 + $0x8] sm:$0x3] %vm2400_vm6, %v2397_v62 }
 0x161   : >> { %v2396_v11 = vmax.f32 %v2385_v7, %v2393_v10 }
 0x163   : >> { %2399 = vst.msk [vmem:[#allocation2] sm:$0xff] %vm2398_vm7, %v2396_v11 }
 0x16a   : >> { %v2402_v12 = vld [vmem:[#allocation2] ss:$2 sm:$0x1f]  ;;  %v2404_v14 = vld [vmem:[#allocation2 + $0x1] ss:$2 sm:$0x1f] }
 0x16b   : >> { %v2405_v16 = vmax.f32 %v2402_v12, %v2404_v14  ;;  %205 = sbr.rel (!%p203_p4) target bundleno = 18 (0x12), region = 81 }
 0x16d   : >> { %v2406_v17 = vpack.c.bf16 %v2405_v16, %v2405_v16 }
 0x16f   : >> { %v2413_v18 = vsel %vm2411_vm10, %v2406_v17, %v2412_v4 }
 0x170   : >> { %2414 = vst [vmem:[%s2408_s22] sm:$0x7] %v2413_v18 }
 0x172 PF: > { %s14_s15 = sadd.s32 1, %s3117_s15  }
 0x173   : > { %p11_p5 = scmp.ge.s32.totalorder %s14_s15, 4  }
 0x175   :  { %13 = sbr.rel (!%p11_p5) target bundleno = 1 (0x1), region = 92 }

// kernel: embedding_net_forward.5
= control target key start
LH: loop header
LB: loop body
LE: loop exit
PB: predicated region body
PF: predicated region fallthrough
CT: control target
= control target key end

     0   :  { %vm1293_vm0 = vcmask 523264   ;;  %s3593_s1 = inlined_call_operand.vmem [shape: bf16[1600,256], index: 1, kind: input, shape index: {}]   ;;  %s3594_s0 = inlined_call_operand.vmem [shape: bf16[8,1600], index: 0, kind: input, shape index: {}]   ;;  %s3595_s4 = inlined_call_operand.vmem [shape: bf16[256,256], index: 4, kind: input, shape index: {}]   ;;  %s3596_s7 = inlined_call_operand.vmem [shape: bf16[256,128], index: 7, kind: input, shape index: {}]   ;;  %s3597_s2 = inlined_call_operand.vmem [shape: f32[1,256], index: 2, kind: input, shape index: {}]   ;;  %s3598_s3 = inlined_call_operand.vmem [shape: f32[1,256], index: 3, kind: input, shape index: {}]   ;;  %s3599_s5 = inlined_call_operand.vmem [shape: f32[1,256], index: 5, kind: input, shape index: {}]   ;;  %s3600_s6 = inlined_call_operand.vmem [shape: f32[1,256], index: 6, kind: input, shape index: {}]   ;;  %s3601_s8 = inlined_call_operand.vmem [shape: f32[1,128], index: 8, kind: input, shape index: {}]   ;;  %s3602_s9 = inlined_call_operand.vmem [shape: f32[8,128], index: 9, kind: output, shape index: {}]  }
   0x1   :  { %v2358_v0 = vld [vmem:[%s3593_s1 + $0x4] ss:$8 sps:$4 sm:$0xff]   ;;  %v2362_v2 = vld [vmem:[%s3593_s1] ss:$8 sps:$4 sm:$0xff]   ;;  %v2364_v4 = vld [vmem:[%s3593_s1 + $0x14] ss:$8 sps:$4 sm:$0xff]  }
   0x2   :  { %v2360_v1 = vld [vmem:[%s3593_s1 + $0x104] ss:$8 sps:$4 sm:$0xff]   ;;  %1297 = vmatprep.subr.bf16.mxu0 %v2358_v0  ;;  %v2363_v3 = vld [vmem:[%s3593_s1 + $0x100] ss:$8 sps:$4 sm:$0xff]   ;;  %v2366_v5 = vld [vmem:[%s3593_s1 + $0x114] ss:$8 sps:$4 sm:$0xff]  }
   0x3   :  { %1338 = vmatprep.subr.bf16.mxu1 %v2360_v1  ;;  %1298 = vmatpush1.bf16.msra.mxu0 %v2362_v2  ;;  %v2368_v6 = vld [vmem:[%s3593_s1 + $0x10] ss:$8 sps:$4 sm:$0xff]   ;;  %v2370_v8 = vld [vmem:[%s3593_s1 + $0x24] ss:$8 sps:$4 sm:$0xff]   ;;  %v2374_v10 = vld [vmem:[%s3593_s1 + $0x20] ss:$8 sps:$4 sm:$0xff]  }
   0x4   :  { %1339 = vmatpush1.bf16.msra.mxu1 %v2363_v3  ;;  %1299 = vmatprep.subr.bf16.mxu0 %v2364_v4  ;;  %v2369_v7 = vld [vmem:[%s3593_s1 + $0x110] ss:$8 sps:$4 sm:$0xff]   ;;  %v2372_v9 = vld [vmem:[%s3593_s1 + $0x124] ss:$8 sps:$4 sm:$0xff]   ;;  %v2375_v11 = vld [vmem:[%s3593_s1 + $0x120] ss:$8 sps:$4 sm:$0xff]  }
   0x5   :  { %1340 = vmatprep.subr.bf16.mxu1 %v2366_v5  ;;  %v2376_v12 = vld [vmem:[%s3593_s1 + $0x34] ss:$8 sps:$4 sm:$0xff]   ;;  %v2380_v14 = vld [vmem:[%s3593_s1 + $0x30] ss:$8 sps:$4 sm:$0xff]   ;;  %v2382_v16 = vld [vmem:[%s3593_s1 + $0x44] ss:$8 sps:$4 sm:$0xff]  }
   0x6   :  { %v2378_v13 = vld [vmem:[%s3593_s1 + $0x134] ss:$8 sps:$4 sm:$0xff]   ;;  %v2381_v15 = vld [vmem:[%s3593_s1 + $0x130] ss:$8 sps:$4 sm:$0xff]   ;;  %v2384_v17 = vld [vmem:[%s3593_s1 + $0x144] ss:$8 sps:$4 sm:$0xff]  }
   0x7   :  { %1300 = vmatpush1.bf16.msra.mxu0 %v2368_v6  ;;  %v2386_v18 = vld [vmem:[%s3593_s1 + $0x40] ss:$8 sps:$4 sm:$0xff]   ;;  %v2388_v20 = vld [vmem:[%s3593_s1 + $0x54] ss:$8 sps:$4 sm:$0xff]   ;;  %v2392_v22 = vld [vmem:[%s3593_s1 + $0x50] ss:$8 sps:$4 sm:$0xff]  }
   0x8   :  { %1341 = vmatpush1.bf16.msra.mxu1 %v2369_v7  ;;  %1301 = vmatprep.subr.bf16.mxu0 %v2370_v8  ;;  %v2387_v19 = vld [vmem:[%s3593_s1 + $0x140] ss:$8 sps:$4 sm:$0xff]   ;;  %v2390_v21 = vld [vmem:[%s3593_s1 + $0x154] ss:$8 sps:$4 sm:$0xff]   ;;  %v2393_v23 = vld [vmem:[%s3593_s1 + $0x150] ss:$8 sps:$4 sm:$0xff]  }
   0x9   :  { %1342 = vmatprep.subr.bf16.mxu1 %v2372_v9  ;;  %v2394_v24 = vld [vmem:[%s3593_s1 + $0x64] ss:$8 sps:$4 sm:$0xff]   ;;  %v2398_v26 = vld [vmem:[%s3593_s1 + $0x60] ss:$8 sps:$4 sm:$0xff]   ;;  %v2400_v28 = vld [vmem:[%s3593_s1 + $0x74] ss:$8 sps:$4 sm:$0xff]  }
   0xa   :  { %v2396_v25 = vld [vmem:[%s3593_s1 + $0x164] ss:$8 sps:$4 sm:$0xff]   ;;  %v2399_v27 = vld [vmem:[%s3593_s1 + $0x160] ss:$8 sps:$4 sm:$0xff]   ;;  %v2402_v29 = vld [vmem:[%s3593_s1 + $0x174] ss:$8 sps:$4 sm:$0xff]  }
   0xb   :  { %1302 = vmatpush1.bf16.msra.mxu0 %v2374_v10  ;;  %v2404_v30 = vld [vmem:[%s3593_s1 + $0x70] ss:$8 sps:$4 sm:$0xff]   ;;  %v2406_v32 = vld [vmem:[%s3593_s1 + $0x84] ss:$8 sps:$4 sm:$0xff]   ;;  %v2410_v34 = vld [vmem:[%s3593_s1 + $0x80] ss:$8 sps:$4 sm:$0xff]  }
   0xc   :  { %1343 = vmatpush1.bf16.msra.mxu1 %v2375_v11  ;;  %1303 = vmatprep.subr.bf16.mxu0 %v2376_v12  ;;  %v2405_v31 = vld [vmem:[%s3593_s1 + $0x170] ss:$8 sps:$4 sm:$0xff]   ;;  %v2408_v33 = vld [vmem:[%s3593_s1 + $0x184] ss:$8 sps:$4 sm:$0xff]   ;;  %v2411_v35 = vld [vmem:[%s3593_s1 + $0x180] ss:$8 sps:$4 sm:$0xff]  }
   0xd   :  { %1344 = vmatprep.subr.bf16.mxu1 %v2378_v13  ;;  %v2412_v36 = vld [vmem:[%s3593_s1 + $0x94] ss:$8 sps:$4 sm:$0xff]   ;;  %v2416_v38 = vld [vmem:[%s3593_s1 + $0x90] ss:$8 sps:$4 sm:$0xff]   ;;  %v2418_v40 = vld [vmem:[%s3593_s1 + $0xa4] ss:$8 sps:$4 sm:$0xff]  }
   0xe   :  { %v2414_v37 = vld [vmem:[%s3593_s1 + $0x194] ss:$8 sps:$4 sm:$0xff]   ;;  %v2417_v39 = vld [vmem:[%s3593_s1 + $0x190] ss:$8 sps:$4 sm:$0xff]   ;;  %v2420_v41 = vld [vmem:[%s3593_s1 + $0x1a4] ss:$8 sps:$4 sm:$0xff]  }
   0xf   :  { %1304 = vmatpush1.bf16.msra.mxu0 %v2380_v14  ;;  %v2422_v42 = vld [vmem:[%s3593_s1 + $0xa0] ss:$8 sps:$4 sm:$0xff]   ;;  %v2424_v44 = vld [vmem:[%s3593_s1 + $0xb4] ss:$8 sps:$4 sm:$0xff]   ;;  %v2428_v49 = vld [vmem:[%s3593_s1 + $0xb0] ss:$8 sps:$4 sm:$0xff]  }
  0x10   :  { %1345 = vmatpush1.bf16.msra.mxu1 %v2381_v15  ;;  %1305 = vmatprep.subr.bf16.mxu0 %v2382_v16  ;;  %v2423_v43 = vld [vmem:[%s3593_s1 + $0x1a0] ss:$8 sps:$4 sm:$0xff]   ;;  %v2426_v45 = vld [vmem:[%s3593_s1 + $0x1b4] ss:$8 sps:$4 sm:$0xff]   ;;  %v2429_v50 = vld [vmem:[%s3593_s1 + $0x1b0] ss:$8 sps:$4 sm:$0xff]  }
  0x11   :  { %1346 = vmatprep.subr.bf16.mxu1 %v2384_v17  ;;  %v41_v46 = vld [vmem:[%s3594_s0] sm:$0xff]  ;;  %v42_v48 = vld [vmem:[%s3594_s0 + $0x8] sm:$0xff]  ;;  %v2436_v56 = vld [vmem:[%s3593_s1 + $0xd4] ss:$8 sps:$4 sm:$0xff]  }
  0x12   :  { %v2073_v47 = vcombine.high %v41_v46, %v41_v46  ;;  %v2075_v51 = vcombine.high %v42_v48, %v42_v48  ;;  %v2430_v52 = vld [vmem:[%s3593_s1 + $0xc4] ss:$8 sps:$4 sm:$0xff]   ;;  %v2434_v54 = vld [vmem:[%s3593_s1 + $0xc0] ss:$8 sps:$4 sm:$0xff]   ;;  %v2438_v57 = vld [vmem:[%s3593_s1 + $0x1d4] ss:$8 sps:$4 sm:$0xff]   ;;  %v2072_v6 = vcombine.low %v41_v46, %v41_v46  ;;  %v2074_v7 = vcombine.low %v42_v48, %v42_v48 }
  0x13   :  { %1306 = vmatpush1.bf16.msra.mxu0 %v2386_v18  ;;  %v2432_v53 = vld [vmem:[%s3593_s1 + $0x1c4] ss:$8 sps:$4 sm:$0xff]   ;;  %v2435_v55 = vld [vmem:[%s3593_s1 + $0x1c0] ss:$8 sps:$4 sm:$0xff]   ;;  %v2440_v58 = vld [vmem:[%s3593_s1 + $0xd0] ss:$8 sps:$4 sm:$0xff]  }
  0x14   :  { %1347 = vmatpush1.bf16.msra.mxu1 %v2387_v19  ;;  %1307 = vmatprep.subr.bf16.mxu0 %v2388_v20  ;;  %v2441_v59 = vld [vmem:[%s3593_s1 + $0x1d0] ss:$8 sps:$4 sm:$0xff]   ;;  %v2442_v60 = vld [vmem:[%s3593_s1 + $0xe4] ss:$8 sps:$4 sm:$0xff]   ;;  %v2446_v62 = vld [vmem:[%s3593_s1 + $0xe0] ss:$8 sps:$4 sm:$0xff]  }
  0x15   :  { %1348 = vmatprep.subr.bf16.mxu1 %v2390_v21  ;;  %1329 = vmatprep.mubr.bf16.mxu0 %v2073_v47  ;;  %v2444_v61 = vld [vmem:[%s3593_s1 + $0x1e4] ss:$8 sps:$4 sm:$0xff]   ;;  %v2447_v63 = vld [vmem:[%s3593_s1 + $0x1e0] ss:$8 sps:$4 sm:$0xff]   ;;  %v2448_v0 = vld [vmem:[%s3593_s1 + $0xf4] ss:$8 sps:$4 sm:$0xff]  }
  0x16   :  { %1370 = vmatprep.mubr.bf16.mxu1 %v2075_v51  ;;  %v2450_v1 = vld [vmem:[%s3593_s1 + $0x1f4] ss:$8 sps:$4 sm:$0xff]   ;;  %v2452_v2 = vld [vmem:[%s3593_s1 + $0xf0] ss:$8 sps:$4 sm:$0xff]   ;;  %v2460_v4 = vld [vmem:[%s3593_s1 + $0x204] ss:$8 sps:$4 sm:$0xff]  }
  0x17   :  { %1308 = vmatpush1.bf16.msra.mxu0 %v2392_v22  ;;  %v2453_v3 = vld [vmem:[%s3593_s1 + $0x1f0] ss:$8 sps:$4 sm:$0xff]   ;;  %v2463_v5 = vld [vmem:[%s3593_s1 + $0x304] ss:$8 sps:$4 sm:$0xff]   ;;  %v2458_v8 = vld [vmem:[%s3593_s1 + $0x200] ss:$8 sps:$4 sm:$0xff]  }
  0x18   :  { %1349 = vmatpush1.bf16.msra.mxu1 %v2393_v23  ;;  %1309 = vmatprep.subr.bf16.mxu0 %v2394_v24  ;;  %v2461_v9 = vld [vmem:[%s3593_s1 + $0x300] ss:$8 sps:$4 sm:$0xff]   ;;  %v2466_v10 = vld [vmem:[%s3593_s1 + $0x214] ss:$8 sps:$4 sm:$0xff]   ;;  %v2464_v12 = vld [vmem:[%s3593_s1 + $0x210] ss:$8 sps:$4 sm:$0xff]  }
  0x19   :  { %1350 = vmatprep.subr.bf16.mxu1 %v2396_v25  ;;  %v2469_v11 = vld [vmem:[%s3593_s1 + $0x314] ss:$8 sps:$4 sm:$0xff]   ;;  %v2467_v13 = vld [vmem:[%s3593_s1 + $0x310] ss:$8 sps:$4 sm:$0xff]   ;;  %v2472_v14 = vld [vmem:[%s3593_s1 + $0x224] ss:$8 sps:$4 sm:$0xff]  }
  0x1a   :  { %v2475_v15 = vld [vmem:[%s3593_s1 + $0x324] ss:$8 sps:$4 sm:$0xff]   ;;  %v2470_v16 = vld [vmem:[%s3593_s1 + $0x220] ss:$8 sps:$4 sm:$0xff]   ;;  %v2478_v18 = vld [vmem:[%s3593_s1 + $0x234] ss:$8 sps:$4 sm:$0xff]  }
  0x1b   :  { %1310 = vmatpush1.bf16.msra.mxu0 %v2398_v26  ;;  %v2473_v17 = vld [vmem:[%s3593_s1 + $0x320] ss:$8 sps:$4 sm:$0xff]   ;;  %v2481_v19 = vld [vmem:[%s3593_s1 + $0x334] ss:$8 sps:$4 sm:$0xff]   ;;  %v2476_v20 = vld [vmem:[%s3593_s1 + $0x230] ss:$8 sps:$4 sm:$0xff]  }
  0x1c   :  { %1351 = vmatpush1.bf16.msra.mxu1 %v2399_v27  ;;  %1311 = vmatprep.subr.bf16.mxu0 %v2400_v28  ;;  %v2479_v21 = vld [vmem:[%s3593_s1 + $0x330] ss:$8 sps:$4 sm:$0xff]   ;;  %v2484_v22 = vld [vmem:[%s3593_s1 + $0x244] ss:$8 sps:$4 sm:$0xff]   ;;  %v2482_v24 = vld [vmem:[%s3593_s1 + $0x240] ss:$8 sps:$4 sm:$0xff]  }
  0x1d   :  { %1352 = vmatprep.subr.bf16.mxu1 %v2402_v29  ;;  %v2487_v23 = vld [vmem:[%s3593_s1 + $0x344] ss:$8 sps:$4 sm:$0xff]   ;;  %v2485_v25 = vld [vmem:[%s3593_s1 + $0x340] ss:$8 sps:$4 sm:$0xff]   ;;  %v2490_v26 = vld [vmem:[%s3593_s1 + $0x254] ss:$8 sps:$4 sm:$0xff]  }
  0x1e   :  { %v2493_v27 = vld [vmem:[%s3593_s1 + $0x354] ss:$8 sps:$4 sm:$0xff]   ;;  %v2488_v28 = vld [vmem:[%s3593_s1 + $0x250] ss:$8 sps:$4 sm:$0xff]   ;;  %v2523_v51 = vld [vmem:[%s3593_s1 + $0x3a4] ss:$8 sps:$4 sm:$0xff]  }
  0x1f   :  { %1312 = vmatpush1.bf16.msra.mxu0 %v2404_v30  ;;  %v2491_v29 = vld [vmem:[%s3593_s1 + $0x350] ss:$8 sps:$4 sm:$0xff]   ;;  %v2496_v30 = vld [vmem:[%s3593_s1 + $0x264] ss:$8 sps:$4 sm:$0xff]   ;;  %v2514_v46 = vld [vmem:[%s3593_s1 + $0x294] ss:$8 sps:$4 sm:$0xff]  }
  0x20   :  { %1353 = vmatpush1.bf16.msra.mxu1 %v2405_v31  ;;  %1313 = vmatprep.subr.bf16.mxu0 %v2406_v32  ;;  %v2499_v31 = vld [vmem:[%s3593_s1 + $0x364] ss:$8 sps:$4 sm:$0xff]   ;;  %v3065_v32 = vld [vmem:[%s3594_s0 + $0x10] sm:$0xff] }
  0x21   :  { %1354 = vmatprep.subr.bf16.mxu1 %v2408_v33  ;;  %v2494_v33 = vld [vmem:[%s3593_s1 + $0x260] ss:$8 sps:$4 sm:$0xff]   ;;  %v2517_v47 = vld [vmem:[%s3593_s1 + $0x394] ss:$8 sps:$4 sm:$0xff]   ;;  %v2512_v48 = vld [vmem:[%s3593_s1 + $0x290] ss:$8 sps:$4 sm:$0xff]  }
  0x23   :  { %1314 = vmatpush1.bf16.msra.mxu0 %v2410_v34  ;;  %v2497_v34 = vld [vmem:[%s3593_s1 + $0x360] ss:$8 sps:$4 sm:$0xff]  }
  0x24   :  { %1355 = vmatpush1.bf16.msra.mxu1 %v2411_v35  ;;  %1315 = vmatprep.subr.bf16.mxu0 %v2412_v36  ;;  %v2077_v35 = vcombine.high %v3065_v32, %v3065_v32  ;;  %v3078_v36 = vld [vmem:[%s3594_s0 + $0x18] sm:$0xff] }
  0x25   :  { %1356 = vmatprep.subr.bf16.mxu1 %v2414_v37  ;;  %v2502_v37 = vld [vmem:[%s3593_s1 + $0x274] ss:$8 sps:$4 sm:$0xff]  }
  0x27   :  { %1316 = vmatpush1.bf16.msra.mxu0 %v2416_v38  ;;  %v2079_v38 = vcombine.high %v3078_v36, %v3078_v36 }
  0x28   :  { %1357 = vmatpush1.bf16.msra.mxu1 %v2417_v39  ;;  %1317 = vmatprep.subr.bf16.mxu0 %v2418_v40  ;;  %v2505_v39 = vld [vmem:[%s3593_s1 + $0x374] ss:$8 sps:$4 sm:$0xff]   ;;  %v2500_v40 = vld [vmem:[%s3593_s1 + $0x270] ss:$8 sps:$4 sm:$0xff]  }
  0x29   :  { %1358 = vmatprep.subr.bf16.mxu1 %v2420_v41  ;;  %v2503_v41 = vld [vmem:[%s3593_s1 + $0x370] ss:$8 sps:$4 sm:$0xff]  }
  0x2b   :  { %1318 = vmatpush1.bf16.msra.mxu0 %v2422_v42  ;;  %v2508_v42 = vld [vmem:[%s3593_s1 + $0x284] ss:$8 sps:$4 sm:$0xff]  }
  0x2c   :  { %1359 = vmatpush1.bf16.msra.mxu1 %v2423_v43  ;;  %1319 = vmatprep.subr.bf16.mxu0 %v2424_v44  ;;  %v2511_v43 = vld [vmem:[%s3593_s1 + $0x384] ss:$8 sps:$4 sm:$0xff]   ;;  %v2506_v44 = vld [vmem:[%s3593_s1 + $0x280] ss:$8 sps:$4 sm:$0xff]  }
  0x2d   :  { %1360 = vmatprep.subr.bf16.mxu1 %v2426_v45  ;;  %v2509_v45 = vld [vmem:[%s3593_s1 + $0x380] ss:$8 sps:$4 sm:$0xff]  }
  0x2f   :  { %1320 = vmatpush1.bf16.msra.mxu0 %v2428_v49  ;;  %v2515_v49 = vld [vmem:[%s3593_s1 + $0x390] ss:$8 sps:$4 sm:$0xff]  }
  0x30   :  { %1361 = vmatpush1.bf16.msra.mxu1 %v2429_v50  ;;  %1321 = vmatprep.subr.bf16.mxu0 %v2430_v52  ;;  %v2520_v50 = vld [vmem:[%s3593_s1 + $0x2a4] ss:$8 sps:$4 sm:$0xff]   ;;  %v2518_v52 = vld [vmem:[%s3593_s1 + $0x2a0] ss:$8 sps:$4 sm:$0xff]  }
  0x31   :  { %1362 = vmatprep.subr.bf16.mxu1 %v2432_v53  ;;  %v2521_v53 = vld [vmem:[%s3593_s1 + $0x3a0] ss:$8 sps:$4 sm:$0xff]  }
  0x33   :  { %1322 = vmatpush1.bf16.msra.mxu0 %v2434_v54  ;;  %v2526_v54 = vld [vmem:[%s3593_s1 + $0x2b4] ss:$8 sps:$4 sm:$0xff]  }
  0x34   :  { %1363 = vmatpush1.bf16.msra.mxu1 %v2435_v55  ;;  %1323 = vmatprep.subr.bf16.mxu0 %v2436_v56  ;;  %v2529_v55 = vld [vmem:[%s3593_s1 + $0x3b4] ss:$8 sps:$4 sm:$0xff]   ;;  %v2524_v56 = vld [vmem:[%s3593_s1 + $0x2b0] ss:$8 sps:$4 sm:$0xff]  }
  0x35   :  { %1364 = vmatprep.subr.bf16.mxu1 %v2438_v57  ;;  %v2527_v57 = vld [vmem:[%s3593_s1 + $0x3b0] ss:$8 sps:$4 sm:$0xff]  }
  0x37   :  { %1324 = vmatpush1.bf16.msra.mxu0 %v2440_v58  ;;  %v2532_v58 = vld [vmem:[%s3593_s1 + $0x2c4] ss:$8 sps:$4 sm:$0xff]  }
  0x38   :  { %1365 = vmatpush1.bf16.msra.mxu1 %v2441_v59  ;;  %1325 = vmatprep.subr.bf16.mxu0 %v2442_v60  ;;  %v2535_v59 = vld [vmem:[%s3593_s1 + $0x3c4] ss:$8 sps:$4 sm:$0xff]   ;;  %v2530_v60 = vld [vmem:[%s3593_s1 + $0x2c0] ss:$8 sps:$4 sm:$0xff]  }
  0x39   :  { %1366 = vmatprep.subr.bf16.mxu1 %v2444_v61  ;;  %v2533_v61 = vld [vmem:[%s3593_s1 + $0x3c0] ss:$8 sps:$4 sm:$0xff]  }
  0x3b   :  { %1326 = vmatpush1.bf16.msra.mxu0 %v2446_v62  ;;  %v2538_v62 = vld [vmem:[%s3593_s1 + $0x2d4] ss:$8 sps:$4 sm:$0xff]  }
  0x3c   :  { %1367 = vmatpush1.bf16.msra.mxu1 %v2447_v63  ;;  %1327 = vmatprep.subr.bf16.mxu0 %v2448_v0  ;;  %v2541_v63 = vld [vmem:[%s3593_s1 + $0x3d4] ss:$8 sps:$4 sm:$0xff]   ;;  %v2536_v0 = vld [vmem:[%s3593_s1 + $0x2d0] ss:$8 sps:$4 sm:$0xff]  }
  0x3d   :  { %1368 = vmatprep.subr.bf16.mxu1 %v2450_v1  ;;  %v2539_v1 = vld [vmem:[%s3593_s1 + $0x3d0] ss:$8 sps:$4 sm:$0xff]  }
  0x3f   :  { %1328 = vmatpush1.bf16.msra.mxu0 %v2452_v2  ;;  %v2544_v2 = vld [vmem:[%s3593_s1 + $0x2e4] ss:$8 sps:$4 sm:$0xff]  }
  0x40   :  { %1369 = vmatpush1.bf16.msra.mxu1 %v2453_v3  ;;  %1379 = vmatprep.subr.bf16.mxu0 %v2460_v4  ;;  %v2547_v3 = vld [vmem:[%s3593_s1 + $0x3e4] ss:$8 sps:$4 sm:$0xff]   ;;  %v2542_v4 = vld [vmem:[%s3593_s1 + $0x2e0] ss:$8 sps:$4 sm:$0xff]  }
  0x41   :  { %1420 = vmatprep.subr.bf16.mxu1 %v2463_v5  ;;  %v2545_v5 = vld [vmem:[%s3593_s1 + $0x3e0] ss:$8 sps:$4 sm:$0xff]  }
  0x42   :  { %1330 = vmatmul.mubr.bf16.vlgmr.msra.gmra.mrb[0].mxu0 %v2072_v6  ;;  %v2550_v6 = vld [vmem:[%s3593_s1 + $0x2f4] ss:$8 sps:$4 sm:$0xff]  }
  0x43   :  { %1371 = vmatmul.mubr.bf16.vlgmr.msra.gmra.mrb[0].mxu1 %v2074_v7  ;;  %1380 = vmatpush1.bf16.msra.mxu0 %v2458_v8  ;;  %v2553_v7 = vld [vmem:[%s3593_s1 + $0x3f4] ss:$8 sps:$4 sm:$0xff]   ;;  %v2548_v8 = vld [vmem:[%s3593_s1 + $0x2f0] ss:$8 sps:$4 sm:$0xff]  }
  0x44   :  { %1421 = vmatpush1.bf16.msra.mxu1 %v2461_v9  ;;  %1381 = vmatprep.subr.bf16.mxu0 %v2466_v10  ;;  %v2551_v9 = vld [vmem:[%s3593_s1 + $0x3f0] ss:$8 sps:$4 sm:$0xff]   ;;  %v2558_v10 = vld [vmem:[%s3593_s1 + $0x404] ss:$8 sps:$4 sm:$0xff]  }
  0x45   :  { %1422 = vmatprep.subr.bf16.mxu1 %v2469_v11  ;;  %1411 = vmatprep.mubr.bf16.mxu0 %v2077_v35  ;;  %v2563_v11 = vld [vmem:[%s3593_s1 + $0x504] ss:$8 sps:$4 sm:$0xff]   ;;  %v2585_v35 = vld [vmem:[%s3593_s1 + $0x540] ss:$8 sps:$4 sm:$0xff]  }
  0x46   :  { %1452 = vmatprep.mubr.bf16.mxu1 %v2079_v38  ;;  %v2588_v38 = vld [vmem:[%s3593_s1 + $0x450] ss:$8 sps:$4 sm:$0xff]  }
  0x47   :  { %1382 = vmatpush1.bf16.msra.mxu0 %v2464_v12  ;;  %v2076_v12 = vcombine.low %v3065_v32, %v3065_v32  ;;  %v2584_v32 = vld [vmem:[%s3593_s1 + $0x444] ss:$8 sps:$4 sm:$0xff]  }
  0x48   :  { %1423 = vmatpush1.bf16.msra.mxu1 %v2467_v13  ;;  %1383 = vmatprep.subr.bf16.mxu0 %v2472_v14  ;;  %v2556_v13 = vld [vmem:[%s3593_s1 + $0x400] ss:$8 sps:$4 sm:$0xff]   ;;  %v2078_v14 = vcombine.low %v3078_v36, %v3078_v36  ;;  %v2590_v36 = vld [vmem:[%s3593_s1 + $0x454] ss:$8 sps:$4 sm:$0xff]  }
  0x49   :  { %1424 = vmatprep.subr.bf16.mxu1 %v2475_v15  ;;  %v2561_v15 = vld [vmem:[%s3593_s1 + $0x500] ss:$8 sps:$4 sm:$0xff]  }
  0x4b   :  { %1384 = vmatpush1.bf16.msra.mxu0 %v2470_v16  ;;  %v2566_v16 = vld [vmem:[%s3593_s1 + $0x414] ss:$8 sps:$4 sm:$0xff]  }
  0x4c   :  { %1425 = vmatpush1.bf16.msra.mxu1 %v2473_v17  ;;  %1385 = vmatprep.subr.bf16.mxu0 %v2478_v18  ;;  %v2569_v17 = vld [vmem:[%s3593_s1 + $0x514] ss:$8 sps:$4 sm:$0xff]   ;;  %v3215_v18 = vld [vmem:[%s3594_s0 + $0x20] sm:$0xff] }
  0x4d   :  { %1426 = vmatprep.subr.bf16.mxu1 %v2481_v19  ;;  %v2081_v19 = vcombine.high %v3215_v18, %v3215_v18 }
  0x4f   :  { %1386 = vmatpush1.bf16.msra.mxu0 %v2476_v20  ;;  %v3222_v20 = vld [vmem:[%s3594_s0 + $0x28] sm:$0xff] }
  0x50   :  { %1427 = vmatpush1.bf16.msra.mxu1 %v2479_v21  ;;  %1387 = vmatprep.subr.bf16.mxu0 %v2484_v22  ;;  %v2564_v21 = vld [vmem:[%s3593_s1 + $0x410] ss:$8 sps:$4 sm:$0xff]  }
  0x51   :  { %1428 = vmatprep.subr.bf16.mxu1 %v2487_v23  ;;  %v2567_v22 = vld [vmem:[%s3593_s1 + $0x510] ss:$8 sps:$4 sm:$0xff]   ;;  %v2083_v23 = vcombine.high %v3222_v20, %v3222_v20 }
  0x53   :  { %1388 = vmatpush1.bf16.msra.mxu0 %v2482_v24  ;;  %v2572_v24 = vld [vmem:[%s3593_s1 + $0x424] ss:$8 sps:$4 sm:$0xff]  }
  0x54   :  { %1429 = vmatpush1.bf16.msra.mxu1 %v2485_v25  ;;  %1389 = vmatprep.subr.bf16.mxu0 %v2490_v26  ;;  %v2575_v25 = vld [vmem:[%s3593_s1 + $0x524] ss:$8 sps:$4 sm:$0xff]   ;;  %v2570_v26 = vld [vmem:[%s3593_s1 + $0x420] ss:$8 sps:$4 sm:$0xff]  }
  0x55   :  { %1430 = vmatprep.subr.bf16.mxu1 %v2493_v27  ;;  %v2573_v27 = vld [vmem:[%s3593_s1 + $0x520] ss:$8 sps:$4 sm:$0xff]  }
  0x57   :  { %1390 = vmatpush1.bf16.msra.mxu0 %v2488_v28  ;;  %v2578_v28 = vld [vmem:[%s3593_s1 + $0x434] ss:$8 sps:$4 sm:$0xff]  }
  0x58   :  { %1431 = vmatpush1.bf16.msra.mxu1 %v2491_v29  ;;  %1391 = vmatprep.subr.bf16.mxu0 %v2496_v30  ;;  %v2581_v29 = vld [vmem:[%s3593_s1 + $0x534] ss:$8 sps:$4 sm:$0xff]   ;;  %v2576_v30 = vld [vmem:[%s3593_s1 + $0x430] ss:$8 sps:$4 sm:$0xff]  }
  0x59   :  { %1432 = vmatprep.subr.bf16.mxu1 %v2499_v31  ;;  %v2579_v31 = vld [vmem:[%s3593_s1 + $0x530] ss:$8 sps:$4 sm:$0xff]  }
  0x5b   :  { %1392 = vmatpush1.bf16.msra.mxu0 %v2494_v33  ;;  %v2587_v33 = vld [vmem:[%s3593_s1 + $0x544] ss:$8 sps:$4 sm:$0xff]  }
  0x5c   :  { %1433 = vmatpush1.bf16.msra.mxu1 %v2497_v34  ;;  %1393 = vmatprep.subr.bf16.mxu0 %v2502_v37  ;;  %v2582_v34 = vld [vmem:[%s3593_s1 + $0x440] ss:$8 sps:$4 sm:$0xff]   ;;  %v2593_v37 = vld [vmem:[%s3593_s1 + $0x554] ss:$8 sps:$4 sm:$0xff]  }
  0x5d   :  { %1434 = vmatprep.subr.bf16.mxu1 %v2505_v39  ;;  %v2591_v39 = vld [vmem:[%s3593_s1 + $0x550] ss:$8 sps:$4 sm:$0xff]  }
  0x5f   :  { %1394 = vmatpush1.bf16.msra.mxu0 %v2500_v40  ;;  %v2596_v40 = vld [vmem:[%s3593_s1 + $0x464] ss:$8 sps:$4 sm:$0xff]  }
  0x60   :  { %1435 = vmatpush1.bf16.msra.mxu1 %v2503_v41  ;;  %1395 = vmatprep.subr.bf16.mxu0 %v2508_v42  ;;  %v2599_v41 = vld [vmem:[%s3593_s1 + $0x564] ss:$8 sps:$4 sm:$0xff]   ;;  %v2594_v42 = vld [vmem:[%s3593_s1 + $0x460] ss:$8 sps:$4 sm:$0xff]  }
  0x61   :  { %1436 = vmatprep.subr.bf16.mxu1 %v2511_v43  ;;  %v2597_v43 = vld [vmem:[%s3593_s1 + $0x560] ss:$8 sps:$4 sm:$0xff]  }
  0x63   :  { %1396 = vmatpush1.bf16.msra.mxu0 %v2506_v44  ;;  %v2602_v44 = vld [vmem:[%s3593_s1 + $0x474] ss:$8 sps:$4 sm:$0xff]  }
  0x64   :  { %1437 = vmatpush1.bf16.msra.mxu1 %v2509_v45  ;;  %1397 = vmatprep.subr.bf16.mxu0 %v2514_v46  ;;  %v2605_v45 = vld [vmem:[%s3593_s1 + $0x574] ss:$8 sps:$4 sm:$0xff]   ;;  %v2600_v46 = vld [vmem:[%s3593_s1 + $0x470] ss:$8 sps:$4 sm:$0xff]  }
  0x65   :  { %1438 = vmatprep.subr.bf16.mxu1 %v2517_v47  ;;  %v2603_v47 = vld [vmem:[%s3593_s1 + $0x570] ss:$8 sps:$4 sm:$0xff]  }
  0x67   :  { %1398 = vmatpush1.bf16.msra.mxu0 %v2512_v48  ;;  %v2608_v48 = vld [vmem:[%s3593_s1 + $0x484] ss:$8 sps:$4 sm:$0xff]  }
  0x68   :  { %1439 = vmatpush1.bf16.msra.mxu1 %v2515_v49  ;;  %1399 = vmatprep.subr.bf16.mxu0 %v2520_v50  ;;  %v2611_v49 = vld [vmem:[%s3593_s1 + $0x584] ss:$8 sps:$4 sm:$0xff]   ;;  %v2606_v50 = vld [vmem:[%s3593_s1 + $0x480] ss:$8 sps:$4 sm:$0xff]  }
  0x69   :  { %1440 = vmatprep.subr.bf16.mxu1 %v2523_v51  ;;  %v2609_v51 = vld [vmem:[%s3593_s1 + $0x580] ss:$8 sps:$4 sm:$0xff]  }
  0x6b   :  { %1400 = vmatpush1.bf16.msra.mxu0 %v2518_v52  ;;  %v2614_v52 = vld [vmem:[%s3593_s1 + $0x494] ss:$8 sps:$4 sm:$0xff]  }
  0x6c   :  { %1441 = vmatpush1.bf16.msra.mxu1 %v2521_v53  ;;  %1401 = vmatprep.subr.bf16.mxu0 %v2526_v54  ;;  %v2617_v53 = vld [vmem:[%s3593_s1 + $0x594] ss:$8 sps:$4 sm:$0xff]   ;;  %v2612_v54 = vld [vmem:[%s3593_s1 + $0x490] ss:$8 sps:$4 sm:$0xff]  }
  0x6d   :  { %1442 = vmatprep.subr.bf16.mxu1 %v2529_v55  ;;  %v2615_v55 = vld [vmem:[%s3593_s1 + $0x590] ss:$8 sps:$4 sm:$0xff]  }
  0x6f   :  { %1402 = vmatpush1.bf16.msra.mxu0 %v2524_v56  ;;  %v2620_v56 = vld [vmem:[%s3593_s1 + $0x4a4] ss:$8 sps:$4 sm:$0xff]  }
  0x70   :  { %1443 = vmatpush1.bf16.msra.mxu1 %v2527_v57  ;;  %1403 = vmatprep.subr.bf16.mxu0 %v2532_v58  ;;  %v2623_v57 = vld [vmem:[%s3593_s1 + $0x5a4] ss:$8 sps:$4 sm:$0xff]   ;;  %v2618_v58 = vld [vmem:[%s3593_s1 + $0x4a0] ss:$8 sps:$4 sm:$0xff]  }
  0x71   :  { %1444 = vmatprep.subr.bf16.mxu1 %v2535_v59  ;;  %v2621_v59 = vld [vmem:[%s3593_s1 + $0x5a0] ss:$8 sps:$4 sm:$0xff]  }
  0x73   :  { %1404 = vmatpush1.bf16.msra.mxu0 %v2530_v60  ;;  %v2626_v60 = vld [vmem:[%s3593_s1 + $0x4b4] ss:$8 sps:$4 sm:$0xff]  }
  0x74   :  { %1445 = vmatpush1.bf16.msra.mxu1 %v2533_v61  ;;  %1405 = vmatprep.subr.bf16.mxu0 %v2538_v62  ;;  %v2629_v61 = vld [vmem:[%s3593_s1 + $0x5b4] ss:$8 sps:$4 sm:$0xff]   ;;  %v2624_v62 = vld [vmem:[%s3593_s1 + $0x4b0] ss:$8 sps:$4 sm:$0xff]  }
  0x75   :  { %1446 = vmatprep.subr.bf16.mxu1 %v2541_v63  ;;  %v2627_v63 = vld [vmem:[%s3593_s1 + $0x5b0] ss:$8 sps:$4 sm:$0xff]  }
  0x77   :  { %1406 = vmatpush1.bf16.msra.mxu0 %v2536_v0  ;;  %v2632_v0 = vld [vmem:[%s3593_s1 + $0x4c4] ss:$8 sps:$4 sm:$0xff]  }
  0x78   :  { %1447 = vmatpush1.bf16.msra.mxu1 %v2539_v1  ;;  %1407 = vmatprep.subr.bf16.mxu0 %v2544_v2  ;;  %v2635_v1 = vld [vmem:[%s3593_s1 + $0x5c4] ss:$8 sps:$4 sm:$0xff]   ;;  %v2630_v2 = vld [vmem:[%s3593_s1 + $0x4c0] ss:$8 sps:$4 sm:$0xff]  }
  0x79   :  { %1448 = vmatprep.subr.bf16.mxu1 %v2547_v3  ;;  %v2633_v3 = vld [vmem:[%s3593_s1 + $0x5c0] ss:$8 sps:$4 sm:$0xff]  }
  0x7b   :  { %1408 = vmatpush1.bf16.msra.mxu0 %v2542_v4  ;;  %v2638_v4 = vld [vmem:[%s3593_s1 + $0x4d4] ss:$8 sps:$4 sm:$0xff]  }
  0x7c   :  { %1449 = vmatpush1.bf16.msra.mxu1 %v2545_v5  ;;  %1409 = vmatprep.subr.bf16.mxu0 %v2550_v6  ;;  %v2641_v5 = vld [vmem:[%s3593_s1 + $0x5d4] ss:$8 sps:$4 sm:$0xff]   ;;  %v2636_v6 = vld [vmem:[%s3593_s1 + $0x4d0] ss:$8 sps:$4 sm:$0xff]  }
  0x7d   :  { %1450 = vmatprep.subr.bf16.mxu1 %v2553_v7  ;;  %v2639_v7 = vld [vmem:[%s3593_s1 + $0x5d0] ss:$8 sps:$4 sm:$0xff]  }
  0x7f   :  { %1410 = vmatpush1.bf16.msra.mxu0 %v2548_v8  ;;  %v2644_v8 = vld [vmem:[%s3593_s1 + $0x4e4] ss:$8 sps:$4 sm:$0xff]  }
  0x80   :  { %1451 = vmatpush1.bf16.msra.mxu1 %v2551_v9  ;;  %1461 = vmatprep.subr.bf16.mxu0 %v2558_v10  ;;  %v2647_v9 = vld [vmem:[%s3593_s1 + $0x5e4] ss:$8 sps:$4 sm:$0xff]   ;;  %v2642_v10 = vld [vmem:[%s3593_s1 + $0x4e0] ss:$8 sps:$4 sm:$0xff]  }
  0x81   :  { %1502 = vmatprep.subr.bf16.mxu1 %v2563_v11  ;;  %v2645_v11 = vld [vmem:[%s3593_s1 + $0x5e0] ss:$8 sps:$4 sm:$0xff]  }
  0x82   :  { %1412 = vmatmul.mubr.bf16.vlgmr.msra.gmra.mrb[4].mxu0 %v2076_v12  ;;  %v2650_v12 = vld [vmem:[%s3593_s1 + $0x4f4] ss:$8 sps:$4 sm:$0xff]  }
  0x83   :  { %1453 = vmatmul.mubr.bf16.vlgmr.msra.gmra.mrb[4].mxu1 %v2078_v14  ;;  %1462 = vmatpush1.bf16.msra.mxu0 %v2556_v13  ;;  %v2653_v13 = vld [vmem:[%s3593_s1 + $0x5f4] ss:$8 sps:$4 sm:$0xff]   ;;  %v2648_v14 = vld [vmem:[%s3593_s1 + $0x4f0] ss:$8 sps:$4 sm:$0xff]  }
  0x84   :  { %1503 = vmatpush1.bf16.msra.mxu1 %v2561_v15  ;;  %1463 = vmatprep.subr.bf16.mxu0 %v2566_v16  ;;  %v2651_v15 = vld [vmem:[%s3593_s1 + $0x5f0] ss:$8 sps:$4 sm:$0xff]   ;;  %v2658_v16 = vld [vmem:[%s3593_s1 + $0x604] ss:$8 sps:$4 sm:$0xff]  }
  0x85   :  { %1504 = vmatprep.subr.bf16.mxu1 %v2569_v17  ;;  %1493 = vmatprep.mubr.bf16.mxu0 %v2081_v19  ;;  %v2080_v17 = vcombine.low %v3215_v18, %v3215_v18  ;;  %v2082_v19 = vcombine.low %v3222_v20, %v3222_v20  ;;  %v2661_v18 = vld [vmem:[%s3593_s1 + $0x610] ss:$8 sps:$4 sm:$0xff]   ;;  %v2666_v20 = vld [vmem:[%s3593_s1 + $0x624] ss:$8 sps:$4 sm:$0xff]  }
  0x86   :  { %1534 = vmatprep.mubr.bf16.mxu1 %v2083_v23  ;;  %v2735_v23 = vmov 0  }
  0x87   :  { %1464 = vmatpush1.bf16.msra.mxu0 %v2564_v21  ;;  %v2656_v21 = vld [vmem:[%s3593_s1 + $0x600] ss:$8 sps:$4 sm:$0xff]  }
  0x88   :  { %1505 = vmatpush1.bf16.msra.mxu1 %v2567_v22  ;;  %1465 = vmatprep.subr.bf16.mxu0 %v2572_v24  ;;  %v2663_v22 = vld [vmem:[%s3593_s1 + $0x614] ss:$8 sps:$4 sm:$0xff]   ;;  %v2664_v24 = vld [vmem:[%s3593_s1 + $0x620] ss:$8 sps:$4 sm:$0xff]  }
  0x89   :  { %1506 = vmatprep.subr.bf16.mxu1 %v2575_v25  ;;  %v2669_v25 = vld [vmem:[%s3593_s1 + $0x634] ss:$8 sps:$4 sm:$0xff]  }
  0x8b   :  { %1466 = vmatpush1.bf16.msra.mxu0 %v2570_v26  ;;  %v2667_v26 = vld [vmem:[%s3593_s1 + $0x630] ss:$8 sps:$4 sm:$0xff]  }
  0x8c   :  { %1507 = vmatpush1.bf16.msra.mxu1 %v2573_v27  ;;  %1467 = vmatprep.subr.bf16.mxu0 %v2578_v28  ;;  %v2670_v27 = vld [vmem:[%s3594_s0 + $0x30] ss:$0 sps:$4 sm:$0xff]   ;;  %v2671_v28 = vld [vmem:[%s3595_s4] ss:$8 sps:$4 sm:$0xff]  }
  0x8d   :  { %1508 = vmatprep.subr.bf16.mxu1 %v2581_v29  ;;  %v2673_v29 = vld [vmem:[%s3595_s4 + $0x4] ss:$8 sps:$4 sm:$0xff]  }
  0x8f   :  { %1468 = vmatpush1.bf16.msra.mxu0 %v2576_v30  ;;  %v2676_v30 = vld [vmem:[%s3595_s4 + $0x14] ss:$8 sps:$4 sm:$0xff]  }
  0x90   :  { %1509 = vmatpush1.bf16.msra.mxu1 %v2579_v31  ;;  %1469 = vmatprep.subr.bf16.mxu0 %v2584_v32  ;;  %v2674_v31 = vld [vmem:[%s3595_s4 + $0x10] ss:$8 sps:$4 sm:$0xff]   ;;  %v2679_v32 = vld [vmem:[%s3595_s4 + $0x24] ss:$8 sps:$4 sm:$0xff]  }
  0x91   :  { %1510 = vmatprep.subr.bf16.mxu1 %v2587_v33  ;;  %v2677_v33 = vld [vmem:[%s3595_s4 + $0x20] ss:$8 sps:$4 sm:$0xff]  }
  0x93   :  { %1470 = vmatpush1.bf16.msra.mxu0 %v2582_v34  ;;  %v2682_v34 = vld [vmem:[%s3595_s4 + $0x34] ss:$8 sps:$4 sm:$0xff]  }
  0x94   :  { %1511 = vmatpush1.bf16.msra.mxu1 %v2585_v35  ;;  %1471 = vmatprep.subr.bf16.mxu0 %v2590_v36  ;;  %v2680_v35 = vld [vmem:[%s3595_s4 + $0x30] ss:$8 sps:$4 sm:$0xff]   ;;  %v2685_v36 = vld [vmem:[%s3595_s4 + $0x44] ss:$8 sps:$4 sm:$0xff]  }
  0x95   :  { %1512 = vmatprep.subr.bf16.mxu1 %v2593_v37  ;;  %v2683_v37 = vld [vmem:[%s3595_s4 + $0x40] ss:$8 sps:$4 sm:$0xff]  }
  0x97   :  { %1472 = vmatpush1.bf16.msra.mxu0 %v2588_v38  ;;  %v2688_v38 = vld [vmem:[%s3595_s4 + $0x54] ss:$8 sps:$4 sm:$0xff]  }
  0x98   :  { %1513 = vmatpush1.bf16.msra.mxu1 %v2591_v39  ;;  %1473 = vmatprep.subr.bf16.mxu0 %v2596_v40  ;;  %v2686_v39 = vld [vmem:[%s3595_s4 + $0x50] ss:$8 sps:$4 sm:$0xff]   ;;  %v2691_v40 = vld [vmem:[%s3595_s4 + $0x64] ss:$8 sps:$4 sm:$0xff]  }
  0x99   :  { %1514 = vmatprep.subr.bf16.mxu1 %v2599_v41  ;;  %v2689_v41 = vld [vmem:[%s3595_s4 + $0x60] ss:$8 sps:$4 sm:$0xff]  }
  0x9b   :  { %1474 = vmatpush1.bf16.msra.mxu0 %v2594_v42  ;;  %v2694_v42 = vld [vmem:[%s3595_s4 + $0x74] ss:$8 sps:$4 sm:$0xff]  }
  0x9c   :  { %1515 = vmatpush1.bf16.msra.mxu1 %v2597_v43  ;;  %1475 = vmatprep.subr.bf16.mxu0 %v2602_v44  ;;  %v2692_v43 = vld [vmem:[%s3595_s4 + $0x70] ss:$8 sps:$4 sm:$0xff]   ;;  %v2697_v44 = vld [vmem:[%s3595_s4 + $0x84] ss:$8 sps:$4 sm:$0xff]  }
  0x9d   :  { %1516 = vmatprep.subr.bf16.mxu1 %v2605_v45  ;;  %v2695_v45 = vld [vmem:[%s3595_s4 + $0x80] ss:$8 sps:$4 sm:$0xff]  }
  0x9f   :  { %1476 = vmatpush1.bf16.msra.mxu0 %v2600_v46  ;;  %v2700_v46 = vld [vmem:[%s3595_s4 + $0x94] ss:$8 sps:$4 sm:$0xff]  }
  0xa0   :  { %1517 = vmatpush1.bf16.msra.mxu1 %v2603_v47  ;;  %1477 = vmatprep.subr.bf16.mxu0 %v2608_v48  ;;  %v2698_v47 = vld [vmem:[%s3595_s4 + $0x90] ss:$8 sps:$4 sm:$0xff]  }
  0xa1   :  { %1518 = vmatprep.subr.bf16.mxu1 %v2611_v49 }
  0xa3   :  { %1478 = vmatpush1.bf16.msra.mxu0 %v2606_v50 }
  0xa4   :  { %1519 = vmatpush1.bf16.msra.mxu1 %v2609_v51  ;;  %1479 = vmatprep.subr.bf16.mxu0 %v2614_v52 }
  0xa5   :  { %1520 = vmatprep.subr.bf16.mxu1 %v2617_v53 }
  0xa7   :  { %1480 = vmatpush1.bf16.msra.mxu0 %v2612_v54 }
  0xa8   :  { %1521 = vmatpush1.bf16.msra.mxu1 %v2615_v55  ;;  %1481 = vmatprep.subr.bf16.mxu0 %v2620_v56  ;;  %v2703_v56 = vld [vmem:[%s3595_s4 + $0xa4] ss:$8 sps:$4 sm:$0xff]  }
  0xa9   :  { %1522 = vmatprep.subr.bf16.mxu1 %v2623_v57 }
  0xab   :  { %1482 = vmatpush1.bf16.msra.mxu0 %v2618_v58 }
  0xac   :  { %1523 = vmatpush1.bf16.msra.mxu1 %v2621_v59  ;;  %1483 = vmatprep.subr.bf16.mxu0 %v2626_v60  ;;  %v2701_v59 = vld [vmem:[%s3595_s4 + $0xa0] ss:$8 sps:$4 sm:$0xff]   ;;  %v2706_v60 = vld [vmem:[%s3595_s4 + $0xb4] ss:$8 sps:$4 sm:$0xff]  }
  0xad   :  { %1524 = vmatprep.subr.bf16.mxu1 %v2629_v61  ;;  %v2704_v61 = vld [vmem:[%s3595_s4 + $0xb0] ss:$8 sps:$4 sm:$0xff]  }
  0xaf   :  { %1484 = vmatpush1.bf16.msra.mxu0 %v2624_v62  ;;  %v2709_v62 = vld [vmem:[%s3595_s4 + $0xc4] ss:$8 sps:$4 sm:$0xff]  }
  0xb0   :  { %1525 = vmatpush1.bf16.msra.mxu1 %v2627_v63  ;;  %1485 = vmatprep.subr.bf16.mxu0 %v2632_v0  ;;  %v2707_v63 = vld [vmem:[%s3595_s4 + $0xc0] ss:$8 sps:$4 sm:$0xff]   ;;  %v2712_v0 = vld [vmem:[%s3595_s4 + $0xd4] ss:$8 sps:$4 sm:$0xff]  }
  0xb1   :  { %1526 = vmatprep.subr.bf16.mxu1 %v2635_v1  ;;  %v2710_v1 = vld [vmem:[%s3595_s4 + $0xd0] ss:$8 sps:$4 sm:$0xff]  }
  0xb3   :  { %1486 = vmatpush1.bf16.msra.mxu0 %v2630_v2  ;;  %v2715_v2 = vld [vmem:[%s3595_s4 + $0xe4] ss:$8 sps:$4 sm:$0xff]  }
  0xb4   :  { %1527 = vmatpush1.bf16.msra.mxu1 %v2633_v3  ;;  %1487 = vmatprep.subr.bf16.mxu0 %v2638_v4  ;;  %v2713_v3 = vld [vmem:[%s3595_s4 + $0xe0] ss:$8 sps:$4 sm:$0xff]   ;;  %v2718_v4 = vld [vmem:[%s3595_s4 + $0xf4] ss:$8 sps:$4 sm:$0xff]  }
  0xb5   :  { %1528 = vmatprep.subr.bf16.mxu1 %v2641_v5  ;;  %v2716_v5 = vld [vmem:[%s3595_s4 + $0xf0] ss:$8 sps:$4 sm:$0xff]  }
  0xb7   :  { %1488 = vmatpush1.bf16.msra.mxu0 %v2636_v6  ;;  %v2719_v6 = vld [vmem:[%s3596_s7 + $0x40] sm:$0xff]  }
  0xb8   :  { %1529 = vmatpush1.bf16.msra.mxu1 %v2639_v7  ;;  %1489 = vmatprep.subr.bf16.mxu0 %v2644_v8  ;;  %v2720_v7 = vld [vmem:[%s3596_s7] sm:$0xff]   ;;  %v2721_v8 = vld [vmem:[%s3596_s7 + $0x48] sm:$0xff]  }
  0xb9   :  { %1530 = vmatprep.subr.bf16.mxu1 %v2647_v9  ;;  %v2722_v9 = vld [vmem:[%s3596_s7 + $0x8] sm:$0xff]  }
  0xbb   :  { %1490 = vmatpush1.bf16.msra.mxu0 %v2642_v10  ;;  %v2723_v10 = vld [vmem:[%s3596_s7 + $0x50] sm:$0xff]  }
  0xbc   :  { %1531 = vmatpush1.bf16.msra.mxu1 %v2645_v11  ;;  %1491 = vmatprep.subr.bf16.mxu0 %v2650_v12  ;;  %v2724_v11 = vld [vmem:[%s3596_s7 + $0x10] sm:$0xff]   ;;  %v2725_v12 = vld [vmem:[%s3596_s7 + $0x58] sm:$0xff]  }
  0xbd   :  { %1532 = vmatprep.subr.bf16.mxu1 %v2653_v13  ;;  %v2726_v13 = vld [vmem:[%s3596_s7 + $0x18] sm:$0xff]  }
  0xbf   :  { %1492 = vmatpush1.bf16.msra.mxu0 %v2648_v14  ;;  %v2727_v14 = vld [vmem:[%s3596_s7 + $0x60] sm:$0xff]  }
  0xc0   :  { %1533 = vmatpush1.bf16.msra.mxu1 %v2651_v15  ;;  %1543 = vmatprep.subr.bf16.mxu0 %v2658_v16  ;;  %v2728_v15 = vld [vmem:[%s3596_s7 + $0x20] sm:$0xff]   ;;  %v2729_v16 = vld [vmem:[%s3596_s7 + $0x68] sm:$0xff]  }
  0xc1   :  { %1831 = vmatprep.subr.bf16.mxu1 %v2673_v29 }
  0xc2   :  { %1494 = vmatmul.mubr.bf16.vlgmr.msra.gmra.mrb[8].mxu0 %v2080_v17  ;;  %v2730_v17 = vld [vmem:[%s3596_s7 + $0x28] sm:$0xff]  }
  0xc3   :  { %1535 = vmatmul.mubr.bf16.vlgmr.msra.gmra.mrb[8].mxu1 %v2082_v19  ;;  %1544 = vmatpush1.bf16.msra.mxu0 %v2656_v21 }
  0xc4   :  { %1575 = vmatprep.mubr.bf16.mxu0 %v2735_v23  ;;  %1545 = vmatprep.subr.bf16.mxu0 %v2663_v22 }
  0xc5   :  { %1832 = vmatpush1.bf16.msra.mxu1 %v2671_v28 }
  0xc6   :  { %1833 = vmatprep.subr.bf16.mxu1 %v2676_v30 }
  0xc7   :  { %1546 = vmatpush1.bf16.msra.mxu0 %v2661_v18 }
  0xc8   :  { %1547 = vmatprep.subr.bf16.mxu0 %v2666_v20 }
  0xc9   :  { %1834 = vmatpush1.bf16.msra.mxu1 %v2674_v31 }
  0xca   :  { %1835 = vmatprep.subr.bf16.mxu1 %v2679_v32 }
  0xcb   :  { %1548 = vmatpush1.bf16.msra.mxu0 %v2664_v24 }
  0xcc   :  { %1549 = vmatprep.subr.bf16.mxu0 %v2669_v25 }
  0xcd   :  { %1836 = vmatpush1.bf16.msra.mxu1 %v2677_v33 }
  0xce   :  { %1837 = vmatprep.subr.bf16.mxu1 %v2682_v34 }
  0xcf   :  { %1550 = vmatpush1.bf16.msra.mxu0 %v2667_v26 }
  0xd0   :  { %2335 = vmatprep.subr.bf16.mxu0 %v2719_v6  ;;  %v1659_v6 = vld [vmem:[%s3599_s5] sm:$0x3] }
  0xd1   :  { %1838 = vmatpush1.bf16.msra.mxu1 %v2680_v35 }
  0xd2   :  { %2285 = vmatmul.mubr.msk.bf16.vlgmr.msra.gmra.mrb[12].mxu0 %vm1293_vm0, %v2670_v27  ;;  %1839 = vmatprep.subr.bf16.mxu1 %v2685_v36 }
  0xd3   :  { %2336 = vmatpush3.bf16.msra.mxu0 %v2720_v7  ;;  %v1874_v7 = vld [vmem:[%s3600_s6] sm:$0x3] }
  0xd4   :  { %2337 = vmatprep.subr.bf16.mxu0 %v2721_v8 }
  0xd5   :  { %1840 = vmatpush1.bf16.msra.mxu1 %v2683_v37 }
  0xd6   :  { %1841 = vmatprep.subr.bf16.mxu1 %v2688_v38 }
  0xd7   :  { %2338 = vmatpush3.bf16.msra.mxu0 %v2722_v9 }
  0xd8   :  { %2339 = vmatprep.subr.bf16.mxu0 %v2723_v10 }
  0xd9   :  { %1842 = vmatpush1.bf16.msra.mxu1 %v2686_v39 }
  0xda   :  { %1843 = vmatprep.subr.bf16.mxu1 %v2691_v40 }
  0xdb   :  { %2340 = vmatpush3.bf16.msra.mxu0 %v2724_v11 }
  0xdc   :  { %2341 = vmatprep.subr.bf16.mxu0 %v2725_v12 }
  0xdd   :  { %1844 = vmatpush1.bf16.msra.mxu1 %v2689_v41  ;;  %v1595_v41 = vlaneseq }
  0xde   :  { %1845 = vmatprep.subr.bf16.mxu1 %v2694_v42 }
  0xdf   :  { %2342 = vmatpush3.bf16.msra.mxu0 %v2726_v13 }
  0xe0   :  { %2343 = vmatprep.subr.bf16.mxu0 %v2727_v14 }
  0xe1   :  { %1846 = vmatpush1.bf16.msra.mxu1 %v2692_v43  ;;  %v1596_v43 = vshrl.u32 %v1595_v41, 7 }
  0xe2   :  { %1847 = vmatprep.subr.bf16.mxu1 %v2697_v44 }
  0xe3   :  { %2344 = vmatpush3.bf16.msra.mxu0 %v2728_v15  ;;  %v1597_v44 = vsub.s32 0, %v1596_v43 }
  0xe4   :  { %2345 = vmatprep.subr.bf16.mxu0 %v2729_v16 }
  0xe5   :  { %1848 = vmatpush1.bf16.msra.mxu1 %v2695_v45  ;;  %v1593_v45 = vld [vmem:[%s3597_s2] sm:$0x3]  ;;  %v1664_v8 = vrot.slane %v1659_v6, %v1597_v44  ;;  %v1879_v10 = vrot.slane %v1874_v7, %v1597_v44 }
  0xe6   :  { %1849 = vmatprep.subr.bf16.mxu1 %v2700_v46  ;;  %v1601_v46 = vsub.s32 1, %v1596_v43 }
  0xe7   :  { %2346 = vmatpush3.bf16.msra.mxu0 %v2730_v17 }
  0xe8   :  { %v1668_v9 = vrot.slane %v1659_v6, %v1601_v46  ;;  %v1883_v12 = vrot.slane %v1874_v7, %v1601_v46 }
  0xe9   :  { %1850 = vmatpush1.bf16.msra.mxu1 %v2698_v47  ;;  %v1609_v47 = vld [vmem:[%s3598_s3] sm:$0x3] }
  0xea   :  { %1851 = vmatprep.subr.bf16.mxu1 %v2703_v56 }
  0xed   :  { %1852 = vmatpush1.bf16.msra.mxu1 %v2701_v59 }
  0xee   :  { %1853 = vmatprep.subr.bf16.mxu1 %v2706_v60 }
  0xf1   :  { %1854 = vmatpush1.bf16.msra.mxu1 %v2704_v61 }
  0xf2   :  { %1855 = vmatprep.subr.bf16.mxu1 %v2709_v62 }
  0xf5   :  { %1856 = vmatpush1.bf16.msra.mxu1 %v2707_v63 }
  0xf6   :  { %1857 = vmatprep.subr.bf16.mxu1 %v2712_v0 }
  0xf9   :  { %1858 = vmatpush1.bf16.msra.mxu1 %v2710_v1 }
  0xfa   :  { %1859 = vmatprep.subr.bf16.mxu1 %v2715_v2  ;;  %v2731_v2 = vld [vmem:[%s3596_s7 + $0x70] sm:$0xff]  }
  0xfb   :  { %2347 = vmatprep.subr.bf16.mxu0 %v2731_v2 }
  0xfd   :  { %1860 = vmatpush1.bf16.msra.mxu1 %v2713_v3  ;;  %v2732_v3 = vld [vmem:[%s3596_s7 + $0x30] sm:$0xff]  }
  0xfe   :  { %1861 = vmatprep.subr.bf16.mxu1 %v2718_v4  ;;  %2348 = vmatpush3.bf16.msra.mxu0 %v2732_v3  ;;  %v2733_v4 = vld [vmem:[%s3596_s7 + $0x78] sm:$0xff]  }
  0xff   :  { %2349 = vmatprep.subr.bf16.mxu0 %v2733_v4 }
 0x101   :  { %1862 = vmatpush1.bf16.msra.mxu1 %v2716_v5  ;;  %v2734_v5 = vld [vmem:[%s3596_s7 + $0x38] sm:$0xff]  }
 0x102   :  { %2350 = vmatpush3.bf16.msra.mxu0 %v2734_v5 }
 0x115   :  { %v1331_v48 = vpop.f32.mrb[0].mxu0 }
 0x116   :  { %v1372_v49 = vpop.f32.mrb[0].mxu1  ;;  %v1333_v51 = vpop.f32.mrb[1].mxu0 }
 0x117   :  { %v1373_v50 = vadd.f32 %v1372_v49, %v1331_v48  ;;  %v1374_v52 = vpop.f32.mrb[1].mxu1  ;;  %v1335_v54 = vpop.f32.mrb[2].mxu0  ;;  %v1598_v48 = vrot.slane %v1593_v45, %v1597_v44 }
 0x118   :  { %v1375_v53 = vadd.f32 %v1374_v52, %v1333_v51  ;;  %v1376_v55 = vpop.f32.mrb[2].mxu1  ;;  %v1336_v57 = vpop.f32.mrb[3].mxu0  ;;  %v1614_v52 = vrot.slane %v1609_v47, %v1597_v44 }
 0x119   :  { %v1377_v58 = vpop.f32.mrb[3].mxu1  ;;  %v1618_v55 = vrot.slane %v1609_v47, %v1601_v46 }
 0x155   :  { %v1413_v19 = vpop.f32.mrb[4].mxu0 }
 0x156   :  { %v1454_v21 = vpop.f32.mrb[4].mxu1  ;;  %v1414_v22 = vadd.f32 %v1413_v19, %v1373_v50  ;;  %v1415_v18 = vpop.f32.mrb[5].mxu0  ;;  %v1602_v50 = vrot.slane %v1593_v45, %v1601_v46 }
 0x157   :  { %v1456_v23 = vpop.f32.mrb[5].mxu1  ;;  %v1416_v20 = vadd.f32 %v1415_v18, %v1375_v53  ;;  %v1417_v24 = vpop.f32.mrb[6].mxu0 }
 0x158   :  { %v1458_v25 = vpop.f32.mrb[6].mxu1  ;;  %v1455_v26 = vadd.f32 %v1454_v21, %v1414_v22  ;;  %v1418_v27 = vpop.f32.mrb[7].mxu0 }
 0x159   :  { %v1459_v28 = vpop.f32.mrb[7].mxu1  ;;  %v1457_v29 = vadd.f32 %v1456_v23, %v1416_v20  ;;  %v2318_v25 = vld [vmem:[%s3601_s8] ss:$0 sm:$0xff] }
 0x195   :  { %v1495_v30 = vpop.f32.mrb[8].mxu0 }
 0x196   :  { %v1536_v31 = vpop.f32.mrb[8].mxu1  ;;  %v1496_v32 = vadd.f32 %v1495_v30, %v1455_v26  ;;  %v1497_v33 = vpop.f32.mrb[9].mxu0 }
 0x197   :  { %v1538_v34 = vpop.f32.mrb[9].mxu1  ;;  %v1498_v35 = vadd.f32 %v1497_v33, %v1457_v29  ;;  %v1499_v36 = vpop.f32.mrb[10].mxu0 }
 0x198   :  { %v1540_v37 = vpop.f32.mrb[10].mxu1  ;;  %v1537_v38 = vadd.f32 %v1536_v31, %v1496_v32  ;;  %v1500_v39 = vpop.f32.mrb[11].mxu0 }
 0x199   :  { %v1541_v40 = vpop.f32.mrb[11].mxu1  ;;  %v1539_v42 = vadd.f32 %v1538_v34, %v1498_v35 }
 0x1a5   :  { %v1577_v49 = vpop.f32.mrb[12].mxu0 }
 0x1a6   :  { %v1578_v51 = vadd.f32 %v1577_v49, %v1537_v38  ;;  %v1579_v53 = vpop.f32.mrb[13].mxu0 }
 0x1a7   :  { %v1580_v54 = vadd.f32 %v1579_v53, %v1539_v42  ;;  %v1581_v56 = vpop.f32.mrb[14].mxu0 }
 0x1a8   :  { %v1605_v57 = vadd.f32 %v1598_v48, %v1578_v51  ;;  %v1582_v58 = vpop.f32.mrb[15].mxu0 }
 0x1a9   :  { %v1606_v59 = vadd.f32 %v1602_v50, %v1580_v54 }
 0x1aa   :  { %vm1607_vm1 = vcmp.gt.f32.partialorder %v1605_v57, 0.0  ;;  %v1621_v60 = vmul.f32 %v1614_v52, %v1605_v57 }
 0x1ab   :  { %v1622_v61 = vmul.f32 %v1618_v55, %v1606_v59  ;;  %vm1608_vm2 = vcmp.gt.f32.partialorder %v1606_v59, 0.0 }
 0x1ac   :  { %v1623_v62 = vsel %vm1607_vm1, %v1605_v57, %v1621_v60 }
 0x1ad   :  { %v1624_v63 = vsel %vm1608_vm2, %v1606_v59, %v1622_v61  ;;  %v1625_v1 = vpack.c.bf16 %v1623_v62, %v1623_v62 }
 0x1ae   :  { %v1626_v0 = vpack.c.bf16 %v1624_v63, %v1624_v63 }
 0x1b0   :  { %1863 = vmatprep.mubr.bf16.mxu1 %v1626_v0 }
 0x1b1   :  { %1864 = vmatmul.mubr.bf16.vlgmr.msra.gmra.mrb[12].mxu1 %v1625_v1 }
 0x284   :  { %v1865_v11 = vpop.f32.mrb[12].mxu1 }
 0x285   :  { %v1866_v13 = vadd.f32 %v1865_v11, %v1664_v8  ;;  %v1867_v14 = vpop.f32.mrb[13].mxu1 }
 0x286   :  { %v1868_v15 = vadd.f32 %v1867_v14, %v1668_v9  ;;  %v1869_v16 = vpop.f32.mrb[14].mxu1 }
 0x287   :  { %vm1872_vm3 = vcmp.gt.f32.partialorder %v1866_v13, 0.0  ;;  %v1886_v17 = vmul.f32 %v1879_v10, %v1866_v13  ;;  %v1870_v19 = vpop.f32.mrb[15].mxu1 }
 0x288   :  { %vm1873_vm4 = vcmp.gt.f32.partialorder %v1868_v15, 0.0  ;;  %v1887_v21 = vmul.f32 %v1883_v12, %v1868_v15 }
 0x289   :  { %v1888_v22 = vsel %vm1872_vm3, %v1866_v13, %v1886_v17 }
 0x28a   :  { %v1889_v18 = vsel %vm1873_vm4, %v1868_v15, %v1887_v21  ;;  %v1890_v20 = vpack.c.bf16 %v1888_v22, %v1888_v22 }
 0x28b   :  { %v1891_v23 = vpack.c.bf16 %v1889_v18, %v1889_v18 }
 0x28d   :  { %2059 = vmatprep.mubr.bf16.mxu0 %v1891_v23 }
 0x28e   :  { %2060 = vmatmul.mubr.bf16.vlgmr.msra.gmra.mrb[16].mxu0 %v1890_v20 }
 0x361   :  { %v2351_v24 = vpop.f32.mrb[16].mxu0 }
 0x362   :  { %v2352_v26 = vpop.f32.mrb[17].mxu0 }
 0x363   :  { %v2353_v27 = vadd.f32 %v2352_v26, %v2351_v24  ;;  %v2354_v28 = vpop.f32.mrb[18].mxu0 }
 0x364   :  { %v2355_v29 = vpop.f32.mrb[19].mxu0 }
 0x365   :  { %v2062_v30 = vadd.f32 %v2353_v27, %v2318_v25 }
 0x367   :  { %2067 = vst [vmem:[%s3602_s9] sm:$0xff] %v2062_v30 }

</bundles_post_ra>
